<compile_context>
chip_gen: v7x
topology: tpu7x:2x2x1
jax: 0.10.0
libtpu: 0.0.40
codegen_flags: <defaults>
</compile_context>

<pallas_src>
import jax
import jax.numpy as jnp
from jax.experimental import pallas as pl
from jax.experimental.pallas import tpu as pltpu

HIDDEN = 512       # __C.HIDDEN_SIZE (pinned by soft_weights=Linear(512,2) and .view(...,512))
VIS_DIM = 1024     # linear_vs = nn.Linear(1024, HIDDEN)
SELECT_NUM = 16    # __C.SELECT_NUM
CLASS_NUM = 8      # __C.CLASS_NUM  -> box channels = CLASS_NUM + 5 = 13
ANCHORS = 3        # anchors per grid cell
TEMP = 0.03        # LogSoftmax temperature


def _refclip_head_kernel(x_ref, tagf_ref, posf_ref, lan_ref,
                         wvs_ref, bvs_ref, wd_ref, bd_ref,
                         wte_ref, wpe_ref, wvp_ref, wtag_ref, bcat_ref,
                         sim_ref):
    # Stand-in tag / position encoders, fused into the kernel (tiny-K matmuls).
    # TODO(synk): process_yolov3_output / tag_encoder are external modules not given in
    # the reference; these linear stand-ins mirror the previous revision's wrapper code.
    tag = jnp.dot(tagf_ref[...], wte_ref[...], preferred_element_type=jnp.float32)
    pos = jnp.dot(posf_ref[...], wpe_ref[...], preferred_element_type=jnp.float32)

    # visual_emb = linear_vs(i_new)            (bf16 operands, f32 accumulate)
    vis = jnp.dot(x_ref[...], wvs_ref[...], preferred_element_type=jnp.float32) + bvs_ref[...]

    # weights = LogSoftmax(soft_weights(vis + tag + pos) / 0.03, dim=-1)
    # folded to a matvec on the class-difference direction + log-sigmoid forms.
    fused = vis + tag + pos
    d = (jnp.sum(fused * wd_ref[...], axis=-1, keepdims=True) + bd_ref[...]) * (1.0 / TEMP)
    logw0 = -jax.nn.softplus(d)      # == log_softmax(logits / T)[..., 0]
    logw1 = -jax.nn.softplus(-d)     # == log_softmax(logits / T)[..., 1]

    # visual_emb = linear_vs_pos(vis * w0) + linear_tag(tag * w1) + pos
    # (two accumulated K=512 dots instead of one concatenated K=1024 dot)
    ve = (jnp.dot((vis * logw0).astype(jnp.bfloat16), wvp_ref[...],
                  preferred_element_type=jnp.float32)
          + jnp.dot((tag * logw1).astype(jnp.bfloat16), wtag_ref[...],
                    preferred_element_type=jnp.float32)
          + bcat_ref[...] + pos)

    # WeakREChead (eval): cosine similarity between each anchor embedding and the sentence.
    # TODO(synk): WeakREChead internals are not provided; cosine-sim + argmax prediction is
    # the standard RefCLIP eval behaviour.
    inv = jax.lax.rsqrt(jnp.maximum(jnp.sum(ve * ve, axis=-1, keepdims=True), 1e-24))
    ve_n = ve * inv

    # Broadcast the per-batch (pre-normalized) language feature to per-anchor rows
    # in-register; reps is a multiple of 8 so the reshape is layout-preserving.
    bpt, h = lan_ref.shape
    reps = x_ref.shape[0] // bpt
    lan_rows = jnp.broadcast_to(lan_ref[...][:, None, :], (bpt, reps, h)).reshape(bpt * reps, h)

    sim_ref[...] = jnp.sum(ve_n * lan_rows, axis=-1, keepdims=True)     # (rpt, 1)


def _tensorcores_per_chip():
    """Best-effort TensorCore count; defaults to 1 (never over-split the grid)."""
    try:
        info = pltpu.get_tpu_info()
    except Exception:
        return 1
    for name in ("num_tensorcores", "tensorcore_count", "num_cores", "core_count"):
        v = getattr(info, name, None)
        if isinstance(v, int) and v > 0:
            return v
    return 1


def refclip_head(i_new, tagfeat, posfeat, lang_flat, p):
    bs, selnum, vdim = i_new.shape
    h = HIDDEN
    rows = bs * selnum
    tag_ch = tagfeat.shape[-1]
    pos_ch = posfeat.shape[-1]

    # --- hoisted language branch: linear_ts + L2 normalization, one matmul for the batch ---
    lan = jnp.dot(lang_flat, p["w_ts"], preferred_element_type=jnp.float32) + p["b_ts"]
    lan = (lan / jnp.maximum(jnp.linalg.norm(lan, axis=-1, keepdims=True), 1e-12)
           ).astype(jnp.float32)                                        # (bs, h)

    # --- flatten batch into the matmul M dimension (rows are batch-major), bf16 streams ---
    x_rows = i_new.reshape(rows, vdim).astype(jnp.bfloat16)
    tag_rows = tagfeat.reshape(rows, tag_ch).astype(jnp.bfloat16)
    pos_rows = posfeat.reshape(rows, pos_ch).astype(jnp.bfloat16)

    # --- packed / folded weights: bf16 at the matmul boundary, f32 biases ---
    w_vs = p["w_vs"].astype(jnp.bfloat16)                               # (1024, 512)
    b_vs = p["b_vs"].reshape(1, h).astype(jnp.float32)
    w_d = (p["w_sw"][:, 1] - p["w_sw"][:, 0]).reshape(1, h).astype(jnp.float32)
    b_d = (p["b_sw"][..., 1] - p["b_sw"][..., 0]).reshape(1, 1).astype(jnp.float32)
    w_vp = p["w_vp"].astype(jnp.bfloat16)                               # (512, 512)
    w_tag = p["w_tag"].astype(jnp.bfloat16)                             # (512, 512)
    b_cat = (p["b_vp"] + p["b_tag"]).reshape(1, h).astype(jnp.float32)
    w_te = p["w_tagenc"].astype(jnp.bfloat16)                           # (8, 512)
    w_pe = p["w_posenc"].astype(jnp.bfloat16)                           # (4, 512)

    # Grid sizing: one big row-tile keeps the ~2 MiB of weights resident and avoids
    # per-step overhead on single-TC v5e/v6e.  Only megacore-split when >1 TC is
    # reported AND there are >= 512 rows (>= 256 rows / tile) with aligned blocks,
    # so the replicated weight DMA on v7x is amortized.
    can_split = (bs % 2 == 0) and ((bs // 2) % 8 == 0) and (selnum % 16 == 0)
    ntiles = 2 if (_tensorcores_per_chip() > 1 and rows >= 512 and can_split) else 1
    rpt = rows // ntiles
    bpt = bs // ntiles

    def wspec(shape):
        return pl.BlockSpec(shape, lambda g: (0,) * len(shape))

    sim = pl.pallas_call(
        _refclip_head_kernel,
        out_shape=jax.ShapeDtypeStruct((rows, 1), jnp.float32),
        grid_spec=pltpu.PrefetchScalarGridSpec(
            num_scalar_prefetch=0,
            grid=(ntiles,),
            in_specs=[
                pl.BlockSpec((rpt, vdim), lambda g: (g, 0)),    # selected visual rows (bf16)
                pl.BlockSpec((rpt, tag_ch), lambda g: (g, 0)),  # tag-encoder inputs (bf16)
                pl.BlockSpec((rpt, pos_ch), lambda g: (g, 0)),  # position-encoder inputs (bf16)
                pl.BlockSpec((bpt, h), lambda g: (g, 0)),       # per-batch normalized language (f32)
                wspec((vdim, h)), wspec((1, h)),                # linear_vs
                wspec((1, h)), wspec((1, 1)),                   # soft_weights (folded to a matvec)
                wspec((tag_ch, h)), wspec((pos_ch, h)),         # tag / position encoder stand-ins
                wspec((h, h)), wspec((h, h)), wspec((1, h)),    # linear_vs_pos, linear_tag, summed bias
            ],
            out_specs=pl.BlockSpec((rpt, 1), lambda g: (g, 0)),
        ),
        compiler_params=pltpu.CompilerParams(dimension_semantics=("parallel",)),
    )(x_rows, tag_rows, pos_rows, lan,
      w_vs, b_vs, w_d, b_d, w_te, w_pe, w_vp, w_tag, b_cat)

    # Rows are batch-major, so this is a pure metadata reshape (no transpose / data movement).
    return sim.reshape(bs, selnum)[:, None, :]                          # (bs, 1, selnum)


def get_boxes_jax(sel_boxes, predictions, class_num):
    """JAX port of get_boxes (predictions has exactly one True per batch row)."""
    mask = predictions[:, 0, :]                                         # (bs, selnum) bool
    sel_idx = jnp.argmax(mask.astype(jnp.int32), axis=-1)               # (bs,)
    picked = jnp.take_along_axis(
        sel_boxes, sel_idx[:, None, None, None], axis=1)[:, 0]          # (bs, anchors, ch)
    c0, c1, c2, c3 = picked[..., 0], picked[..., 1], picked[..., 2], picked[..., 3]
    x1 = c0 - c2 / 2
    y1 = c1 - c3 / 2
    x2 = x1 + c2
    y2 = y1 + c3
    boxes = jnp.concatenate(
        [jnp.stack([x1, y1, x2, y2], axis=-1), picked[..., 4:]], axis=-1)
    score = boxes[:, :, 4]
    ind = jnp.argmax(score, axis=-1)                                    # (bs,)
    box_new = jnp.take_along_axis(boxes[..., :5], ind[:, None, None], axis=1)  # (bs, 1, 5)
    return box_new


def net_forward(boxes_s, feat_s, lang_flat, params):
    """Eval-mode forward of RefCLIP Net.  boxes_s / feat_s / lang_flat stand in for the
    (frozen) visual_encoder small-scale output, the MultiScaleFusion-fused feature map
    x_[0] (NCHW, 1024 ch) and lang_encoder's 'flat_lang_feat'."""
    bs, gridnum, anncornum, ch = boxes_s.shape
    # TODO(synk): visual_encoder / lang_encoder / MultiScaleFusion are external modules
    # not given in the reference; their outputs are taken as synthetic inputs here.

    # Select top SELECT_NUM grid cells by mean objectness (channel 4).
    mean_i = jnp.mean(boxes_s, axis=2)[:, :, 4]                         # (bs, gridnum)
    _, indices = jax.lax.top_k(mean_i, SELECT_NUM)
    # masked_select over a scatter-built mask returns rows in grid order (not top-k order):
    idx = jnp.sort(indices, axis=1)
    sel_boxes = jnp.take_along_axis(boxes_s, idx[:, :, None, None], axis=1)  # (bs, sel, 3, 13)

    # x_[0]: NCHW -> (bs, h*w, c), then select the same grid cells.
    b, c, h, w = feat_s.shape
    i_flat = jnp.transpose(feat_s.reshape(b, c, h * w), (0, 2, 1))
    i_new = jnp.take_along_axis(i_flat, idx[:, :, None], axis=1)        # (bs, sel, 1024)

    # Raw tag / position encoder inputs (the encoders themselves are fused in the kernel).
    tagfeat = sel_boxes[:, :, 0, 5:]                                    # (bs, sel, CLASS_NUM)
    posfeat = sel_boxes[:, :, 0, :4]                                    # (bs, sel, 4)

    sim = refclip_head(i_new, tagfeat, posfeat, lang_flat, params)      # (bs, 1, sel)

    # predictions_s: one-hot mask of the max-similarity anchor.
    # (exact ties would mark multiple anchors; get_boxes_jax picks the first, matching argmax)
    pred = sim == jnp.max(sim, axis=-1, keepdims=True)                  # bool (bs, 1, sel)

    box_pred = get_boxes_jax(sel_boxes, pred, CLASS_NUM)                # (bs, 1, 5)
    return box_pred, sim


if __name__ == "__main__":
    key = jax.random.PRNGKey(0)
    ks = jax.random.split(key, 12)

    bs = 2
    grid_hw = 8
    gridnum = grid_hw * grid_hw
    ch = CLASS_NUM + 5

    # Deterministic synthetic stand-ins for the external encoders' outputs.
    boxes_s = jax.random.uniform(ks[0], (bs, gridnum, ANCHORS, ch), jnp.float32)
    feat_s = jax.random.normal(ks[1], (bs, VIS_DIM, grid_hw, grid_hw), jnp.float32)  # NCHW
    lang_flat = jax.random.normal(ks[2], (bs, HIDDEN), jnp.float32)

    s = 0.02
    params = dict(
        w_vs=jax.random.normal(ks[3], (VIS_DIM, HIDDEN), jnp.float32) * s,
        b_vs=jnp.zeros((1, HIDDEN), jnp.float32),
        w_ts=jax.random.normal(ks[4], (HIDDEN, HIDDEN), jnp.float32) * s,
        b_ts=jnp.zeros((1, HIDDEN), jnp.float32),
        w_sw=jax.random.normal(ks[5], (HIDDEN, 2), jnp.float32) * s,
        b_sw=jnp.zeros((1, 2), jnp.float32),
        w_vp=jax.random.normal(ks[6], (HIDDEN, HIDDEN), jnp.float32) * s,
        b_vp=jnp.zeros((1, HIDDEN), jnp.float32),
        w_tag=jax.random.normal(ks[7], (HIDDEN, HIDDEN), jnp.float32) * s,
        b_tag=jnp.zeros((1, HIDDEN), jnp.float32),
        w_tagenc=jax.random.normal(ks[8], (CLASS_NUM, HIDDEN), jnp.float32) * s,
        w_posenc=jax.random.normal(ks[9], (4, HIDDEN), jnp.float32) * s,
    )

    box_pred, sim = jax.jit(net_forward)(boxes_s, feat_s, lang_flat, params)
    jax.block_until_ready((box_pred, sim))
    assert box_pred.shape == (bs, 1, 5)
    assert sim.shape == (bs, 1, SELECT_NUM)
    print("KERNEL_OK")
</pallas_src>

<mosaic_0001>
module attributes {stable_mosaic.version = 11 : i64} {
  func.func @_refclip_head_kernel(%arg0: i32, %arg1: memref<32x1024xbf16, #tpu.memory_space<vmem>>, %arg2: memref<32x8xbf16, #tpu.memory_space<vmem>>, %arg3: memref<32x4xbf16, #tpu.memory_space<vmem>>, %arg4: memref<2x512xf32, #tpu.memory_space<vmem>>, %arg5: memref<1024x512xbf16, #tpu.memory_space<vmem>>, %arg6: memref<1x512xf32, #tpu.memory_space<vmem>>, %arg7: memref<1x512xf32, #tpu.memory_space<vmem>>, %arg8: memref<1x1xf32, #tpu.memory_space<vmem>>, %arg9: memref<8x512xbf16, #tpu.memory_space<vmem>>, %arg10: memref<4x512xbf16, #tpu.memory_space<vmem>>, %arg11: memref<512x512xbf16, #tpu.memory_space<vmem>>, %arg12: memref<512x512xbf16, #tpu.memory_space<vmem>>, %arg13: memref<1x512xf32, #tpu.memory_space<vmem>>, %arg14: memref<32x1xf32, #tpu.memory_space<vmem>>) attributes {dimension_semantics = [#tpu.dimension_semantics<parallel>], iteration_bounds = array<i64: 1>, scalar_prefetch = 0 : i64, scratch_operands = 0 : i64, tpu.core_type = #tpu.core_type<tc>, window_params = [{transform_indices = @transform_0, window_bounds = array<i64: 32, 1024>}, {transform_indices = @transform_1, window_bounds = array<i64: 32, 8>}, {transform_indices = @transform_2, window_bounds = array<i64: 32, 4>}, {transform_indices = @transform_3, window_bounds = array<i64: 2, 512>}, {pipeline_mode = #tpu.pipeline_mode<synchronous>, transform_indices = @transform_4, window_bounds = array<i64: 1024, 512>}, {pipeline_mode = #tpu.pipeline_mode<synchronous>, transform_indices = @transform_5, window_bounds = array<i64: 1, 512>}, {pipeline_mode = #tpu.pipeline_mode<synchronous>, transform_indices = @transform_6, window_bounds = array<i64: 1, 512>}, {pipeline_mode = #tpu.pipeline_mode<synchronous>, transform_indices = @transform_7, window_bounds = array<i64: 1, 1>}, {pipeline_mode = #tpu.pipeline_mode<synchronous>, transform_indices = @transform_8, window_bounds = array<i64: 8, 512>}, {pipeline_mode = #tpu.pipeline_mode<synchronous>, transform_indices = @transform_9, window_bounds = array<i64: 4, 512>}, {pipeline_mode = #tpu.pipeline_mode<synchronous>, transform_indices = @transform_10, window_bounds = array<i64: 512, 512>}, {pipeline_mode = #tpu.pipeline_mode<synchronous>, transform_indices = @transform_11, window_bounds = array<i64: 512, 512>}, {pipeline_mode = #tpu.pipeline_mode<synchronous>, transform_indices = @transform_12, window_bounds = array<i64: 1, 512>}, {transform_indices = @transform_13, window_bounds = array<i64: 32, 1>}]} {
    %c0 = arith.constant 0 : index
    %c0_0 = arith.constant 0 : index
    %0 = vector.load %arg2[%c0, %c0_0] : memref<32x8xbf16, #tpu.memory_space<vmem>>, vector<32x8xbf16>
    %c0_1 = arith.constant 0 : index
    %c0_2 = arith.constant 0 : index
    %1 = vector.load %arg9[%c0_1, %c0_2] : memref<8x512xbf16, #tpu.memory_space<vmem>>, vector<8x512xbf16>
    %cst = arith.constant dense<0.000000e+00> : vector<32x512xf32>
    %2 = tpu.matmul %0, %1, %cst {dimension_numbers = #tpu.dot_dimension_numbers<[1], [0], [0], [1], [0, 0, 1, 1], [], []>} : vector<32x8xbf16>, vector<8x512xbf16>, vector<32x512xf32> -> vector<32x512xf32>
    %c0_3 = arith.constant 0 : index
    %c0_4 = arith.constant 0 : index
    %3 = vector.load %arg3[%c0_3, %c0_4] : memref<32x4xbf16, #tpu.memory_space<vmem>>, vector<32x4xbf16>
    %c0_5 = arith.constant 0 : index
    %c0_6 = arith.constant 0 : index
    %4 = vector.load %arg10[%c0_5, %c0_6] : memref<4x512xbf16, #tpu.memory_space<vmem>>, vector<4x512xbf16>
    %cst_7 = arith.constant dense<0.000000e+00> : vector<32x512xf32>
    %5 = tpu.matmul %3, %4, %cst_7 {dimension_numbers = #tpu.dot_dimension_numbers<[1], [0], [0], [1], [0, 0, 1, 1], [], []>} : vector<32x4xbf16>, vector<4x512xbf16>, vector<32x512xf32> -> vector<32x512xf32>
    %c0_8 = arith.constant 0 : index
    %c0_9 = arith.constant 0 : index
    %6 = vector.load %arg1[%c0_8, %c0_9] : memref<32x1024xbf16, #tpu.memory_space<vmem>>, vector<32x1024xbf16>
    %c0_10 = arith.constant 0 : index
    %c0_11 = arith.constant 0 : index
    %7 = vector.load %arg5[%c0_10, %c0_11] : memref<1024x512xbf16, #tpu.memory_space<vmem>>, vector<1024x512xbf16>
    %cst_12 = arith.constant dense<0.000000e+00> : vector<32x512xf32>
    %8 = tpu.matmul %6, %7, %cst_12 {dimension_numbers = #tpu.dot_dimension_numbers<[1], [0], [0], [1], [0, 0, 1, 1], [], []>} : vector<32x1024xbf16>, vector<1024x512xbf16>, vector<32x512xf32> -> vector<32x512xf32>
    %c0_13 = arith.constant 0 : index
    %c0_14 = arith.constant 0 : index
    %9 = vector.load %arg6[%c0_13, %c0_14] : memref<1x512xf32, #tpu.memory_space<vmem>>, vector<1x512xf32>
    %10 = vector.broadcast %9 : vector<1x512xf32> to vector<32x512xf32>
    %11 = arith.addf %8, %10 : vector<32x512xf32>
    %12 = arith.addf %11, %2 : vector<32x512xf32>
    %13 = arith.addf %12, %5 : vector<32x512xf32>
    %c0_15 = arith.constant 0 : index
    %c0_16 = arith.constant 0 : index
    %14 = vector.load %arg7[%c0_15, %c0_16] : memref<1x512xf32, #tpu.memory_space<vmem>>, vector<1x512xf32>
    %15 = vector.broadcast %14 : vector<1x512xf32> to vector<32x512xf32>
    %16 = arith.mulf %13, %15 : vector<32x512xf32>
    %cst_17 = arith.constant dense<0.000000e+00> : vector<32xf32>
    %17 = vector.multi_reduction <add>, %16, %cst_17 [1] : vector<32x512xf32> to vector<32xf32>
    %18 = vector.shape_cast %17 : vector<32xf32> to vector<32x1xf32>
    %c0_18 = arith.constant 0 : index
    %c0_19 = arith.constant 0 : index
    %19 = vector.load %arg8[%c0_18, %c0_19] : memref<1x1xf32, #tpu.memory_space<vmem>>, vector<1x1xf32>
    %20 = vector.broadcast %19 : vector<1x1xf32> to vector<32x1xf32>
    %21 = arith.addf %18, %20 : vector<32x1xf32>
    %cst_20 = arith.constant 33.3333321 : f32
    %22 = vector.broadcast %cst_20 : f32 to vector<32x1xf32>
    %23 = arith.mulf %21, %22 : vector<32x1xf32>
    %cst_21 = arith.constant 0.000000e+00 : f32
    %24 = vector.broadcast %cst_21 : f32 to vector<32x1xf32>
    %25 = arith.maximumf %23, %24 : vector<32x1xf32>
    %26 = vector.broadcast %cst_21 : f32 to vector<32x1xf32>
    %27 = arith.subf %23, %26 : vector<32x1xf32>
    %28 = arith.cmpf one, %27, %27 : vector<32x1xf32>
    %29 = vector.broadcast %cst_21 : f32 to vector<32x1xf32>
    %30 = arith.addf %23, %29 : vector<32x1xf32>
    %31 = math.absf %27 : vector<32x1xf32>
    %cst_22 = arith.constant 0.000000e+00 : f32
    %32 = vector.broadcast %cst_22 : f32 to vector<32x1xf32>
    %33 = arith.subf %32, %31 : vector<32x1xf32>
    %34 = math.exp %33 : vector<32x1xf32>
    %35 = math.log1p %34 : vector<32x1xf32>
    %36 = arith.addf %25, %35 : vector<32x1xf32>
    %37 = arith.select %28, %30, %36 : vector<32x1xi1>, vector<32x1xf32>
    %cst_23 = arith.constant 0.000000e+00 : f32
    %38 = vector.broadcast %cst_23 : f32 to vector<32x1xf32>
    %39 = arith.subf %38, %37 : vector<32x1xf32>
    %cst_24 = arith.constant 0.000000e+00 : f32
    %40 = vector.broadcast %cst_24 : f32 to vector<32x1xf32>
    %41 = arith.subf %40, %23 : vector<32x1xf32>
    %cst_25 = arith.constant 0.000000e+00 : f32
    %42 = vector.broadcast %cst_25 : f32 to vector<32x1xf32>
    %43 = arith.maximumf %41, %42 : vector<32x1xf32>
    %44 = vector.broadcast %cst_25 : f32 to vector<32x1xf32>
    %45 = arith.subf %41, %44 : vector<32x1xf32>
    %46 = arith.cmpf one, %45, %45 : vector<32x1xf32>
    %47 = vector.broadcast %cst_25 : f32 to vector<32x1xf32>
    %48 = arith.addf %41, %47 : vector<32x1xf32>
    %49 = math.absf %45 : vector<32x1xf32>
    %cst_26 = arith.constant 0.000000e+00 : f32
    %50 = vector.broadcast %cst_26 : f32 to vector<32x1xf32>
    %51 = arith.subf %50, %49 : vector<32x1xf32>
    %52 = math.exp %51 : vector<32x1xf32>
    %53 = math.log1p %52 : vector<32x1xf32>
    %54 = arith.addf %43, %53 : vector<32x1xf32>
    %55 = arith.select %46, %48, %54 : vector<32x1xi1>, vector<32x1xf32>
    %cst_27 = arith.constant 0.000000e+00 : f32
    %56 = vector.broadcast %cst_27 : f32 to vector<32x1xf32>
    %57 = arith.subf %56, %55 : vector<32x1xf32>
    %58 = vector.broadcast %39 : vector<32x1xf32> to vector<32x512xf32>
    %59 = arith.mulf %11, %58 : vector<32x512xf32>
    %60 = arith.truncf %59 : vector<32x512xf32> to vector<32x512xbf16>
    %c0_28 = arith.constant 0 : index
    %c0_29 = arith.constant 0 : index
    %61 = vector.load %arg11[%c0_28, %c0_29] : memref<512x512xbf16, #tpu.memory_space<vmem>>, vector<512x512xbf16>
    %cst_30 = arith.constant dense<0.000000e+00> : vector<32x512xf32>
    %62 = tpu.matmul %60, %61, %cst_30 {dimension_numbers = #tpu.dot_dimension_numbers<[1], [0], [0], [1], [0, 0, 1, 1], [], []>} : vector<32x512xbf16>, vector<512x512xbf16>, vector<32x512xf32> -> vector<32x512xf32>
    %63 = vector.broadcast %57 : vector<32x1xf32> to vector<32x512xf32>
    %64 = arith.mulf %2, %63 : vector<32x512xf32>
    %65 = arith.truncf %64 : vector<32x512xf32> to vector<32x512xbf16>
    %c0_31 = arith.constant 0 : index
    %c0_32 = arith.constant 0 : index
    %66 = vector.load %arg12[%c0_31, %c0_32] : memref<512x512xbf16, #tpu.memory_space<vmem>>, vector<512x512xbf16>
    %cst_33 = arith.constant dense<0.000000e+00> : vector<32x512xf32>
    %67 = tpu.matmul %65, %66, %cst_33 {dimension_numbers = #tpu.dot_dimension_numbers<[1], [0], [0], [1], [0, 0, 1, 1], [], []>} : vector<32x512xbf16>, vector<512x512xbf16>, vector<32x512xf32> -> vector<32x512xf32>
    %68 = arith.addf %62, %67 : vector<32x512xf32>
    %c0_34 = arith.constant 0 : index
    %c0_35 = arith.constant 0 : index
    %69 = vector.load %arg13[%c0_34, %c0_35] : memref<1x512xf32, #tpu.memory_space<vmem>>, vector<1x512xf32>
    %70 = vector.broadcast %69 : vector<1x512xf32> to vector<32x512xf32>
    %71 = arith.addf %68, %70 : vector<32x512xf32>
    %72 = arith.addf %71, %5 : vector<32x512xf32>
    %73 = arith.mulf %72, %72 : vector<32x512xf32>
    %cst_36 = arith.constant dense<0.000000e+00> : vector<32xf32>
    %74 = vector.multi_reduction <add>, %73, %cst_36 [1] : vector<32x512xf32> to vector<32xf32>
    %75 = vector.shape_cast %74 : vector<32xf32> to vector<32x1xf32>
    %cst_37 = arith.constant 1.000000e-24 : f32
    %76 = vector.broadcast %cst_37 : f32 to vector<32x1xf32>
    %77 = arith.maximumf %75, %76 : vector<32x1xf32>
    %78 = math.rsqrt %77 : vector<32x1xf32>
    %79 = vector.broadcast %78 : vector<32x1xf32> to vector<32x512xf32>
    %80 = arith.mulf %72, %79 : vector<32x512xf32>
    %c0_38 = arith.constant 0 : index
    %c0_39 = arith.constant 0 : index
    %81 = vector.load %arg4[%c0_38, %c0_39] : memref<2x512xf32, #tpu.memory_space<vmem>>, vector<2x512xf32>
    %82 = vector.shape_cast %81 : vector<2x512xf32> to vector<2x1x512xf32>
    %83 = vector.shape_cast %82 : vector<2x1x512xf32> to vector<2x1x512xf32>
    %84 = vector.broadcast %83 : vector<2x1x512xf32> to vector<2x16x512xf32>
    %85 = vector.shape_cast %84 : vector<2x16x512xf32> to vector<32x512xf32>
    %86 = arith.mulf %80, %85 : vector<32x512xf32>
    %cst_40 = arith.constant dense<0.000000e+00> : vector<32xf32>
    %87 = vector.multi_reduction <add>, %86, %cst_40 [1] : vector<32x512xf32> to vector<32xf32>
    %88 = vector.shape_cast %87 : vector<32xf32> to vector<32x1xf32>
    %c0_41 = arith.constant 0 : index
    %c0_42 = arith.constant 0 : index
    %89 = vector.load %arg14[%c0_41, %c0_42] : memref<32x1xf32, #tpu.memory_space<vmem>>, vector<32x1xf32>
    tpu.vector_store %arg14[%c0_41, %c0_42], %88 {strides = array<i32>} : memref<32x1xf32, #tpu.memory_space<vmem>>, vector<32x1xf32>,
    return
  }
  func.func @transform_0(%arg0: i32) -> (i32, i32) {
    %c0_i32 = arith.constant 0 : i32
    %c0_i32_0 = arith.constant 0 : i32
    return %arg0, %c0_i32 : i32, i32
  }
  func.func @transform_1(%arg0: i32) -> (i32, i32) {
    %c0_i32 = arith.constant 0 : i32
    %c0_i32_0 = arith.constant 0 : i32
    return %arg0, %c0_i32 : i32, i32
  }
  func.func @transform_2(%arg0: i32) -> (i32, i32) {
    %c0_i32 = arith.constant 0 : i32
    %c0_i32_0 = arith.constant 0 : i32
    return %arg0, %c0_i32 : i32, i32
  }
  func.func @transform_3(%arg0: i32) -> (i32, i32) {
    %c0_i32 = arith.constant 0 : i32
    %c0_i32_0 = arith.constant 0 : i32
    return %arg0, %c0_i32 : i32, i32
  }
  func.func @transform_4(%arg0: i32) -> (i32, i32) {
    %c0_i32 = arith.constant 0 : i32
    %c0_i32_0 = arith.constant 0 : i32
    %c0_i32_1 = arith.constant 0 : i32
    return %c0_i32, %c0_i32_0 : i32, i32
  }
  func.func @transform_5(%arg0: i32) -> (i32, i32) {
    %c0_i32 = arith.constant 0 : i32
    %c0_i32_0 = arith.constant 0 : i32
    %c0_i32_1 = arith.constant 0 : i32
    return %c0_i32, %c0_i32_0 : i32, i32
  }
  func.func @transform_6(%arg0: i32) -> (i32, i32) {
    %c0_i32 = arith.constant 0 : i32
    %c0_i32_0 = arith.constant 0 : i32
    %c0_i32_1 = arith.constant 0 : i32
    return %c0_i32, %c0_i32_0 : i32, i32
  }
  func.func @transform_7(%arg0: i32) -> (i32, i32) {
    %c0_i32 = arith.constant 0 : i32
    %c0_i32_0 = arith.constant 0 : i32
    %c0_i32_1 = arith.constant 0 : i32
    return %c0_i32, %c0_i32_0 : i32, i32
  }
  func.func @transform_8(%arg0: i32) -> (i32, i32) {
    %c0_i32 = arith.constant 0 : i32
    %c0_i32_0 = arith.constant 0 : i32
    %c0_i32_1 = arith.constant 0 : i32
    return %c0_i32, %c0_i32_0 : i32, i32
  }
  func.func @transform_9(%arg0: i32) -> (i32, i32) {
    %c0_i32 = arith.constant 0 : i32
    %c0_i32_0 = arith.constant 0 : i32
    %c0_i32_1 = arith.constant 0 : i32
    return %c0_i32, %c0_i32_0 : i32, i32
  }
  func.func @transform_10(%arg0: i32) -> (i32, i32) {
    %c0_i32 = arith.constant 0 : i32
    %c0_i32_0 = arith.constant 0 : i32
    %c0_i32_1 = arith.constant 0 : i32
    return %c0_i32, %c0_i32_0 : i32, i32
  }
  func.func @transform_11(%arg0: i32) -> (i32, i32) {
    %c0_i32 = arith.constant 0 : i32
    %c0_i32_0 = arith.constant 0 : i32
    %c0_i32_1 = arith.constant 0 : i32
    return %c0_i32, %c0_i32_0 : i32, i32
  }
  func.func @transform_12(%arg0: i32) -> (i32, i32) {
    %c0_i32 = arith.constant 0 : i32
    %c0_i32_0 = arith.constant 0 : i32
    %c0_i32_1 = arith.constant 0 : i32
    return %c0_i32, %c0_i32_0 : i32, i32
  }
  func.func @transform_13(%arg0: i32) -> (i32, i32) {
    %c0_i32 = arith.constant 0 : i32
    %c0_i32_0 = arith.constant 0 : i32
    return %arg0, %c0_i32 : i32, i32
  }
}

</mosaic_0001>

<bundles_post_ra>
// kernel: net_forward.1
= control target key start
LH: loop header
LB: loop body
LE: loop exit
PB: predicated region body
PF: predicated region fallthrough
CT: control target
= control target key end

     0   :  { %vm80_vm0 = vcmask 1043456   ;;  %v6437_v2 = vmov 0   ;;  %v6438_v3 = vmov 1983009808   ;;  %v219_v5 = vlaneseq  ;;  %s8702_s8 = inlined_call_operand.vmem [shape: bf16[8,512], index: 8, kind: input, shape index: {}]   ;;  %s8703_s1 = inlined_call_operand.vmem [shape: bf16[32,8], index: 1, kind: input, shape index: {}]   ;;  %s8704_s9 = inlined_call_operand.vmem [shape: bf16[4,512], index: 9, kind: input, shape index: {}]   ;;  %s8705_s4 = inlined_call_operand.vmem [shape: bf16[1024,512], index: 4, kind: input, shape index: {}]   ;;  %s8706_s2 = inlined_call_operand.vmem [shape: bf16[32,4], index: 2, kind: input, shape index: {}]   ;;  %s8707_s0 = inlined_call_operand.vmem [shape: bf16[32,1024], index: 0, kind: input, shape index: {}]   ;;  %s8708_s7 = inlined_call_operand.<no memory space> [shape: f32[1,1], index: 7, kind: input, shape index: {}]   ;;  %s8709_s5 = inlined_call_operand.vmem [shape: f32[1,512], index: 5, kind: input, shape index: {}]   ;;  %s8710_s6 = inlined_call_operand.vmem [shape: f32[1,512], index: 6, kind: input, shape index: {}]   ;;  %s8711_s11 = inlined_call_operand.vmem [shape: bf16[512,512], index: 11, kind: input, shape index: {}]   ;;  %s8712_s10 = inlined_call_operand.vmem [shape: bf16[512,512], index: 10, kind: input, shape index: {}]   ;;  %s8713_s12 = inlined_call_operand.vmem [shape: f32[1,512], index: 12, kind: input, shape index: {}]   ;;  %s8714_s3 = inlined_call_operand.vmem [shape: f32[2,512], index: 3, kind: input, shape index: {}]   ;;  %s8715_s13 = inlined_call_operand.vmem [shape: f32[32,1], index: 13, kind: output, shape index: {}]  }
   0x1   :  { %v51_v0 = vld [vmem:[%s8702_s8] sm:$0xff]  ;;  %v52_v1 = vld [vmem:[%s8702_s8 + $0x8] sm:$0xff]  ;;  %125 = vmatprep.mubr.bf16.mxu0 %v6437_v2  ;;  %178 = vmatprep.mubr.bf16.mxu1 %v6437_v2  ;;  %v217_v4 = vunpack.c.l.s4 %v6438_v3  ;;  %vm73_vm1 = vcmask 64512   ;;  %vm239_vm2 = vcmask 1041408   ;;  %vm232_vm3 = vcmask 31744  }
   0x2   :  { %v4957_v6 = vcombine.high %v51_v0, %v51_v0  ;;  %v4959_v7 = vcombine.high %v52_v1, %v52_v1  ;;  %v4956_v8 = vcombine.low %v51_v0, %v51_v0  ;;  %v4958_v9 = vcombine.low %v52_v1, %v52_v1  ;;  %v203_v10 = vld [vmem:[%s8704_s9] sm:$0xff]  ;;  %5618 = vset.pattern.permute.xlu0 %v6437_v2  ;;  %v5632_v25 = vld [vmem:[%s8705_s4 + $0xc] ss:$16 sps:$4 sm:$0xff]   ;;  %v5630_v28 = vld [vmem:[%s8705_s4 + $0x8] ss:$16 sps:$4 sm:$0xff]  }
   0x3   :  { %v218_v11 = vunpack.c.0.s8 %v217_v4  ;;  %v6521_v12 = vshrl.u32 %v219_v5, 7  ;;  %v215_v13 = vcombine.high %v203_v10, %v203_v10  ;;  %5619 = vset.pattern.permute.xlu1 %v6437_v2  ;;  %v5624_v16 = vld [vmem:[%s8703_s1] sm:$0xff]   ;;  %v5626_v26 = vld [vmem:[%s8703_s1 + $0x8] sm:$0xff]  }
   0x4   :  { %4960 = vmatprep.subr.msk.bf16.mxu0 %vm80_vm0, %v4957_v6  ;;  %4963 = vmatprep.subr.msk.bf16.mxu1 %vm80_vm0, %v4959_v7  ;;  %v82_v14 = vsel %vm80_vm0, %v4956_v8, 0  ;;  %v88_v15 = vsel %vm80_vm0, %v4958_v9, 0  ;;  %v5629_v20 = vld [vmem:[%s8705_s4 + $0x4] ss:$16 sps:$4 sm:$0xff]   ;;  %v5627_v27 = vld [vmem:[%s8705_s4] ss:$16 sps:$4 sm:$0xff]  }
   0x5   :  { %94 = vmatpush1.bf16.msra.mxu0 %v82_v14  ;;  %147 = vmatpush1.bf16.msra.mxu1 %v88_v15  ;;  %v221_v17 = vsub.s32 %v218_v11, %v6521_v12  ;;  %v5633_v29 = vld [vmem:[%s8706_s2] sm:$0xff]   ;;  %v5639_v31 = vld [vmem:[%s8705_s4 + $0x2c] ss:$16 sps:$4 sm:$0xff]   ;;  %v5637_v33 = vld [vmem:[%s8705_s4 + $0x28] ss:$16 sps:$4 sm:$0xff]  }
   0x6   :  { %v5636_v30 = vld [vmem:[%s8705_s4 + $0x24] ss:$16 sps:$4 sm:$0xff]   ;;  %v5634_v32 = vld [vmem:[%s8705_s4 + $0x20] ss:$16 sps:$4 sm:$0xff]   ;;  %v5645_v35 = vld [vmem:[%s8705_s4 + $0x4c] ss:$16 sps:$4 sm:$0xff]  }
   0x7   :  { %v222_v18 = vrot.slane %v203_v10, %v221_v17  ;;  %v229_v19 = vrot.slane %v215_v13, %v221_v17  ;;  %v5642_v34 = vld [vmem:[%s8705_s4 + $0x44] ss:$16 sps:$4 sm:$0xff]   ;;  %v5640_v36 = vld [vmem:[%s8705_s4 + $0x40] ss:$16 sps:$4 sm:$0xff]   ;;  %v5643_v37 = vld [vmem:[%s8705_s4 + $0x48] ss:$16 sps:$4 sm:$0xff]  }
   0x8   :  { %4961 = vmatmul.mubr.msk.bf16.vlgmr.msra.gmra.mrb[0].mxu0 %vm73_vm1, %v5624_v16  ;;  %4964 = vmatmul.mubr.msk.bf16.vlgmr.msra.gmra.mrb[0].mxu1 %vm73_vm1, %v5624_v16  ;;  %v5648_v38 = vld [vmem:[%s8705_s4 + $0x64] ss:$16 sps:$4 sm:$0xff]   ;;  %v5651_v39 = vld [vmem:[%s8705_s4 + $0x6c] ss:$16 sps:$4 sm:$0xff]   ;;  %v5646_v40 = vld [vmem:[%s8705_s4 + $0x60] ss:$16 sps:$4 sm:$0xff]  }
   0x9   :  { %v230_v21 = vcombine.high %v222_v18, %v222_v18  ;;  %v241_v22 = vsel %vm239_vm2, %v222_v18, 0  ;;  %v231_v23 = vcombine.high %v229_v19, %v229_v19  ;;  %135 = vmatprep.mubr.bf16.mxu0 %v6437_v2  ;;  %188 = vmatprep.mubr.bf16.mxu1 %v6437_v2  ;;  %v247_v24 = vsel %vm239_vm2, %v229_v19, 0  ;;  %v5649_v41 = vld [vmem:[%s8705_s4 + $0x68] ss:$16 sps:$4 sm:$0xff]   ;;  %v5654_v42 = vld [vmem:[%s8705_s4 + $0x84] ss:$16 sps:$4 sm:$0xff]  }
   0xa   :  { %v5657_v43 = vld [vmem:[%s8705_s4 + $0x8c] ss:$16 sps:$4 sm:$0xff]   ;;  %v5652_v44 = vld [vmem:[%s8705_s4 + $0x80] ss:$16 sps:$4 sm:$0xff]   ;;  %v5655_v45 = vld [vmem:[%s8705_s4 + $0x88] ss:$16 sps:$4 sm:$0xff]  }
   0xb   :  { %4968 = vmatprep.subr.msk.bf16.mxu0 %vm239_vm2, %v230_v21  ;;  %4971 = vmatprep.subr.msk.bf16.mxu1 %vm239_vm2, %v231_v23  ;;  %v5660_v46 = vld [vmem:[%s8705_s4 + $0xa4] ss:$16 sps:$4 sm:$0xff]   ;;  %v5663_v47 = vld [vmem:[%s8705_s4 + $0xac] ss:$16 sps:$4 sm:$0xff]   ;;  %v5658_v48 = vld [vmem:[%s8705_s4 + $0xa0] ss:$16 sps:$4 sm:$0xff]  }
   0xc   :  { %253 = vmatpush1.bf16.msra.mxu0 %v241_v22  ;;  %306 = vmatpush1.bf16.msra.mxu1 %v247_v24  ;;  %v5661_v49 = vld [vmem:[%s8705_s4 + $0xa8] ss:$16 sps:$4 sm:$0xff]   ;;  %v5666_v50 = vld [vmem:[%s8705_s4 + $0xc4] ss:$16 sps:$4 sm:$0xff]   ;;  %v5669_v51 = vld [vmem:[%s8705_s4 + $0xcc] ss:$16 sps:$4 sm:$0xff]  }
   0xd   :  { %2012 = vmatprep.subr.bf16.mxu0 %v5629_v20  ;;  %2224 = vmatprep.subr.bf16.mxu1 %v5632_v25  ;;  %v5664_v52 = vld [vmem:[%s8705_s4 + $0xc0] ss:$16 sps:$4 sm:$0xff]   ;;  %v5667_v53 = vld [vmem:[%s8705_s4 + $0xc8] ss:$16 sps:$4 sm:$0xff]   ;;  %v5672_v54 = vld [vmem:[%s8705_s4 + $0xe4] ss:$16 sps:$4 sm:$0xff]  }
   0xe   :  { %v5718_v55 = vld [vmem:[%s8706_s2 + $0x8] sm:$0xff]   ;;  %v5670_v57 = vld [vmem:[%s8705_s4 + $0xe0] ss:$16 sps:$4 sm:$0xff]   ;;  %v5678_v61 = vld [vmem:[%s8705_s4 + $0x104] ss:$16 sps:$4 sm:$0xff]  }
   0xf   :  { %v5675_v56 = vld [vmem:[%s8705_s4 + $0xec] ss:$16 sps:$4 sm:$0xff]   ;;  %v5673_v58 = vld [vmem:[%s8705_s4 + $0xe8] ss:$16 sps:$4 sm:$0xff]   ;;  %v6654_v59 = vld [vmem:[%s8707_s0] sm:$0xff] }
  0x10   :  { %4962 = vmatmul.mubr.msk.bf16.gmra.mrb[4].mxu0 %vm73_vm1, %v5626_v26  ;;  %4965 = vmatmul.mubr.msk.bf16.gmra.mrb[4].mxu1 %vm73_vm1, %v5626_v26  ;;  %v6659_v60 = vld [vmem:[%s8707_s0 + $0x20] sm:$0xff]  ;;  %v5681_v62 = vld [vmem:[%s8705_s4 + $0x10c] ss:$16 sps:$4 sm:$0xff]   ;;  %v5679_v1 = vld [vmem:[%s8705_s4 + $0x108] ss:$16 sps:$4 sm:$0xff]  }
  0x11   :  { %284 = vmatprep.mubr.bf16.mxu0 %v6437_v2  ;;  %337 = vmatprep.mubr.bf16.mxu1 %v6437_v2  ;;  %v4975_v63 = vcombine.high %v6654_v59, %v6659_v60  ;;  %v5676_v0 = vld [vmem:[%s8705_s4 + $0x100] ss:$16 sps:$4 sm:$0xff]   ;;  %v5687_v3 = vld [vmem:[%s8705_s4 + $0x12c] ss:$16 sps:$4 sm:$0xff]   ;;  %v5685_v5 = vld [vmem:[%s8705_s4 + $0x128] ss:$16 sps:$4 sm:$0xff]  }
  0x12   :  { %v5682_v4 = vld [vmem:[%s8705_s4 + $0x120] ss:$16 sps:$4 sm:$0xff]   ;;  %v5690_v6 = vld [vmem:[%s8705_s4 + $0x144] ss:$16 sps:$4 sm:$0xff]   ;;  %v5693_v7 = vld [vmem:[%s8705_s4 + $0x14c] ss:$16 sps:$4 sm:$0xff]  }
  0x13   :  { %v5688_v8 = vld [vmem:[%s8705_s4 + $0x140] ss:$16 sps:$4 sm:$0xff]   ;;  %v5691_v9 = vld [vmem:[%s8705_s4 + $0x148] ss:$16 sps:$4 sm:$0xff]   ;;  %v5696_v10 = vld [vmem:[%s8705_s4 + $0x164] ss:$16 sps:$4 sm:$0xff]  }
  0x14   :  { %v5699_v11 = vld [vmem:[%s8705_s4 + $0x16c] ss:$16 sps:$4 sm:$0xff]   ;;  %v5694_v13 = vld [vmem:[%s8705_s4 + $0x160] ss:$16 sps:$4 sm:$0xff]   ;;  %v5697_v14 = vld [vmem:[%s8705_s4 + $0x168] ss:$16 sps:$4 sm:$0xff]  }
  0x15   :  { %v5702_v15 = vld [vmem:[%s8705_s4 + $0x184] ss:$16 sps:$4 sm:$0xff]   ;;  %v5705_v16 = vld [vmem:[%s8705_s4 + $0x18c] ss:$16 sps:$4 sm:$0xff]   ;;  %v5700_v17 = vld [vmem:[%s8705_s4 + $0x180] ss:$16 sps:$4 sm:$0xff]  }
  0x16   :  { %v5703_v18 = vld [vmem:[%s8705_s4 + $0x188] ss:$16 sps:$4 sm:$0xff]   ;;  %v5708_v19 = vld [vmem:[%s8705_s4 + $0x1a4] ss:$16 sps:$4 sm:$0xff]   ;;  %v5711_v20 = vld [vmem:[%s8705_s4 + $0x1ac] ss:$16 sps:$4 sm:$0xff]  }
  0x17   :  { %v5706_v21 = vld [vmem:[%s8705_s4 + $0x1a0] ss:$16 sps:$4 sm:$0xff]   ;;  %v5709_v22 = vld [vmem:[%s8705_s4 + $0x1a8] ss:$16 sps:$4 sm:$0xff]   ;;  %v5714_v23 = vld [vmem:[%s8705_s4 + $0x1c4] ss:$16 sps:$4 sm:$0xff]  }
  0x18   :  { %4969 = vmatmul.mubr.msk.bf16.vlgmr.msra.gmra.mrb[8].mxu0 %vm232_vm3, %v5633_v29  ;;  %4972 = vmatmul.mubr.msk.bf16.vlgmr.msra.gmra.mrb[8].mxu1 %vm232_vm3, %v5633_v29  ;;  %v5717_v24 = vld [vmem:[%s8705_s4 + $0x1cc] ss:$16 sps:$4 sm:$0xff]   ;;  %v5712_v25 = vld [vmem:[%s8705_s4 + $0x1c0] ss:$16 sps:$4 sm:$0xff]   ;;  %v5715_v26 = vld [vmem:[%s8705_s4 + $0x1c8] ss:$16 sps:$4 sm:$0xff]  }
  0x19   :  { %2013 = vmatpush1.bf16.msra.mxu0 %v5627_v27  ;;  %2225 = vmatpush1.bf16.msra.mxu1 %v5630_v28  ;;  %v5721_v27 = vld [vmem:[%s8705_s4 + $0x1e4] ss:$16 sps:$4 sm:$0xff]   ;;  %v5724_v28 = vld [vmem:[%s8705_s4 + $0x1ec] ss:$16 sps:$4 sm:$0xff]   ;;  %v5719_v29 = vld [vmem:[%s8705_s4 + $0x1e0] ss:$16 sps:$4 sm:$0xff]  }
  0x1a   :  { %2014 = vmatprep.subr.bf16.mxu0 %v5636_v30  ;;  %2226 = vmatprep.subr.bf16.mxu1 %v5639_v31  ;;  %v5722_v30 = vld [vmem:[%s8705_s4 + $0x1e8] ss:$16 sps:$4 sm:$0xff]   ;;  %v5727_v31 = vld [vmem:[%s8705_s4 + $0x204] ss:$16 sps:$4 sm:$0xff]  }
  0x1b   :  { %294 = vmatprep.mubr.bf16.mxu0 %v6437_v2  ;;  %347 = vmatprep.mubr.bf16.mxu1 %v6437_v2  ;;  %v5684_v2 = vld [vmem:[%s8705_s4 + $0x124] ss:$16 sps:$4 sm:$0xff]  }
  0x1d   :  { %2015 = vmatpush1.bf16.msra.mxu0 %v5634_v32  ;;  %2227 = vmatpush1.bf16.msra.mxu1 %v5637_v33  ;;  %v5730_v32 = vld [vmem:[%s8705_s4 + $0x20c] ss:$16 sps:$4 sm:$0xff]   ;;  %v4974_v33 = vcombine.low %v6654_v59, %v6659_v60  ;;  %v5757_v59 = vld [vmem:[%s8705_s4 + $0x2a4] ss:$16 sps:$4 sm:$0xff]  }
  0x1e   :  { %2016 = vmatprep.subr.bf16.mxu0 %v5642_v34  ;;  %2228 = vmatprep.subr.bf16.mxu1 %v5645_v35  ;;  %v5725_v34 = vld [vmem:[%s8705_s4 + $0x200] ss:$16 sps:$4 sm:$0xff]   ;;  %v5728_v35 = vld [vmem:[%s8705_s4 + $0x208] ss:$16 sps:$4 sm:$0xff]   ;;  %v5760_v60 = vld [vmem:[%s8705_s4 + $0x2ac] ss:$16 sps:$4 sm:$0xff]  }
  0x20   :  { %4970 = vmatmul.mubr.msk.bf16.gmra.mrb[12].mxu0 %vm232_vm3, %v5718_v55  ;;  %4973 = vmatmul.mubr.msk.bf16.gmra.mrb[12].mxu1 %vm232_vm3, %v5718_v55  ;;  %v5751_v55 = vld [vmem:[%s8705_s4 + $0x284] ss:$16 sps:$4 sm:$0xff]  }
  0x21   :  { %2017 = vmatpush1.bf16.msra.mxu0 %v5640_v36  ;;  %2229 = vmatpush1.bf16.msra.mxu1 %v5643_v37  ;;  %v5733_v36 = vld [vmem:[%s8705_s4 + $0x224] ss:$16 sps:$4 sm:$0xff]   ;;  %v5736_v37 = vld [vmem:[%s8705_s4 + $0x22c] ss:$16 sps:$4 sm:$0xff]  }
  0x22   :  { %2018 = vmatprep.subr.bf16.mxu0 %v5648_v38  ;;  %2230 = vmatprep.subr.bf16.mxu1 %v5651_v39  ;;  %v366_v38 = vld [vmem:[%s8707_s0 + $0x40] sm:$0xff] }
  0x23   :  { %2044 = vmatprep.mubr.bf16.mxu0 %v4975_v63  ;;  %2256 = vmatprep.mubr.bf16.mxu1 %v4975_v63  ;;  %v370_v39 = vld [vmem:[%s8707_s0 + $0x60] sm:$0xff] }
  0x24   :  { %v5763_v63 = vld [vmem:[%s8705_s4 + $0x2c4] ss:$16 sps:$4 sm:$0xff]  }
  0x25   :  { %2019 = vmatpush1.bf16.msra.mxu0 %v5646_v40  ;;  %2231 = vmatpush1.bf16.msra.mxu1 %v5649_v41  ;;  %v5731_v40 = vld [vmem:[%s8705_s4 + $0x220] ss:$16 sps:$4 sm:$0xff]   ;;  %v4983_v41 = vcombine.high %v366_v38, %v370_v39 }
  0x26   :  { %2020 = vmatprep.subr.bf16.mxu0 %v5654_v42  ;;  %2232 = vmatprep.subr.bf16.mxu1 %v5657_v43  ;;  %v5734_v42 = vld [vmem:[%s8705_s4 + $0x228] ss:$16 sps:$4 sm:$0xff]   ;;  %v5739_v43 = vld [vmem:[%s8705_s4 + $0x244] ss:$16 sps:$4 sm:$0xff]  }
  0x29   :  { %2021 = vmatpush1.bf16.msra.mxu0 %v5652_v44  ;;  %2233 = vmatpush1.bf16.msra.mxu1 %v5655_v45  ;;  %v5742_v44 = vld [vmem:[%s8705_s4 + $0x24c] ss:$16 sps:$4 sm:$0xff]   ;;  %v5737_v45 = vld [vmem:[%s8705_s4 + $0x240] ss:$16 sps:$4 sm:$0xff]  }
  0x2a   :  { %2022 = vmatprep.subr.bf16.mxu0 %v5660_v46  ;;  %2234 = vmatprep.subr.bf16.mxu1 %v5663_v47  ;;  %v5740_v46 = vld [vmem:[%s8705_s4 + $0x248] ss:$16 sps:$4 sm:$0xff]   ;;  %v4982_v47 = vcombine.low %v366_v38, %v370_v39  ;;  %v5815_v38 = vld [vmem:[%s8705_s4 + $0x3e0] ss:$16 sps:$4 sm:$0xff]  }
  0x2b   :  { %v5818_v39 = vld [vmem:[%s8705_s4 + $0x3e8] ss:$16 sps:$4 sm:$0xff]  }
  0x2d   :  { %2023 = vmatpush1.bf16.msra.mxu0 %v5658_v48  ;;  %2235 = vmatpush1.bf16.msra.mxu1 %v5661_v49  ;;  %v6806_v48 = vld [vmem:[%s8707_s0 + $0x8] sm:$0xff] }
  0x2e   :  { %2024 = vmatprep.subr.bf16.mxu0 %v5666_v50  ;;  %2236 = vmatprep.subr.bf16.mxu1 %v5669_v51  ;;  %v6811_v49 = vld [vmem:[%s8707_s0 + $0x28] sm:$0xff]  ;;  %v5745_v50 = vld [vmem:[%s8705_s4 + $0x264] ss:$16 sps:$4 sm:$0xff]  }
  0x2f   :  { %v5748_v51 = vld [vmem:[%s8705_s4 + $0x26c] ss:$16 sps:$4 sm:$0xff]  }
  0x31   :  { %2025 = vmatpush1.bf16.msra.mxu0 %v5664_v52  ;;  %2237 = vmatpush1.bf16.msra.mxu1 %v5667_v53  ;;  %v4977_v52 = vcombine.high %v6806_v48, %v6811_v49  ;;  %v5743_v53 = vld [vmem:[%s8705_s4 + $0x260] ss:$16 sps:$4 sm:$0xff]  }
  0x32   :  { %2026 = vmatprep.subr.bf16.mxu0 %v5672_v54  ;;  %2238 = vmatprep.subr.bf16.mxu1 %v5675_v56  ;;  %v5746_v54 = vld [vmem:[%s8705_s4 + $0x268] ss:$16 sps:$4 sm:$0xff]   ;;  %v5754_v56 = vld [vmem:[%s8705_s4 + $0x28c] ss:$16 sps:$4 sm:$0xff]  }
  0x35   :  { %2027 = vmatpush1.bf16.msra.mxu0 %v5670_v57  ;;  %2239 = vmatpush1.bf16.msra.mxu1 %v5673_v58  ;;  %v5749_v57 = vld [vmem:[%s8705_s4 + $0x280] ss:$16 sps:$4 sm:$0xff]   ;;  %v5752_v58 = vld [vmem:[%s8705_s4 + $0x288] ss:$16 sps:$4 sm:$0xff]  }
  0x36   :  { %2028 = vmatprep.subr.bf16.mxu0 %v5678_v61  ;;  %2240 = vmatprep.subr.bf16.mxu1 %v5681_v62  ;;  %v5755_v61 = vld [vmem:[%s8705_s4 + $0x2a0] ss:$16 sps:$4 sm:$0xff]   ;;  %v5758_v62 = vld [vmem:[%s8705_s4 + $0x2a8] ss:$16 sps:$4 sm:$0xff]  }
  0x39   :  { %2029 = vmatpush1.bf16.msra.mxu0 %v5676_v0  ;;  %2241 = vmatpush1.bf16.msra.mxu1 %v5679_v1  ;;  %v5766_v0 = vld [vmem:[%s8705_s4 + $0x2cc] ss:$16 sps:$4 sm:$0xff]   ;;  %v5761_v1 = vld [vmem:[%s8705_s4 + $0x2c0] ss:$16 sps:$4 sm:$0xff]  }
  0x3a   :  { %2030 = vmatprep.subr.bf16.mxu0 %v5684_v2  ;;  %2242 = vmatprep.subr.bf16.mxu1 %v5687_v3  ;;  %v5764_v2 = vld [vmem:[%s8705_s4 + $0x2c8] ss:$16 sps:$4 sm:$0xff]   ;;  %v5769_v3 = vld [vmem:[%s8705_s4 + $0x2e4] ss:$16 sps:$4 sm:$0xff]  }
  0x3d   :  { %2031 = vmatpush1.bf16.msra.mxu0 %v5682_v4  ;;  %2243 = vmatpush1.bf16.msra.mxu1 %v5685_v5  ;;  %v5772_v4 = vld [vmem:[%s8705_s4 + $0x2ec] ss:$16 sps:$4 sm:$0xff]   ;;  %v5767_v5 = vld [vmem:[%s8705_s4 + $0x2e0] ss:$16 sps:$4 sm:$0xff]  }
  0x3e   :  { %2032 = vmatprep.subr.bf16.mxu0 %v5690_v6  ;;  %2244 = vmatprep.subr.bf16.mxu1 %v5693_v7  ;;  %v5770_v6 = vld [vmem:[%s8705_s4 + $0x2e8] ss:$16 sps:$4 sm:$0xff]   ;;  %v5775_v7 = vld [vmem:[%s8705_s4 + $0x304] ss:$16 sps:$4 sm:$0xff]  }
  0x41   :  { %2033 = vmatpush1.bf16.msra.mxu0 %v5688_v8  ;;  %2245 = vmatpush1.bf16.msra.mxu1 %v5691_v9  ;;  %v5778_v8 = vld [vmem:[%s8705_s4 + $0x30c] ss:$16 sps:$4 sm:$0xff]   ;;  %v5773_v9 = vld [vmem:[%s8705_s4 + $0x300] ss:$16 sps:$4 sm:$0xff]  }
  0x42   :  { %2034 = vmatprep.subr.bf16.mxu0 %v5696_v10  ;;  %2246 = vmatprep.subr.bf16.mxu1 %v5699_v11  ;;  %v5776_v10 = vld [vmem:[%s8705_s4 + $0x308] ss:$16 sps:$4 sm:$0xff]   ;;  %v5781_v11 = vld [vmem:[%s8705_s4 + $0x324] ss:$16 sps:$4 sm:$0xff]  }
  0x45   :  { %2035 = vmatpush1.bf16.msra.mxu0 %v5694_v13  ;;  %2247 = vmatpush1.bf16.msra.mxu1 %v5697_v14  ;;  %v5784_v13 = vld [vmem:[%s8705_s4 + $0x32c] ss:$16 sps:$4 sm:$0xff]   ;;  %v5779_v14 = vld [vmem:[%s8705_s4 + $0x320] ss:$16 sps:$4 sm:$0xff]  }
  0x46   :  { %2036 = vmatprep.subr.bf16.mxu0 %v5702_v15  ;;  %2248 = vmatprep.subr.bf16.mxu1 %v5705_v16  ;;  %v5782_v15 = vld [vmem:[%s8705_s4 + $0x328] ss:$16 sps:$4 sm:$0xff]   ;;  %v5787_v16 = vld [vmem:[%s8705_s4 + $0x344] ss:$16 sps:$4 sm:$0xff]  }
  0x49   :  { %2037 = vmatpush1.bf16.msra.mxu0 %v5700_v17  ;;  %2249 = vmatpush1.bf16.msra.mxu1 %v5703_v18  ;;  %v5790_v17 = vld [vmem:[%s8705_s4 + $0x34c] ss:$16 sps:$4 sm:$0xff]   ;;  %v5785_v18 = vld [vmem:[%s8705_s4 + $0x340] ss:$16 sps:$4 sm:$0xff]  }
  0x4a   :  { %2038 = vmatprep.subr.bf16.mxu0 %v5708_v19  ;;  %2250 = vmatprep.subr.bf16.mxu1 %v5711_v20  ;;  %v5788_v19 = vld [vmem:[%s8705_s4 + $0x348] ss:$16 sps:$4 sm:$0xff]   ;;  %v5793_v20 = vld [vmem:[%s8705_s4 + $0x364] ss:$16 sps:$4 sm:$0xff]  }
  0x4d   :  { %2039 = vmatpush1.bf16.msra.mxu0 %v5706_v21  ;;  %2251 = vmatpush1.bf16.msra.mxu1 %v5709_v22  ;;  %v5796_v21 = vld [vmem:[%s8705_s4 + $0x36c] ss:$16 sps:$4 sm:$0xff]   ;;  %v5791_v22 = vld [vmem:[%s8705_s4 + $0x360] ss:$16 sps:$4 sm:$0xff]  }
  0x4e   :  { %2040 = vmatprep.subr.bf16.mxu0 %v5714_v23  ;;  %2252 = vmatprep.subr.bf16.mxu1 %v5717_v24  ;;  %v5794_v23 = vld [vmem:[%s8705_s4 + $0x368] ss:$16 sps:$4 sm:$0xff]   ;;  %v5799_v24 = vld [vmem:[%s8705_s4 + $0x384] ss:$16 sps:$4 sm:$0xff]  }
  0x51   :  { %2041 = vmatpush1.bf16.msra.mxu0 %v5712_v25  ;;  %2253 = vmatpush1.bf16.msra.mxu1 %v5715_v26  ;;  %v5802_v25 = vld [vmem:[%s8705_s4 + $0x38c] ss:$16 sps:$4 sm:$0xff]   ;;  %v5797_v26 = vld [vmem:[%s8705_s4 + $0x380] ss:$16 sps:$4 sm:$0xff]  }
  0x52   :  { %2042 = vmatprep.subr.bf16.mxu0 %v5721_v27  ;;  %2254 = vmatprep.subr.bf16.mxu1 %v5724_v28  ;;  %v5800_v27 = vld [vmem:[%s8705_s4 + $0x388] ss:$16 sps:$4 sm:$0xff]   ;;  %v5805_v28 = vld [vmem:[%s8705_s4 + $0x3a4] ss:$16 sps:$4 sm:$0xff]  }
  0x55   :  { %2043 = vmatpush1.bf16.msra.mxu0 %v5719_v29  ;;  %2255 = vmatpush1.bf16.msra.mxu1 %v5722_v30  ;;  %v5808_v29 = vld [vmem:[%s8705_s4 + $0x3ac] ss:$16 sps:$4 sm:$0xff]   ;;  %v5803_v30 = vld [vmem:[%s8705_s4 + $0x3a0] ss:$16 sps:$4 sm:$0xff]  }
  0x56   :  { %2065 = vmatprep.subr.bf16.mxu0 %v5727_v31  ;;  %2277 = vmatprep.subr.bf16.mxu1 %v5730_v32  ;;  %v5806_v31 = vld [vmem:[%s8705_s4 + $0x3a8] ss:$16 sps:$4 sm:$0xff]   ;;  %v5811_v32 = vld [vmem:[%s8705_s4 + $0x3c4] ss:$16 sps:$4 sm:$0xff]  }
  0x58   :  { %2045 = vmatmul.mubr.bf16.vlgmr.msra.gmra.mrb[16].mxu0 %v4974_v33  ;;  %2257 = vmatmul.mubr.bf16.vlgmr.msra.gmra.mrb[16].mxu1 %v4974_v33  ;;  %v5814_v33 = vld [vmem:[%s8705_s4 + $0x3cc] ss:$16 sps:$4 sm:$0xff]  }
  0x59   :  { %2066 = vmatpush1.bf16.msra.mxu0 %v5725_v34  ;;  %2278 = vmatpush1.bf16.msra.mxu1 %v5728_v35  ;;  %v5809_v34 = vld [vmem:[%s8705_s4 + $0x3c0] ss:$16 sps:$4 sm:$0xff]   ;;  %v5812_v35 = vld [vmem:[%s8705_s4 + $0x3c8] ss:$16 sps:$4 sm:$0xff]  }
  0x5a   :  { %2067 = vmatprep.subr.bf16.mxu0 %v5733_v36  ;;  %2279 = vmatprep.subr.bf16.mxu1 %v5736_v37  ;;  %v5817_v36 = vld [vmem:[%s8705_s4 + $0x3e4] ss:$16 sps:$4 sm:$0xff]   ;;  %v5820_v37 = vld [vmem:[%s8705_s4 + $0x3ec] ss:$16 sps:$4 sm:$0xff]  }
  0x5b   :  { %2054 = vmatprep.mubr.bf16.mxu0 %v4983_v41  ;;  %2266 = vmatprep.mubr.bf16.mxu1 %v4983_v41  ;;  %v5826_v41 = vld [vmem:[%s8705_s4 + $0x40c] ss:$16 sps:$4 sm:$0xff]  }
  0x5d   :  { %2068 = vmatpush1.bf16.msra.mxu0 %v5731_v40  ;;  %2280 = vmatpush1.bf16.msra.mxu1 %v5734_v42  ;;  %v5823_v40 = vld [vmem:[%s8705_s4 + $0x404] ss:$16 sps:$4 sm:$0xff]   ;;  %v5821_v42 = vld [vmem:[%s8705_s4 + $0x400] ss:$16 sps:$4 sm:$0xff]  }
  0x5e   :  { %2069 = vmatprep.subr.bf16.mxu0 %v5739_v43  ;;  %2281 = vmatprep.subr.bf16.mxu1 %v5742_v44  ;;  %v367_v43 = vld [vmem:[%s8707_s0 + $0x48] sm:$0xff]  ;;  %v4976_v44 = vcombine.low %v6806_v48, %v6811_v49 }
  0x5f   :  { %v5832_v48 = vld [vmem:[%s8705_s4 + $0x42c] ss:$16 sps:$4 sm:$0xff]  }
  0x60   :  { %2055 = vmatmul.mubr.bf16.gmra.mrb[20].mxu0 %v4982_v47  ;;  %2267 = vmatmul.mubr.bf16.gmra.mrb[20].mxu1 %v4982_v47  ;;  %v5829_v47 = vld [vmem:[%s8705_s4 + $0x424] ss:$16 sps:$4 sm:$0xff]  }
  0x61   :  { %2070 = vmatpush1.bf16.msra.mxu0 %v5737_v45  ;;  %2282 = vmatpush1.bf16.msra.mxu1 %v5740_v46  ;;  %v371_v45 = vld [vmem:[%s8707_s0 + $0x68] sm:$0xff] }
  0x62   :  { %2071 = vmatprep.subr.bf16.mxu0 %v5745_v50  ;;  %2283 = vmatprep.subr.bf16.mxu1 %v5748_v51  ;;  %v5824_v46 = vld [vmem:[%s8705_s4 + $0x408] ss:$16 sps:$4 sm:$0xff]   ;;  %v4985_v49 = vcombine.high %v367_v43, %v371_v45  ;;  %v5827_v50 = vld [vmem:[%s8705_s4 + $0x420] ss:$16 sps:$4 sm:$0xff]  }
  0x63   :  { %2097 = vmatprep.mubr.bf16.mxu0 %v4977_v52  ;;  %2309 = vmatprep.mubr.bf16.mxu1 %v4977_v52  ;;  %v5830_v51 = vld [vmem:[%s8705_s4 + $0x428] ss:$16 sps:$4 sm:$0xff]   ;;  %v5835_v52 = vld [vmem:[%s8705_s4 + $0x444] ss:$16 sps:$4 sm:$0xff]  }
  0x65   :  { %2072 = vmatpush1.bf16.msra.mxu0 %v5743_v53  ;;  %2284 = vmatpush1.bf16.msra.mxu1 %v5746_v54  ;;  %v5838_v53 = vld [vmem:[%s8705_s4 + $0x44c] ss:$16 sps:$4 sm:$0xff]   ;;  %v5833_v54 = vld [vmem:[%s8705_s4 + $0x440] ss:$16 sps:$4 sm:$0xff]  }
  0x66   :  { %2073 = vmatprep.subr.bf16.mxu0 %v5751_v55  ;;  %2285 = vmatprep.subr.bf16.mxu1 %v5754_v56  ;;  %v7015_v55 = vld [vmem:[%s8707_s0 + $0x10] sm:$0xff]  ;;  %v4984_v56 = vcombine.low %v367_v43, %v371_v45 }
  0x67   :  { %v5905_v43 = vld [vmem:[%s8705_s4 + $0x5c0] ss:$16 sps:$4 sm:$0xff]   ;;  %v5913_v45 = vld [vmem:[%s8705_s4 + $0x5e4] ss:$16 sps:$4 sm:$0xff]  }
  0x69   :  { %2074 = vmatpush1.bf16.msra.mxu0 %v5749_v57  ;;  %2286 = vmatpush1.bf16.msra.mxu1 %v5752_v58  ;;  %v7020_v57 = vld [vmem:[%s8707_s0 + $0x30] sm:$0xff]  ;;  %v5836_v58 = vld [vmem:[%s8705_s4 + $0x448] ss:$16 sps:$4 sm:$0xff]  }
  0x6a   :  { %2075 = vmatprep.subr.bf16.mxu0 %v5757_v59  ;;  %2287 = vmatprep.subr.bf16.mxu1 %v5760_v60  ;;  %v5841_v59 = vld [vmem:[%s8705_s4 + $0x464] ss:$16 sps:$4 sm:$0xff]   ;;  %v5844_v60 = vld [vmem:[%s8705_s4 + $0x46c] ss:$16 sps:$4 sm:$0xff]  }
  0x6d   :  { %2076 = vmatpush1.bf16.msra.mxu0 %v5755_v61  ;;  %2288 = vmatpush1.bf16.msra.mxu1 %v5758_v62  ;;  %v4979_v61 = vcombine.high %v7015_v55, %v7020_v57  ;;  %v5839_v62 = vld [vmem:[%s8705_s4 + $0x460] ss:$16 sps:$4 sm:$0xff]  }
  0x6e   :  { %2077 = vmatprep.subr.bf16.mxu0 %v5763_v63  ;;  %2289 = vmatprep.subr.bf16.mxu1 %v5766_v0  ;;  %v5842_v63 = vld [vmem:[%s8705_s4 + $0x468] ss:$16 sps:$4 sm:$0xff]   ;;  %v5847_v0 = vld [vmem:[%s8705_s4 + $0x484] ss:$16 sps:$4 sm:$0xff]  }
  0x71   :  { %2078 = vmatpush1.bf16.msra.mxu0 %v5761_v1  ;;  %2290 = vmatpush1.bf16.msra.mxu1 %v5764_v2  ;;  %v5850_v1 = vld [vmem:[%s8705_s4 + $0x48c] ss:$16 sps:$4 sm:$0xff]   ;;  %v5845_v2 = vld [vmem:[%s8705_s4 + $0x480] ss:$16 sps:$4 sm:$0xff]  }
  0x72   :  { %2079 = vmatprep.subr.bf16.mxu0 %v5769_v3  ;;  %2291 = vmatprep.subr.bf16.mxu1 %v5772_v4  ;;  %v5848_v3 = vld [vmem:[%s8705_s4 + $0x488] ss:$16 sps:$4 sm:$0xff]   ;;  %v5853_v4 = vld [vmem:[%s8705_s4 + $0x4a4] ss:$16 sps:$4 sm:$0xff]  }
  0x75   :  { %2080 = vmatpush1.bf16.msra.mxu0 %v5767_v5  ;;  %2292 = vmatpush1.bf16.msra.mxu1 %v5770_v6  ;;  %v5856_v5 = vld [vmem:[%s8705_s4 + $0x4ac] ss:$16 sps:$4 sm:$0xff]   ;;  %v5851_v6 = vld [vmem:[%s8705_s4 + $0x4a0] ss:$16 sps:$4 sm:$0xff]  }
  0x76   :  { %2081 = vmatprep.subr.bf16.mxu0 %v5775_v7  ;;  %2293 = vmatprep.subr.bf16.mxu1 %v5778_v8  ;;  %v5854_v7 = vld [vmem:[%s8705_s4 + $0x4a8] ss:$16 sps:$4 sm:$0xff]   ;;  %v5859_v8 = vld [vmem:[%s8705_s4 + $0x4c4] ss:$16 sps:$4 sm:$0xff]  }
  0x79   :  { %2082 = vmatpush1.bf16.msra.mxu0 %v5773_v9  ;;  %2294 = vmatpush1.bf16.msra.mxu1 %v5776_v10  ;;  %v5862_v9 = vld [vmem:[%s8705_s4 + $0x4cc] ss:$16 sps:$4 sm:$0xff]   ;;  %v5857_v10 = vld [vmem:[%s8705_s4 + $0x4c0] ss:$16 sps:$4 sm:$0xff]  }
  0x7a   :  { %2083 = vmatprep.subr.bf16.mxu0 %v5781_v11  ;;  %2295 = vmatprep.subr.bf16.mxu1 %v5784_v13  ;;  %v5860_v11 = vld [vmem:[%s8705_s4 + $0x4c8] ss:$16 sps:$4 sm:$0xff]   ;;  %v5865_v13 = vld [vmem:[%s8705_s4 + $0x4e4] ss:$16 sps:$4 sm:$0xff]  }
  0x7d   :  { %2084 = vmatpush1.bf16.msra.mxu0 %v5779_v14  ;;  %2296 = vmatpush1.bf16.msra.mxu1 %v5782_v15  ;;  %v5868_v14 = vld [vmem:[%s8705_s4 + $0x4ec] ss:$16 sps:$4 sm:$0xff]   ;;  %v5863_v15 = vld [vmem:[%s8705_s4 + $0x4e0] ss:$16 sps:$4 sm:$0xff]  }
  0x7e   :  { %2085 = vmatprep.subr.bf16.mxu0 %v5787_v16  ;;  %2297 = vmatprep.subr.bf16.mxu1 %v5790_v17  ;;  %v5866_v16 = vld [vmem:[%s8705_s4 + $0x4e8] ss:$16 sps:$4 sm:$0xff]   ;;  %v5871_v17 = vld [vmem:[%s8705_s4 + $0x504] ss:$16 sps:$4 sm:$0xff]  }
  0x81   :  { %2086 = vmatpush1.bf16.msra.mxu0 %v5785_v18  ;;  %2298 = vmatpush1.bf16.msra.mxu1 %v5788_v19  ;;  %v5874_v18 = vld [vmem:[%s8705_s4 + $0x50c] ss:$16 sps:$4 sm:$0xff]   ;;  %v5869_v19 = vld [vmem:[%s8705_s4 + $0x500] ss:$16 sps:$4 sm:$0xff]  }
  0x82   :  { %2087 = vmatprep.subr.bf16.mxu0 %v5793_v20  ;;  %2299 = vmatprep.subr.bf16.mxu1 %v5796_v21  ;;  %v5872_v20 = vld [vmem:[%s8705_s4 + $0x508] ss:$16 sps:$4 sm:$0xff]   ;;  %v5877_v21 = vld [vmem:[%s8705_s4 + $0x524] ss:$16 sps:$4 sm:$0xff]  }
  0x85   :  { %2088 = vmatpush1.bf16.msra.mxu0 %v5791_v22  ;;  %2300 = vmatpush1.bf16.msra.mxu1 %v5794_v23  ;;  %v5880_v22 = vld [vmem:[%s8705_s4 + $0x52c] ss:$16 sps:$4 sm:$0xff]   ;;  %v5875_v23 = vld [vmem:[%s8705_s4 + $0x520] ss:$16 sps:$4 sm:$0xff]  }
  0x86   :  { %2089 = vmatprep.subr.bf16.mxu0 %v5799_v24  ;;  %2301 = vmatprep.subr.bf16.mxu1 %v5802_v25  ;;  %v5878_v24 = vld [vmem:[%s8705_s4 + $0x528] ss:$16 sps:$4 sm:$0xff]   ;;  %v5883_v25 = vld [vmem:[%s8705_s4 + $0x544] ss:$16 sps:$4 sm:$0xff]  }
  0x89   :  { %2090 = vmatpush1.bf16.msra.mxu0 %v5797_v26  ;;  %2302 = vmatpush1.bf16.msra.mxu1 %v5800_v27  ;;  %v5886_v26 = vld [vmem:[%s8705_s4 + $0x54c] ss:$16 sps:$4 sm:$0xff]   ;;  %v5881_v27 = vld [vmem:[%s8705_s4 + $0x540] ss:$16 sps:$4 sm:$0xff]  }
  0x8a   :  { %2091 = vmatprep.subr.bf16.mxu0 %v5805_v28  ;;  %2303 = vmatprep.subr.bf16.mxu1 %v5808_v29  ;;  %v5884_v28 = vld [vmem:[%s8705_s4 + $0x548] ss:$16 sps:$4 sm:$0xff]   ;;  %v5889_v29 = vld [vmem:[%s8705_s4 + $0x564] ss:$16 sps:$4 sm:$0xff]  }
  0x8d   :  { %2092 = vmatpush1.bf16.msra.mxu0 %v5803_v30  ;;  %2304 = vmatpush1.bf16.msra.mxu1 %v5806_v31  ;;  %v5892_v30 = vld [vmem:[%s8705_s4 + $0x56c] ss:$16 sps:$4 sm:$0xff]   ;;  %v5887_v31 = vld [vmem:[%s8705_s4 + $0x560] ss:$16 sps:$4 sm:$0xff]  }
  0x8e   :  { %2093 = vmatprep.subr.bf16.mxu0 %v5811_v32  ;;  %2305 = vmatprep.subr.bf16.mxu1 %v5814_v33  ;;  %v5890_v32 = vld [vmem:[%s8705_s4 + $0x568] ss:$16 sps:$4 sm:$0xff]   ;;  %v5895_v33 = vld [vmem:[%s8705_s4 + $0x584] ss:$16 sps:$4 sm:$0xff]  }
  0x91   :  { %2094 = vmatpush1.bf16.msra.mxu0 %v5809_v34  ;;  %2306 = vmatpush1.bf16.msra.mxu1 %v5812_v35  ;;  %v5898_v34 = vld [vmem:[%s8705_s4 + $0x58c] ss:$16 sps:$4 sm:$0xff]   ;;  %v5893_v35 = vld [vmem:[%s8705_s4 + $0x580] ss:$16 sps:$4 sm:$0xff]  }
  0x92   :  { %2095 = vmatprep.subr.bf16.mxu0 %v5817_v36  ;;  %2307 = vmatprep.subr.bf16.mxu1 %v5820_v37  ;;  %v5896_v36 = vld [vmem:[%s8705_s4 + $0x588] ss:$16 sps:$4 sm:$0xff]   ;;  %v5901_v37 = vld [vmem:[%s8705_s4 + $0x5a4] ss:$16 sps:$4 sm:$0xff]  }
  0x95   :  { %2096 = vmatpush1.bf16.msra.mxu0 %v5815_v38  ;;  %2308 = vmatpush1.bf16.msra.mxu1 %v5818_v39  ;;  %v5904_v38 = vld [vmem:[%s8705_s4 + $0x5ac] ss:$16 sps:$4 sm:$0xff]   ;;  %v5899_v39 = vld [vmem:[%s8705_s4 + $0x5a0] ss:$16 sps:$4 sm:$0xff]  }
  0x96   :  { %2118 = vmatprep.subr.bf16.mxu0 %v5823_v40  ;;  %2330 = vmatprep.subr.bf16.mxu1 %v5826_v41  ;;  %v5902_v40 = vld [vmem:[%s8705_s4 + $0x5a8] ss:$16 sps:$4 sm:$0xff]   ;;  %v5907_v41 = vld [vmem:[%s8705_s4 + $0x5c4] ss:$16 sps:$4 sm:$0xff]  }
  0x98   :  { %2098 = vmatmul.mubr.bf16.vlgmr.msra.gmra.mrb[16].mxu0 %v4976_v44  ;;  %2310 = vmatmul.mubr.bf16.vlgmr.msra.gmra.mrb[16].mxu1 %v4976_v44  ;;  %v5908_v44 = vld [vmem:[%s8705_s4 + $0x5c8] ss:$16 sps:$4 sm:$0xff]  }
  0x99   :  { %2119 = vmatpush1.bf16.msra.mxu0 %v5821_v42  ;;  %2331 = vmatpush1.bf16.msra.mxu1 %v5824_v46  ;;  %v5910_v42 = vld [vmem:[%s8705_s4 + $0x5cc] ss:$16 sps:$4 sm:$0xff]  }
  0x9a   :  { %2120 = vmatprep.subr.bf16.mxu0 %v5829_v47  ;;  %2332 = vmatprep.subr.bf16.mxu1 %v5832_v48  ;;  %v5916_v46 = vld [vmem:[%s8705_s4 + $0x5ec] ss:$16 sps:$4 sm:$0xff]   ;;  %v5911_v47 = vld [vmem:[%s8705_s4 + $0x5e0] ss:$16 sps:$4 sm:$0xff]   ;;  %v5914_v48 = vld [vmem:[%s8705_s4 + $0x5e8] ss:$16 sps:$4 sm:$0xff]  }
  0x9b   :  { %2107 = vmatprep.mubr.bf16.mxu0 %v4985_v49  ;;  %2319 = vmatprep.mubr.bf16.mxu1 %v4985_v49  ;;  %v5919_v49 = vld [vmem:[%s8705_s4 + $0x604] ss:$16 sps:$4 sm:$0xff]  }
  0x9d   :  { %2121 = vmatpush1.bf16.msra.mxu0 %v5827_v50  ;;  %2333 = vmatpush1.bf16.msra.mxu1 %v5830_v51  ;;  %v5922_v50 = vld [vmem:[%s8705_s4 + $0x60c] ss:$16 sps:$4 sm:$0xff]   ;;  %v4978_v51 = vcombine.low %v7015_v55, %v7020_v57  ;;  %v5925_v55 = vld [vmem:[%s8705_s4 + $0x624] ss:$16 sps:$4 sm:$0xff]  }
  0x9e   :  { %2122 = vmatprep.subr.bf16.mxu0 %v5835_v52  ;;  %2334 = vmatprep.subr.bf16.mxu1 %v5838_v53  ;;  %v368_v52 = vld [vmem:[%s8707_s0 + $0x50] sm:$0xff]  ;;  %v5928_v57 = vld [vmem:[%s8705_s4 + $0x62c] ss:$16 sps:$4 sm:$0xff]  }
  0x9f   :  { %v372_v53 = vld [vmem:[%s8707_s0 + $0x70] sm:$0xff] }
  0xa0   :  { %2108 = vmatmul.mubr.bf16.gmra.mrb[20].mxu0 %v4984_v56  ;;  %2320 = vmatmul.mubr.bf16.gmra.mrb[20].mxu1 %v4984_v56  ;;  %v5920_v56 = vld [vmem:[%s8705_s4 + $0x608] ss:$16 sps:$4 sm:$0xff]  }
  0xa1   :  { %2123 = vmatpush1.bf16.msra.mxu0 %v5833_v54  ;;  %2335 = vmatpush1.bf16.msra.mxu1 %v5836_v58  ;;  %v5917_v54 = vld [vmem:[%s8705_s4 + $0x600] ss:$16 sps:$4 sm:$0xff]   ;;  %v4987_v58 = vcombine.high %v368_v52, %v372_v53 }
  0xa2   :  { %2124 = vmatprep.subr.bf16.mxu0 %v5841_v59  ;;  %2336 = vmatprep.subr.bf16.mxu1 %v5844_v60  ;;  %v5923_v59 = vld [vmem:[%s8705_s4 + $0x620] ss:$16 sps:$4 sm:$0xff]   ;;  %v5926_v60 = vld [vmem:[%s8705_s4 + $0x628] ss:$16 sps:$4 sm:$0xff]  }
  0xa3   :  { %2150 = vmatprep.mubr.bf16.mxu0 %v4979_v61  ;;  %2362 = vmatprep.mubr.bf16.mxu1 %v4979_v61  ;;  %v5931_v61 = vld [vmem:[%s8705_s4 + $0x644] ss:$16 sps:$4 sm:$0xff]  }
  0xa5   :  { %2125 = vmatpush1.bf16.msra.mxu0 %v5839_v62  ;;  %2337 = vmatpush1.bf16.msra.mxu1 %v5842_v63  ;;  %v5934_v62 = vld [vmem:[%s8705_s4 + $0x64c] ss:$16 sps:$4 sm:$0xff]  }
  0xa6   :  { %2126 = vmatprep.subr.bf16.mxu0 %v5847_v0  ;;  %2338 = vmatprep.subr.bf16.mxu1 %v5850_v1 }
  0xa9   :  { %2127 = vmatpush1.bf16.msra.mxu0 %v5845_v2  ;;  %2339 = vmatpush1.bf16.msra.mxu1 %v5848_v3  ;;  %v4986_v3 = vcombine.low %v368_v52, %v372_v53  ;;  %v5965_v52 = vld [vmem:[%s8705_s4 + $0x700] ss:$16 sps:$4 sm:$0xff]   ;;  %v5968_v53 = vld [vmem:[%s8705_s4 + $0x708] ss:$16 sps:$4 sm:$0xff]  }
  0xaa   :  { %2128 = vmatprep.subr.bf16.mxu0 %v5853_v4  ;;  %2340 = vmatprep.subr.bf16.mxu1 %v5856_v5  ;;  %v7232_v4 = vld [vmem:[%s8707_s0 + $0x18] sm:$0xff] }
  0xab   :  { %v7237_v5 = vld [vmem:[%s8707_s0 + $0x38] sm:$0xff] }
  0xad   :  { %2129 = vmatpush1.bf16.msra.mxu0 %v5851_v6  ;;  %2341 = vmatpush1.bf16.msra.mxu1 %v5854_v7  ;;  %v5929_v7 = vld [vmem:[%s8705_s4 + $0x640] ss:$16 sps:$4 sm:$0xff]  }
  0xae   :  { %2130 = vmatprep.subr.bf16.mxu0 %v5859_v8  ;;  %2342 = vmatprep.subr.bf16.mxu1 %v5862_v9  ;;  %v5932_v8 = vld [vmem:[%s8705_s4 + $0x648] ss:$16 sps:$4 sm:$0xff]  }
  0xb1   :  { %2131 = vmatpush1.bf16.msra.mxu0 %v5857_v10  ;;  %2343 = vmatpush1.bf16.msra.mxu1 %v5860_v11 }
  0xb2   :  { %2132 = vmatprep.subr.bf16.mxu0 %v5865_v13  ;;  %2344 = vmatprep.subr.bf16.mxu1 %v5868_v14  ;;  %v5937_v13 = vld [vmem:[%s8705_s4 + $0x664] ss:$16 sps:$4 sm:$0xff]   ;;  %v5940_v14 = vld [vmem:[%s8705_s4 + $0x66c] ss:$16 sps:$4 sm:$0xff]  }
  0xb5   :  { %2133 = vmatpush1.bf16.msra.mxu0 %v5863_v15  ;;  %2345 = vmatpush1.bf16.msra.mxu1 %v5866_v16  ;;  %v4981_v15 = vcombine.high %v7232_v4, %v7237_v5  ;;  %v5935_v16 = vld [vmem:[%s8705_s4 + $0x660] ss:$16 sps:$4 sm:$0xff]  }
  0xb6   :  { %2134 = vmatprep.subr.bf16.mxu0 %v5871_v17  ;;  %2346 = vmatprep.subr.bf16.mxu1 %v5874_v18  ;;  %v5938_v17 = vld [vmem:[%s8705_s4 + $0x668] ss:$16 sps:$4 sm:$0xff]   ;;  %v5943_v18 = vld [vmem:[%s8705_s4 + $0x684] ss:$16 sps:$4 sm:$0xff]  }
  0xb9   :  { %2135 = vmatpush1.bf16.msra.mxu0 %v5869_v19  ;;  %2347 = vmatpush1.bf16.msra.mxu1 %v5872_v20  ;;  %v5946_v19 = vld [vmem:[%s8705_s4 + $0x68c] ss:$16 sps:$4 sm:$0xff]  }
  0xba   :  { %2136 = vmatprep.subr.bf16.mxu0 %v5877_v21  ;;  %2348 = vmatprep.subr.bf16.mxu1 %v5880_v22 }
  0xbd   :  { %2137 = vmatpush1.bf16.msra.mxu0 %v5875_v23  ;;  %2349 = vmatpush1.bf16.msra.mxu1 %v5878_v24 }
  0xbe   :  { %2138 = vmatprep.subr.bf16.mxu0 %v5883_v25  ;;  %2350 = vmatprep.subr.bf16.mxu1 %v5886_v26  ;;  %v5941_v25 = vld [vmem:[%s8705_s4 + $0x680] ss:$16 sps:$4 sm:$0xff]   ;;  %v5944_v26 = vld [vmem:[%s8705_s4 + $0x688] ss:$16 sps:$4 sm:$0xff]  }
  0xc1   :  { %2139 = vmatpush1.bf16.msra.mxu0 %v5881_v27  ;;  %2351 = vmatpush1.bf16.msra.mxu1 %v5884_v28 }
  0xc2   :  { %2140 = vmatprep.subr.bf16.mxu0 %v5889_v29  ;;  %2352 = vmatprep.subr.bf16.mxu1 %v5892_v30  ;;  %v5949_v30 = vld [vmem:[%s8705_s4 + $0x6a4] ss:$16 sps:$4 sm:$0xff]  }
  0xc5   :  { %2141 = vmatpush1.bf16.msra.mxu0 %v5887_v31  ;;  %2353 = vmatpush1.bf16.msra.mxu1 %v5890_v32  ;;  %v5952_v31 = vld [vmem:[%s8705_s4 + $0x6ac] ss:$16 sps:$4 sm:$0xff]   ;;  %v5947_v32 = vld [vmem:[%s8705_s4 + $0x6a0] ss:$16 sps:$4 sm:$0xff]  }
  0xc6   :  { %2142 = vmatprep.subr.bf16.mxu0 %v5895_v33  ;;  %2354 = vmatprep.subr.bf16.mxu1 %v5898_v34  ;;  %v5950_v33 = vld [vmem:[%s8705_s4 + $0x6a8] ss:$16 sps:$4 sm:$0xff]   ;;  %v5955_v34 = vld [vmem:[%s8705_s4 + $0x6c4] ss:$16 sps:$4 sm:$0xff]  }
  0xc9   :  { %2143 = vmatpush1.bf16.msra.mxu0 %v5893_v35  ;;  %2355 = vmatpush1.bf16.msra.mxu1 %v5896_v36  ;;  %v5958_v35 = vld [vmem:[%s8705_s4 + $0x6cc] ss:$16 sps:$4 sm:$0xff]  }
  0xca   :  { %2144 = vmatprep.subr.bf16.mxu0 %v5901_v37  ;;  %2356 = vmatprep.subr.bf16.mxu1 %v5904_v38 }
  0xcd   :  { %2145 = vmatpush1.bf16.msra.mxu0 %v5899_v39  ;;  %2357 = vmatpush1.bf16.msra.mxu1 %v5902_v40 }
  0xce   :  { %2146 = vmatprep.subr.bf16.mxu0 %v5907_v41  ;;  %2358 = vmatprep.subr.bf16.mxu1 %v5910_v42  ;;  %v5953_v41 = vld [vmem:[%s8705_s4 + $0x6c0] ss:$16 sps:$4 sm:$0xff]   ;;  %v5956_v42 = vld [vmem:[%s8705_s4 + $0x6c8] ss:$16 sps:$4 sm:$0xff]  }
  0xd1   :  { %2147 = vmatpush1.bf16.msra.mxu0 %v5905_v43  ;;  %2359 = vmatpush1.bf16.msra.mxu1 %v5908_v44 }
  0xd2   :  { %2148 = vmatprep.subr.bf16.mxu0 %v5913_v45  ;;  %2360 = vmatprep.subr.bf16.mxu1 %v5916_v46  ;;  %v5961_v46 = vld [vmem:[%s8705_s4 + $0x6e4] ss:$16 sps:$4 sm:$0xff]  }
  0xd5   :  { %2149 = vmatpush1.bf16.msra.mxu0 %v5911_v47  ;;  %2361 = vmatpush1.bf16.msra.mxu1 %v5914_v48  ;;  %v5964_v47 = vld [vmem:[%s8705_s4 + $0x6ec] ss:$16 sps:$4 sm:$0xff]   ;;  %v5959_v48 = vld [vmem:[%s8705_s4 + $0x6e0] ss:$16 sps:$4 sm:$0xff]  }
  0xd6   :  { %2171 = vmatprep.subr.bf16.mxu0 %v5919_v49  ;;  %2383 = vmatprep.subr.bf16.mxu1 %v5922_v50  ;;  %v5962_v49 = vld [vmem:[%s8705_s4 + $0x6e8] ss:$16 sps:$4 sm:$0xff]   ;;  %v5967_v50 = vld [vmem:[%s8705_s4 + $0x704] ss:$16 sps:$4 sm:$0xff]  }
  0xd8   :  { %2151 = vmatmul.mubr.bf16.vlgmr.msra.gmra.mrb[16].mxu0 %v4978_v51  ;;  %2363 = vmatmul.mubr.bf16.vlgmr.msra.gmra.mrb[16].mxu1 %v4978_v51  ;;  %v5970_v51 = vld [vmem:[%s8705_s4 + $0x70c] ss:$16 sps:$4 sm:$0xff]  }
  0xd9   :  { %2172 = vmatpush1.bf16.msra.mxu0 %v5917_v54  ;;  %2384 = vmatpush1.bf16.msra.mxu1 %v5920_v56  ;;  %v5973_v54 = vld [vmem:[%s8705_s4 + $0x724] ss:$16 sps:$4 sm:$0xff]   ;;  %v5976_v56 = vld [vmem:[%s8705_s4 + $0x72c] ss:$16 sps:$4 sm:$0xff]  }
  0xda   :  { %2173 = vmatprep.subr.bf16.mxu0 %v5925_v55  ;;  %2385 = vmatprep.subr.bf16.mxu1 %v5928_v57  ;;  %v5971_v55 = vld [vmem:[%s8705_s4 + $0x720] ss:$16 sps:$4 sm:$0xff]   ;;  %v5974_v57 = vld [vmem:[%s8705_s4 + $0x728] ss:$16 sps:$4 sm:$0xff]  }
  0xdb   :  { %v7221_v63 = vpop.f32.mrb[0].mxu0  ;;  %v7223_v0 = vpop.f32.mrb[0].mxu1  ;;  %2160 = vmatprep.mubr.bf16.mxu0 %v4987_v58  ;;  %2372 = vmatprep.mubr.bf16.mxu1 %v4987_v58  ;;  %v5979_v58 = vld [vmem:[%s8705_s4 + $0x744] ss:$16 sps:$4 sm:$0xff]  }
  0xdc   :  { %v7225_v1 = vpop.f32.mrb[1].mxu0  ;;  %v7227_v2 = vpop.f32.mrb[1].mxu1 }
  0xdd   :  { %2174 = vmatpush1.bf16.msra.mxu0 %v5923_v59  ;;  %2386 = vmatpush1.bf16.msra.mxu1 %v5926_v60  ;;  %v7239_v6 = vpop.f32.mrb[2].mxu0  ;;  %v7247_v9 = vpop.f32.mrb[2].mxu1  ;;  %v5982_v59 = vld [vmem:[%s8705_s4 + $0x74c] ss:$16 sps:$4 sm:$0xff]   ;;  %v5977_v60 = vld [vmem:[%s8705_s4 + $0x740] ss:$16 sps:$4 sm:$0xff]  }
  0xde   :  { %v7249_v10 = vpop.f32.mrb[3].mxu0  ;;  %2175 = vmatprep.subr.bf16.mxu0 %v5931_v61  ;;  %2387 = vmatprep.subr.bf16.mxu1 %v5934_v62  ;;  %v7251_v11 = vpop.f32.mrb[3].mxu1  ;;  %v5980_v61 = vld [vmem:[%s8705_s4 + $0x748] ss:$16 sps:$4 sm:$0xff]   ;;  %v5985_v62 = vld [vmem:[%s8705_s4 + $0x764] ss:$16 sps:$4 sm:$0xff]  }
  0xe0   :  { %2161 = vmatmul.mubr.bf16.gmra.mrb[20].mxu0 %v4986_v3  ;;  %2373 = vmatmul.mubr.bf16.gmra.mrb[20].mxu1 %v4986_v3  ;;  %v5988_v3 = vld [vmem:[%s8705_s4 + $0x76c] ss:$16 sps:$4 sm:$0xff]  }
  0xe1   :  { %2176 = vmatpush1.bf16.msra.mxu0 %v5929_v7  ;;  %2388 = vmatpush1.bf16.msra.mxu1 %v5932_v8  ;;  %v5983_v7 = vld [vmem:[%s8705_s4 + $0x760] ss:$16 sps:$4 sm:$0xff]   ;;  %v5986_v8 = vld [vmem:[%s8705_s4 + $0x768] ss:$16 sps:$4 sm:$0xff]  }
  0xe2   :  { %2177 = vmatprep.subr.bf16.mxu0 %v5937_v13  ;;  %2389 = vmatprep.subr.bf16.mxu1 %v5940_v14  ;;  %v5991_v13 = vld [vmem:[%s8705_s4 + $0x784] ss:$16 sps:$4 sm:$0xff]   ;;  %v5994_v14 = vld [vmem:[%s8705_s4 + $0x78c] ss:$16 sps:$4 sm:$0xff]  }
  0xe3   :  { %v7273_v20 = vpop.f32.mrb[4].mxu0  ;;  %v7275_v21 = vpop.f32.mrb[4].mxu1  ;;  %2203 = vmatprep.mubr.bf16.mxu0 %v4981_v15  ;;  %2415 = vmatprep.mubr.bf16.mxu1 %v4981_v15 }
  0xe4   :  { %v7277_v22 = vpop.f32.mrb[5].mxu0  ;;  %v7279_v23 = vpop.f32.mrb[5].mxu1 }
  0xe5   :  { %2178 = vmatpush1.bf16.msra.mxu0 %v5935_v16  ;;  %2390 = vmatpush1.bf16.msra.mxu1 %v5938_v17  ;;  %v7281_v24 = vpop.f32.mrb[6].mxu0  ;;  %v7289_v27 = vpop.f32.mrb[6].mxu1 }
  0xe6   :  { %v7291_v28 = vpop.f32.mrb[7].mxu0  ;;  %2179 = vmatprep.subr.bf16.mxu0 %v5943_v18  ;;  %2391 = vmatprep.subr.bf16.mxu1 %v5946_v19  ;;  %v7293_v29 = vpop.f32.mrb[7].mxu1 }
  0xe9   :  { %2180 = vmatpush1.bf16.msra.mxu0 %v5941_v25  ;;  %2392 = vmatpush1.bf16.msra.mxu1 %v5944_v26  ;;  %v5989_v26 = vld [vmem:[%s8705_s4 + $0x780] ss:$16 sps:$4 sm:$0xff]  }
  0xea   :  { %2181 = vmatprep.subr.bf16.mxu0 %v5949_v30  ;;  %2393 = vmatprep.subr.bf16.mxu1 %v5952_v31  ;;  %v5992_v30 = vld [vmem:[%s8705_s4 + $0x788] ss:$16 sps:$4 sm:$0xff]  }
  0xeb   :  { %v7313_v36 = vpop.f32.mrb[8].mxu0  ;;  %v7315_v37 = vpop.f32.mrb[8].mxu1 }
  0xec   :  { %8746 = vst [vmem:[#allocation3_spill] sm:$0xff] %v7313_v36  ;;  %8747 = vst [vmem:[#allocation4_spill] sm:$0xff] %v7315_v37  ;;  %v7317_v38 = vpop.f32.mrb[9].mxu0  ;;  %v7319_v39 = vpop.f32.mrb[9].mxu1 }
  0xed   :  { %8748 = vst [vmem:[#allocation5_spill] sm:$0xff] %v7317_v38  ;;  %8749 = vst [vmem:[#allocation6_spill] sm:$0xff] %v7319_v39  ;;  %2182 = vmatpush1.bf16.msra.mxu0 %v5947_v32  ;;  %2394 = vmatpush1.bf16.msra.mxu1 %v5950_v33  ;;  %v7321_v40 = vpop.f32.mrb[10].mxu0  ;;  %v7329_v43 = vpop.f32.mrb[10].mxu1  ;;  %v5997_v33 = vld [vmem:[%s8705_s4 + $0x7a4] ss:$16 sps:$4 sm:$0xff]  }
  0xee   :  { %8750 = vst [vmem:[#allocation7_spill] sm:$0xff] %v7321_v40  ;;  %8751 = vst [vmem:[#allocation8_spill] sm:$0xff] %v7329_v43  ;;  %v7331_v44 = vpop.f32.mrb[11].mxu0  ;;  %2183 = vmatprep.subr.bf16.mxu0 %v5955_v34  ;;  %2395 = vmatprep.subr.bf16.mxu1 %v5958_v35  ;;  %v7333_v45 = vpop.f32.mrb[11].mxu1  ;;  %v6000_v34 = vld [vmem:[%s8705_s4 + $0x7ac] ss:$16 sps:$4 sm:$0xff]  }
  0xef   :  { %8752 = vst [vmem:[#allocation9_spill] sm:$0xff] %v7331_v44  ;;  %8753 = vst [vmem:[#allocation10_spill] sm:$0xff] %v7333_v45  ;;  %v5995_v35 = vld [vmem:[%s8705_s4 + $0x7a0] ss:$16 sps:$4 sm:$0xff]  }
  0xf1   :  { %2184 = vmatpush1.bf16.msra.mxu0 %v5953_v41  ;;  %2396 = vmatpush1.bf16.msra.mxu1 %v5956_v42  ;;  %v5998_v41 = vld [vmem:[%s8705_s4 + $0x7a8] ss:$16 sps:$4 sm:$0xff]   ;;  %v6003_v42 = vld [vmem:[%s8705_s4 + $0x7c4] ss:$16 sps:$4 sm:$0xff]  }
  0xf2   :  { %2185 = vmatprep.subr.bf16.mxu0 %v5961_v46  ;;  %2397 = vmatprep.subr.bf16.mxu1 %v5964_v47  ;;  %v6006_v46 = vld [vmem:[%s8705_s4 + $0x7cc] ss:$16 sps:$4 sm:$0xff]   ;;  %v6001_v47 = vld [vmem:[%s8705_s4 + $0x7c0] ss:$16 sps:$4 sm:$0xff]  }
  0xf3   :  { %v7401_v15 = vpop.f32.mrb[12].mxu0  ;;  %v7403_v16 = vpop.f32.mrb[12].mxu1 }
  0xf4   :  { %8754 = vst [vmem:[#allocation11_spill] sm:$0xff] %v7401_v15  ;;  %8755 = vst [vmem:[#allocation12_spill] sm:$0xff] %v7403_v16  ;;  %v7405_v17 = vpop.f32.mrb[13].mxu0  ;;  %v7407_v18 = vpop.f32.mrb[13].mxu1 }
  0xf5   :  { %2186 = vmatpush1.bf16.msra.mxu0 %v5959_v48  ;;  %2398 = vmatpush1.bf16.msra.mxu1 %v5962_v49  ;;  %8756 = vst [vmem:[#allocation13_spill] sm:$0xff] %v7405_v17  ;;  %8757 = vst [vmem:[#allocation14_spill] sm:$0xff] %v7407_v18  ;;  %v7409_v19 = vpop.f32.mrb[14].mxu0  ;;  %v7411_v25 = vpop.f32.mrb[14].mxu1  ;;  %v6004_v48 = vld [vmem:[%s8705_s4 + $0x7c8] ss:$16 sps:$4 sm:$0xff]  }
  0xf6   :  { %2187 = vmatprep.subr.bf16.mxu0 %v5967_v50  ;;  %2399 = vmatprep.subr.bf16.mxu1 %v5970_v51  ;;  %8758 = vst [vmem:[#allocation15_spill] sm:$0xff] %v7409_v19  ;;  %8759 = vst [vmem:[#allocation16_spill] sm:$0xff] %v7411_v25  ;;  %v7419_v31 = vpop.f32.mrb[15].mxu0  ;;  %v7421_v32 = vpop.f32.mrb[15].mxu1  ;;  %v6009_v49 = vld [vmem:[%s8705_s4 + $0x7e4] ss:$16 sps:$4 sm:$0xff]  }
  0xf7   :  { %8760 = vst [vmem:[#allocation17_spill] sm:$0xff] %v7419_v31  ;;  %8761 = vst [vmem:[#allocation18_spill] sm:$0xff] %v7421_v32  ;;  %v6012_v50 = vld [vmem:[%s8705_s4 + $0x7ec] ss:$16 sps:$4 sm:$0xff]   ;;  %v6007_v51 = vld [vmem:[%s8705_s4 + $0x7e0] ss:$16 sps:$4 sm:$0xff]  }
  0xf9   :  { %2188 = vmatpush1.bf16.msra.mxu0 %v5965_v52  ;;  %2400 = vmatpush1.bf16.msra.mxu1 %v5968_v53  ;;  %v6010_v52 = vld [vmem:[%s8705_s4 + $0x7e8] ss:$16 sps:$4 sm:$0xff]  }
  0xfa   :  { %2189 = vmatprep.subr.bf16.mxu0 %v5973_v54  ;;  %2401 = vmatprep.subr.bf16.mxu1 %v5976_v56  ;;  %v369_v53 = vld [vmem:[%s8707_s0 + $0x58] sm:$0xff]  ;;  %v4980_v56 = vcombine.low %v7232_v4, %v7237_v5  ;;  %v7474_v4 = vsub.s32 2, %v6521_v12  ;;  %v630_v5 = vld [vmem:[%s8709_s5] sm:$0xf] }
  0xfb   :  { %v373_v54 = vld [vmem:[%s8707_s0 + $0x78] sm:$0xff] }
  0xfc   :  { %8763 = vst [vmem:[#allocation20_spill] sm:$0xff] %v7474_v4 }
  0xfd   :  { %2190 = vmatpush1.bf16.msra.mxu0 %v5971_v55  ;;  %2402 = vmatpush1.bf16.msra.mxu1 %v5974_v57  ;;  %v4989_v55 = vcombine.high %v369_v53, %v373_v54  ;;  %v4988_v57 = vcombine.low %v369_v53, %v373_v54 }
  0xfe   :  { %2191 = vmatprep.subr.bf16.mxu0 %v5979_v58  ;;  %2403 = vmatprep.subr.bf16.mxu1 %v5982_v59  ;;  %v18_v58 = vstv %s8708_s7  ;;  %v7471_v59 = vsub.s32 0, %v6521_v12 }
  0xff   :  { %19 = vst [vmem:[#allocation2] sm:$0x1] %v18_v58 }
 0x100   :  { %8762 = vst [vmem:[#allocation19_spill] sm:$0xff] %v7471_v59 }
 0x101   :  { %2192 = vmatpush1.bf16.msra.mxu0 %v5977_v60  ;;  %2404 = vmatpush1.bf16.msra.mxu1 %v5980_v61  ;;  %v7480_v60 = vsub.s32 1, %v6521_v12  ;;  %v7483_v61 = vsub.s32 3, %v6521_v12 }
 0x102   :  { %2193 = vmatprep.subr.bf16.mxu0 %v5985_v62  ;;  %2405 = vmatprep.subr.bf16.mxu1 %v5988_v3  ;;  %v635_v62 = vrot.slane %v630_v5, %v7471_v59  ;;  %v643_v3 = vrot.slane %v630_v5, %v7474_v4 }
 0x103   :  { %8764 = vst [vmem:[#allocation21_spill] sm:$0xff] %v7480_v60  ;;  %8765 = vst [vmem:[#allocation22_spill] sm:$0xff] %v7483_v61 }
 0x105   :  { %2194 = vmatpush1.bf16.msra.mxu0 %v5983_v7  ;;  %2406 = vmatpush1.bf16.msra.mxu1 %v5986_v8  ;;  %v7488_v7 = vrot.slane %v630_v5, %v7480_v60  ;;  %v7491_v8 = vrot.slane %v630_v5, %v7483_v61 }
 0x106   :  { %2195 = vmatprep.subr.bf16.mxu0 %v5991_v13  ;;  %2407 = vmatprep.subr.bf16.mxu1 %v5994_v14  ;;  %v2468_v13 = vld [vmem:[%s8710_s6] sm:$0xf] }
 0x109   :  { %2196 = vmatpush1.bf16.msra.mxu0 %v5989_v26  ;;  %2408 = vmatpush1.bf16.msra.mxu1 %v5992_v30 }
 0x10a   :  { %2197 = vmatprep.subr.bf16.mxu0 %v5997_v33  ;;  %2409 = vmatprep.subr.bf16.mxu1 %v6000_v34 }
 0x10d   :  { %2198 = vmatpush1.bf16.msra.mxu0 %v5995_v35  ;;  %2410 = vmatpush1.bf16.msra.mxu1 %v5998_v41  ;;  %v7501_v35 = vrot.slane %v2468_v13, %v7471_v59  ;;  %v7504_v41 = vrot.slane %v2468_v13, %v7474_v4 }
 0x10e   :  { %2199 = vmatprep.subr.bf16.mxu0 %v6003_v42  ;;  %2411 = vmatprep.subr.bf16.mxu1 %v6006_v46 }
 0x111   :  { %2200 = vmatpush1.bf16.msra.mxu0 %v6001_v47  ;;  %2412 = vmatpush1.bf16.msra.mxu1 %v6004_v48 }
 0x112   :  { %2201 = vmatprep.subr.bf16.mxu0 %v6009_v49  ;;  %2413 = vmatprep.subr.bf16.mxu1 %v6012_v50  ;;  %v7513_v49 = vrot.slane %v2468_v13, %v7480_v60  ;;  %v7516_v50 = vrot.slane %v2468_v13, %v7483_v61 }
 0x115   :  { %2202 = vmatpush1.bf16.msra.mxu0 %v6007_v51  ;;  %2414 = vmatpush1.bf16.msra.mxu1 %v6010_v52 }
 0x118   :  { %2204 = vmatmul.mubr.bf16.vlgmr.msra.gmra.mrb[16].mxu0 %v4980_v56  ;;  %2416 = vmatmul.mubr.bf16.vlgmr.msra.gmra.mrb[16].mxu1 %v4980_v56 }
 0x119   :  { %2213 = vmatprep.mubr.bf16.mxu0 %v4989_v55  ;;  %2425 = vmatprep.mubr.bf16.mxu1 %v4989_v55 }
 0x120   :  { %2214 = vmatmul.mubr.bf16.gmra.mrb[20].mxu0 %v4988_v57  ;;  %2426 = vmatmul.mubr.bf16.gmra.mrb[20].mxu1 %v4988_v57 }
 0x1eb   :  { %v2205_v14 = vpop.f32.mrb[16].mxu0  ;;  %v2417_v26 = vpop.f32.mrb[16].mxu1 }
 0x1ec   :  { %v7496_v30 = vadd.f32 %v2205_v14, %v635_v62  ;;  %v7498_v12 = vadd.f32 %v2417_v26, %v643_v3  ;;  %v2207_v33 = vpop.f32.mrb[17].mxu0  ;;  %v2419_v34 = vpop.f32.mrb[17].mxu1 }
 0x1ed   :  { %v7507_v42 = vadd.f32 %v2207_v33, %v7488_v7  ;;  %v7510_v46 = vadd.f32 %v2419_v34, %v7491_v8  ;;  %v2209_v47 = vpop.f32.mrb[18].mxu0  ;;  %v2421_v48 = vpop.f32.mrb[18].mxu1 }
 0x1ee   :  { %v2436_v51 = vadd.f32 %v7496_v30, %v7221_v63  ;;  %v2438_v52 = vadd.f32 %v7498_v12, %v7223_v0  ;;  %v7522_v53 = vadd.f32 %v2209_v47, %v635_v62  ;;  %v7524_v54 = vadd.f32 %v2421_v48, %v643_v3  ;;  %v2211_v56 = vpop.f32.mrb[19].mxu0  ;;  %v2423_v55 = vpop.f32.mrb[19].mxu1 }
 0x1ef   :  { %v2437_v57 = vadd.f32 %v7507_v42, %v7225_v1  ;;  %v2439_v58 = vadd.f32 %v7510_v46, %v7227_v2  ;;  %v7531_v5 = vadd.f32 %v2211_v56, %v7488_v7  ;;  %v7534_v13 = vadd.f32 %v2423_v55, %v7491_v8 }
 0x1f0   :  { %v2452_v14 = vadd.f32 %v2436_v51, %v7313_v36  ;;  %v2454_v26 = vadd.f32 %v2438_v52, %v7315_v37  ;;  %v2440_v33 = vadd.f32 %v7522_v53, %v7239_v6  ;;  %v2442_v34 = vadd.f32 %v7524_v54, %v7247_v9 }
 0x1f1   :  { %v2453_v47 = vadd.f32 %v2437_v57, %v7317_v38  ;;  %v2441_v48 = vadd.f32 %v7531_v5, %v7249_v10  ;;  %v2443_v56 = vadd.f32 %v7534_v13, %v7251_v11  ;;  %v2455_v55 = vadd.f32 %v2439_v58, %v7319_v39 }
 0x1f2   :  { %v2456_v51 = vadd.f32 %v2440_v33, %v7321_v40  ;;  %v2458_v52 = vadd.f32 %v2442_v34, %v7329_v43  ;;  %v2490_v37 = vmul.f32 %v7501_v35, %v2452_v14  ;;  %v2492_v36 = vmul.f32 %v7504_v41, %v2454_v26 }
 0x1f3   :  { %v2457_v61 = vadd.f32 %v2441_v48, %v7331_v44  ;;  %v2459_v57 = vadd.f32 %v2443_v56, %v7333_v45  ;;  %v2215_v38 = vpop.f32.mrb[20].mxu0  ;;  %v2427_v60 = vpop.f32.mrb[20].mxu1  ;;  %v2491_v4 = vmul.f32 %v7513_v49, %v2453_v47  ;;  %v2493_v59 = vmul.f32 %v7516_v50, %v2455_v55 }
 0x1f4   :  { %v2494_v58 = vmul.f32 %v7501_v35, %v2456_v51  ;;  %v7557_v39 = vadd.f32 %v2215_v38, %v635_v62  ;;  %v7559_v33 = vadd.f32 %v2427_v60, %v643_v3  ;;  %v2217_v34 = vpop.f32.mrb[21].mxu0  ;;  %v2429_v14 = vpop.f32.mrb[21].mxu1  ;;  %v2496_v26 = vmul.f32 %v7504_v41, %v2458_v52 }
 0x1f5   :  { %v2495_v48 = vmul.f32 %v7513_v49, %v2457_v61  ;;  %v7564_v56 = vadd.f32 %v2217_v34, %v7488_v7  ;;  %v7567_v45 = vadd.f32 %v2429_v14, %v7491_v8  ;;  %v2219_v47 = vpop.f32.mrb[22].mxu0  ;;  %v2431_v55 = vpop.f32.mrb[22].mxu1  ;;  %v2506_v44 = vadd.f32 %v2491_v4, %v2490_v37 }
 0x1f6   :  { %8766 = vst [vmem:[#allocation23_spill] sm:$0xff] %v7557_v39  ;;  %8767 = vst [vmem:[#allocation24_spill] sm:$0xff] %v7559_v33  ;;  %v2444_v38 = vadd.f32 %v7557_v39, %v7273_v20  ;;  %v2446_v60 = vadd.f32 %v7559_v33, %v7275_v21  ;;  %v7573_v51 = vadd.f32 %v2219_v47, %v635_v62  ;;  %v2221_v61 = vpop.f32.mrb[23].mxu0  ;;  %v2433_v43 = vpop.f32.mrb[23].mxu1 }
 0x1f7   :  { %8768 = vst [vmem:[#allocation25_spill] sm:$0xff] %v7567_v45  ;;  %v7575_v52 = vadd.f32 %v2431_v55, %v643_v3  ;;  %v2445_v34 = vadd.f32 %v7564_v56, %v7277_v22  ;;  %v2447_v14 = vadd.f32 %v7567_v45, %v7279_v23  ;;  %v7582_v37 = vadd.f32 %v2221_v61, %v7488_v7 }
 0x1f8   :  { %8769 = vst [vmem:[#allocation26_spill] sm:$0xff] %v7573_v51  ;;  %v7585_v4 = vadd.f32 %v2433_v43, %v7491_v8  ;;  %v2460_v40 = vadd.f32 %v2444_v38, %v7401_v15  ;;  %v2462_v62 = vadd.f32 %v2446_v60, %v7403_v16  ;;  %v2448_v3 = vadd.f32 %v7573_v51, %v7281_v24 }
 0x1f9   :  { %8770 = vst [vmem:[#allocation27_spill] sm:$0xff] %v7575_v52  ;;  %v2450_v47 = vadd.f32 %v7575_v52, %v7289_v27  ;;  %v2461_v55 = vadd.f32 %v2445_v34, %v7405_v17  ;;  %v2449_v33 = vadd.f32 %v7582_v37, %v7291_v28  ;;  %v2507_v43 = vadd.f32 %v2506_v44, %v2492_v36 }
 0x1fa   :  { %8771 = vst [vmem:[#allocation28_spill] sm:$0xff] %v7585_v4  ;;  %v2451_v7 = vadd.f32 %v7585_v4, %v7293_v29  ;;  %v2464_v8 = vadd.f32 %v2448_v3, %v7409_v19  ;;  %v2497_v60 = vmul.f32 %v7516_v50, %v2459_v57  ;;  %v2511_v61 = vadd.f32 %v2495_v48, %v2494_v58 }
 0x1fb   :  { %v2466_v38 = vadd.f32 %v2450_v47, %v7411_v25  ;;  %v2465_v16 = vadd.f32 %v2449_v33, %v7419_v31  ;;  %v2508_v52 = vadd.f32 %v2507_v43, %v2493_v59  ;;  %v2463_v34 = vadd.f32 %v2447_v14, %v7407_v18  ;;  %v6033_v43 = vld [vmem:[%s8711_s11 + $0x64] ss:$16 sps:$4 sm:$0xff]  }
 0x1fc   :  { %v2467_v15 = vadd.f32 %v2451_v7, %v7421_v32  ;;  %v2502_v17 = vmul.f32 %v7501_v35, %v2464_v8  ;;  %v2512_v45 = vadd.f32 %v2511_v61, %v2496_v26  ;;  %v2498_v4 = vmul.f32 %v7501_v35, %v2460_v40  ;;  %v6028_v7 = vld [vmem:[%s8711_s11 + $0x48] ss:$16 sps:$4 sm:$0xff]   ;;  %v6036_v8 = vld [vmem:[%s8711_s11 + $0x6c] ss:$16 sps:$4 sm:$0xff]   ;;  %v6039_v61 = vld [vmem:[%s8711_s11 + $0x84] ss:$16 sps:$4 sm:$0xff]  }
 0x1fd   :  { %v2499_v36 = vmul.f32 %v7513_v49, %v2461_v55  ;;  %v2503_v44 = vmul.f32 %v7513_v49, %v2465_v16  ;;  %2509 = vadd.xlane.f32.xlu0 %v2508_v52  ;;  %v2500_v57 = vmul.f32 %v7504_v41, %v2462_v62  ;;  %v2504_v33 = vmul.f32 %v7504_v41, %v2466_v38  ;;  %v6015_v16 = vld [vmem:[%s8711_s11 + $0x4] ss:$16 sps:$4 sm:$0xff]   ;;  %v6019_v41 = vld [vmem:[%s8711_s11 + $0x20] ss:$16 sps:$4 sm:$0xff]   ;;  %v6024_v52 = vld [vmem:[%s8711_s11 + $0x2c] ss:$16 sps:$4 sm:$0xff]  }
 0x1fe   :  { %v2513_v3 = vadd.f32 %v2512_v45, %v2497_v60  ;;  %v2501_v59 = vmul.f32 %v7516_v50, %v2463_v34  ;;  %v2505_v26 = vmul.f32 %v7516_v50, %v2467_v15  ;;  %v6013_v45 = vld [vmem:[%s8711_s11] ss:$16 sps:$4 sm:$0xff]   ;;  %v6018_v15 = vld [vmem:[%s8711_s11 + $0xc] ss:$16 sps:$4 sm:$0xff]   ;;  %3681 = vmatprep.subr.bf16.mxu0 %v6015_v16  ;;  %v6021_v49 = vld [vmem:[%s8711_s11 + $0x24] ss:$16 sps:$4 sm:$0xff]  }
 0x1ff   :  { %v2516_v58 = vadd.f32 %v2499_v36, %v2498_v4  ;;  %v2521_v48 = vadd.f32 %v2503_v44, %v2502_v17  ;;  %v6016_v17 = vld [vmem:[%s8711_s11 + $0x8] ss:$16 sps:$4 sm:$0xff]   ;;  %3787 = vmatprep.subr.bf16.mxu1 %v6018_v15  ;;  %3682 = vmatpush1.bf16.msra.mxu0 %v6013_v45  ;;  %v6027_v4 = vld [vmem:[%s8711_s11 + $0x44] ss:$16 sps:$4 sm:$0xff]   ;;  %v6025_v62 = vld [vmem:[%s8711_s11 + $0x40] ss:$16 sps:$4 sm:$0xff]  }
 0x200   :  { %v6022_v50 = vld [vmem:[%s8711_s11 + $0x28] ss:$16 sps:$4 sm:$0xff]   ;;  %3788 = vmatpush1.bf16.msra.mxu1 %v6016_v17  ;;  %3683 = vmatprep.subr.bf16.mxu0 %v6021_v49  ;;  %v6030_v55 = vld [vmem:[%s8711_s11 + $0x4c] ss:$16 sps:$4 sm:$0xff]   ;;  %v6031_v38 = vld [vmem:[%s8711_s11 + $0x60] ss:$16 sps:$4 sm:$0xff]  }
 0x201   :  { %v2517_v14 = vadd.f32 %v2516_v58, %v2500_v57  ;;  %2514 = vadd.xlane.f32.xlu0 %v2513_v3  ;;  %v2522_v47 = vadd.f32 %v2521_v48, %v2504_v33  ;;  %3789 = vmatprep.subr.bf16.mxu1 %v6024_v52  ;;  %v6034_v60 = vld [vmem:[%s8711_s11 + $0x68] ss:$16 sps:$4 sm:$0xff]   ;;  %v6042_v34 = vld [vmem:[%s8711_s11 + $0x8c] ss:$16 sps:$4 sm:$0xff]   ;;  %v6037_v36 = vld [vmem:[%s8711_s11 + $0x80] ss:$16 sps:$4 sm:$0xff]  }
 0x202   :  { %v6040_v44 = vld [vmem:[%s8711_s11 + $0x88] ss:$16 sps:$4 sm:$0xff]   ;;  %v6045_v3 = vld [vmem:[%s8711_s11 + $0xa4] ss:$16 sps:$4 sm:$0xff]   ;;  %v6048_v57 = vld [vmem:[%s8711_s11 + $0xac] ss:$16 sps:$4 sm:$0xff]  }
 0x203   :  { %v2518_v40 = vadd.f32 %v2517_v14, %v2501_v59  ;;  %v2523_v35 = vadd.f32 %v2522_v47, %v2505_v26  ;;  %3684 = vmatpush1.bf16.msra.mxu0 %v6019_v41  ;;  %v6043_v58 = vld [vmem:[%s8711_s11 + $0xa0] ss:$16 sps:$4 sm:$0xff]   ;;  %v6046_v33 = vld [vmem:[%s8711_s11 + $0xa8] ss:$16 sps:$4 sm:$0xff]   ;;  %v6051_v48 = vld [vmem:[%s8711_s11 + $0xc4] ss:$16 sps:$4 sm:$0xff]  }
 0x204   :  { %3790 = vmatpush1.bf16.msra.mxu1 %v6022_v50  ;;  %3685 = vmatprep.subr.bf16.mxu0 %v6027_v4  ;;  %v6054_v59 = vld [vmem:[%s8711_s11 + $0xcc] ss:$16 sps:$4 sm:$0xff]   ;;  %v6049_v14 = vld [vmem:[%s8711_s11 + $0xc0] ss:$16 sps:$4 sm:$0xff]   ;;  %v6052_v26 = vld [vmem:[%s8711_s11 + $0xc8] ss:$16 sps:$4 sm:$0xff]  }
 0x205   :  { %2519 = vadd.xlane.f32.xlu1 %v2518_v40  ;;  %3791 = vmatprep.subr.bf16.mxu1 %v6030_v55  ;;  %v6057_v47 = vld [vmem:[%s8711_s11 + $0xe4] ss:$16 sps:$4 sm:$0xff]   ;;  %v6060_v40 = vld [vmem:[%s8711_s11 + $0xec] ss:$16 sps:$4 sm:$0xff]   ;;  %v6058_v45 = vld [vmem:[%s8711_s11 + $0xe8] ss:$16 sps:$4 sm:$0xff]  }
 0x206   :  { %v6063_v16 = vld [vmem:[%s8711_s11 + $0x104] ss:$16 sps:$4 sm:$0xff]   ;;  %v6066_v17 = vld [vmem:[%s8711_s11 + $0x10c] ss:$16 sps:$4 sm:$0xff]   ;;  %v6061_v15 = vld [vmem:[%s8711_s11 + $0x100] ss:$16 sps:$4 sm:$0xff]  }
 0x207   :  { %3686 = vmatpush1.bf16.msra.mxu0 %v6025_v62  ;;  %v6064_v41 = vld [vmem:[%s8711_s11 + $0x108] ss:$16 sps:$4 sm:$0xff]   ;;  %v6069_v49 = vld [vmem:[%s8711_s11 + $0x124] ss:$16 sps:$4 sm:$0xff]   ;;  %v6072_v50 = vld [vmem:[%s8711_s11 + $0x12c] ss:$16 sps:$4 sm:$0xff]  }
 0x208   :  { %3792 = vmatpush1.bf16.msra.mxu1 %v6028_v7  ;;  %3687 = vmatprep.subr.bf16.mxu0 %v6033_v43  ;;  %v6067_v52 = vld [vmem:[%s8711_s11 + $0x120] ss:$16 sps:$4 sm:$0xff]   ;;  %v6070_v4 = vld [vmem:[%s8711_s11 + $0x128] ss:$16 sps:$4 sm:$0xff]   ;;  %v6075_v62 = vld [vmem:[%s8711_s11 + $0x144] ss:$16 sps:$4 sm:$0xff]  }
 0x209   :  { %2524 = vadd.xlane.f32.xlu1 %v2523_v35  ;;  %3793 = vmatprep.subr.bf16.mxu1 %v6036_v8  ;;  %v6055_v35 = vld [vmem:[%s8711_s11 + $0xe0] ss:$16 sps:$4 sm:$0xff]   ;;  %v6078_v55 = vld [vmem:[%s8711_s11 + $0x14c] ss:$16 sps:$4 sm:$0xff]   ;;  %v6076_v43 = vld [vmem:[%s8711_s11 + $0x148] ss:$16 sps:$4 sm:$0xff]  }
 0x20a   :  { %v6073_v7 = vld [vmem:[%s8711_s11 + $0x140] ss:$16 sps:$4 sm:$0xff]   ;;  %v6081_v8 = vld [vmem:[%s8711_s11 + $0x164] ss:$16 sps:$4 sm:$0xff]  }
 0x20b   :  { %3688 = vmatpush1.bf16.msra.mxu0 %v6031_v38  ;;  %v6084_v38 = vld [vmem:[%s8711_s11 + $0x16c] ss:$16 sps:$4 sm:$0xff]  }
 0x20c   :  { %3794 = vmatpush1.bf16.msra.mxu1 %v6034_v60  ;;  %3689 = vmatprep.subr.bf16.mxu0 %v6039_v61  ;;  %v6079_v60 = vld [vmem:[%s8711_s11 + $0x160] ss:$16 sps:$4 sm:$0xff]   ;;  %v6082_v61 = vld [vmem:[%s8711_s11 + $0x168] ss:$16 sps:$4 sm:$0xff]  }
 0x20d   :  { %3795 = vmatprep.subr.bf16.mxu1 %v6042_v34  ;;  %v6087_v34 = vld [vmem:[%s8711_s11 + $0x184] ss:$16 sps:$4 sm:$0xff]  }
 0x20f   :  { %3690 = vmatpush1.bf16.msra.mxu0 %v6037_v36  ;;  %v6090_v36 = vld [vmem:[%s8711_s11 + $0x18c] ss:$16 sps:$4 sm:$0xff]  }
 0x210   :  { %3796 = vmatpush1.bf16.msra.mxu1 %v6040_v44  ;;  %3691 = vmatprep.subr.bf16.mxu0 %v6045_v3  ;;  %v6085_v44 = vld [vmem:[%s8711_s11 + $0x180] ss:$16 sps:$4 sm:$0xff]   ;;  %v6088_v3 = vld [vmem:[%s8711_s11 + $0x188] ss:$16 sps:$4 sm:$0xff]  }
 0x211   :  { %3797 = vmatprep.subr.bf16.mxu1 %v6048_v57  ;;  %v6093_v57 = vld [vmem:[%s8711_s11 + $0x1a4] ss:$16 sps:$4 sm:$0xff]  }
 0x213   :  { %3692 = vmatpush1.bf16.msra.mxu0 %v6043_v58  ;;  %v5246_v58 = vld [vmem:[#allocation2] ss:$0 sm:$0xff] }
 0x214   :  { %3798 = vmatpush1.bf16.msra.mxu1 %v6046_v33  ;;  %3693 = vmatprep.subr.bf16.mxu0 %v6051_v48  ;;  %v6096_v33 = vld [vmem:[%s8711_s11 + $0x1ac] ss:$16 sps:$4 sm:$0xff]   ;;  %v6091_v48 = vld [vmem:[%s8711_s11 + $0x1a0] ss:$16 sps:$4 sm:$0xff]  }
 0x215   :  { %3799 = vmatprep.subr.bf16.mxu1 %v6054_v59  ;;  %v6094_v59 = vld [vmem:[%s8711_s11 + $0x1a8] ss:$16 sps:$4 sm:$0xff]  }
 0x217   :  { %3694 = vmatpush1.bf16.msra.mxu0 %v6049_v14 }
 0x218   :  { %3800 = vmatpush1.bf16.msra.mxu1 %v6052_v26  ;;  %3695 = vmatprep.subr.bf16.mxu0 %v6057_v47 }
 0x219   :  { %3801 = vmatprep.subr.bf16.mxu1 %v6060_v40 }
 0x21b   :  { %3696 = vmatpush1.bf16.msra.mxu0 %v6055_v35 }
 0x21c   :  { %3802 = vmatpush1.bf16.msra.mxu1 %v6058_v45  ;;  %3697 = vmatprep.subr.bf16.mxu0 %v6063_v16 }
 0x21d   :  { %3803 = vmatprep.subr.bf16.mxu1 %v6066_v17 }
 0x21f   :  { %3698 = vmatpush1.bf16.msra.mxu0 %v6061_v15 }
 0x220   :  { %3804 = vmatpush1.bf16.msra.mxu1 %v6064_v41  ;;  %3699 = vmatprep.subr.bf16.mxu0 %v6069_v49 }
 0x221   :  { %3805 = vmatprep.subr.bf16.mxu1 %v6072_v50 }
 0x223   :  { %3700 = vmatpush1.bf16.msra.mxu0 %v6067_v52 }
 0x224   :  { %3806 = vmatpush1.bf16.msra.mxu1 %v6070_v4  ;;  %3701 = vmatprep.subr.bf16.mxu0 %v6075_v62 }
 0x225   :  { %3807 = vmatprep.subr.bf16.mxu1 %v6078_v55 }
 0x227   :  { %3702 = vmatpush1.bf16.msra.mxu0 %v6073_v7 }
 0x228   :  { %3808 = vmatpush1.bf16.msra.mxu1 %v6076_v43  ;;  %3703 = vmatprep.subr.bf16.mxu0 %v6081_v8 }
 0x229   :  { %3809 = vmatprep.subr.bf16.mxu1 %v6084_v38 }
 0x22b   :  { %3704 = vmatpush1.bf16.msra.mxu0 %v6079_v60 }
 0x22c   :  { %3810 = vmatpush1.bf16.msra.mxu1 %v6082_v61  ;;  %3705 = vmatprep.subr.bf16.mxu0 %v6087_v34 }
 0x22d   :  { %3811 = vmatprep.subr.bf16.mxu1 %v6090_v36 }
 0x22f   :  { %3706 = vmatpush1.bf16.msra.mxu0 %v6085_v44 }
 0x230   :  { %3812 = vmatpush1.bf16.msra.mxu1 %v6088_v3  ;;  %3707 = vmatprep.subr.bf16.mxu0 %v6093_v57 }
 0x231   :  { %3813 = vmatprep.subr.bf16.mxu1 %v6096_v33 }
 0x233   :  { %3708 = vmatpush1.bf16.msra.mxu0 %v6091_v48 }
 0x234   :  { %3814 = vmatpush1.bf16.msra.mxu1 %v6094_v59 }
 0x28a   :  { %v2510_v14 = vpop.xlane.xlu0 %2509 }
 0x28b   :  { %v2533_v26 = vadd.f32 %v5246_v58, %v2510_v14 }
 0x28d   :  { %v7780_v47 = vmul.f32 33.333332, %v2533_v26 }
 0x28e   :  { %v2515_v40 = vpop.xlane.xlu0 %2514 }
 0x28f   :  { %v2553_v35 = vand.u32 2147483647, %v7780_v47  ;;  %v2534_v45 = vadd.f32 %v5246_v58, %v2515_v40  ;;  %v7784_v16 = vsub.f32 0.0, %v7780_v47  ;;  %vm2545_vm14 = vcmp.ne.f32.partialorder %v7780_v47, %v7780_v47 }
 0x291   :  { %v7786_v17 = vmul.f32 33.333332, %v2534_v45  ;;  %v2557_v41 = vsub.f32 0.0, %v2553_v35  ;;  %v2633_v50 = vand.u32 2147483647, %v7784_v16  ;;  %vm2625_vm5 = vcmp.ne.f32.partialorder %v7784_v16, %v7784_v16 }
 0x292   :  { %v2520_v15 = vpop.xlane.xlu1 %2519 }
 0x293   :  { %v2535_v49 = vadd.f32 %v5246_v58, %v2520_v15  ;;  %v2554_v52 = vand.u32 2147483647, %v7786_v17  ;;  %v7791_v4 = vsub.f32 0.0, %v7786_v17  ;;  %v2637_v55 = vsub.f32 0.0, %v2633_v50 }
 0x294   :  { %v2561_v8 = vmul.f32 1.442695, %v2557_v41  ;;  %vm2546_vm0 = vcmp.ne.f32.partialorder %v7786_v17, %v7786_v17 }
 0x295   :  { %v7793_v62 = vmul.f32 33.333332, %v2535_v49  ;;  %v2558_v7 = vsub.f32 0.0, %v2554_v52  ;;  %v2641_v60 = vmul.f32 1.442695, %v2637_v55  ;;  %vm2626_vm6 = vcmp.ne.f32.partialorder %v7791_v4, %v7791_v4 }
 0x296   :  { %v2525_v43 = vpop.xlane.xlu1 %2524  ;;  %v2634_v61 = vand.u32 2147483647, %v7791_v4 }
 0x297   :  { %v2536_v38 = vadd.f32 %v5246_v58, %v2525_v43  ;;  %v2555_v34 = vand.u32 2147483647, %v7793_v62  ;;  %v7798_v36 = vsub.f32 0.0, %v7793_v62  ;;  %v2563_v44 = vmul.f32 1.442695, %v2558_v7 }
 0x298   :  { %6397 = vpow2.f32 %v2641_v60  ;;  %v2638_v57 = vsub.f32 0.0, %v2634_v61  ;;  %vm2547_vm2 = vcmp.ne.f32.partialorder %v7793_v62, %v7793_v62 }
 0x299   :  { %v7800_v3 = vmul.f32 33.333332, %v2536_v38  ;;  %v2635_v33 = vand.u32 2147483647, %v7798_v36  ;;  %6399 = vpow2.f32 %v2561_v8  ;;  %v2559_v59 = vsub.f32 0.0, %v2555_v34 }
 0x29a   :  { %v2643_v48 = vmul.f32 1.442695, %v2638_v57  ;;  %6401 = vpow2.f32 %v2563_v44  ;;  %vm2627_vm10 = vcmp.ne.f32.partialorder %v7798_v36, %v7798_v36 }
 0x29b   :  { %v2556_v58 = vand.u32 2147483647, %v7800_v3  ;;  %v2639_v14 = vsub.f32 0.0, %v2635_v33  ;;  %v7805_v26 = vsub.f32 0.0, %v7800_v3  ;;  %v2565_v45 = vmul.f32 1.442695, %v2559_v59 }
 0x29c   :  { %6403 = vpow2.f32 %v2643_v48  ;;  %vm2548_vm3 = vcmp.ne.f32.partialorder %v7800_v3, %v7800_v3 }
 0x29d   :  { %v2645_v40 = vmul.f32 1.442695, %v2639_v14  ;;  %v2636_v35 = vand.u32 2147483647, %v7805_v26  ;;  %v2560_v15 = vsub.f32 0.0, %v2556_v58  ;;  %vm2628_vm13 = vcmp.ne.f32.partialorder %v7805_v26, %v7805_v26 }
 0x29f   :  { %6405 = vpow2.f32 %v2645_v40  ;;  %v2640_v41 = vsub.f32 0.0, %v2636_v35  ;;  %v2567_v52 = vmul.f32 1.442695, %v2560_v15  ;;  %v2621_v35 = vmax.f32 %v7784_v16, 0.0 }
 0x2a0   :  { %6407 = vpow2.f32 %v2565_v45 }
 0x2a1   :  { %v2647_v50 = vmul.f32 1.442695, %v2640_v41 }
 0x2a2   :  { %v6398_v49 = vpop.eup %6397 }
 0x2a3   :  { %v2649_v55 = vadd.f32 1.0, %v6398_v49  ;;  %v7808_v7 = vpop.eup %6399  ;;  %6409 = vpow2.f32 %v2647_v50  ;;  %v2652_v60 = vmul.f32 -0.5, %v6398_v49  ;;  %v2655_v59 = vand.u32 2147483647, %v6398_v49 }
 0x2a4   :  { %v7810_v43 = vpop.eup %6401  ;;  %v2569_v38 = vadd.f32 1.0, %v7808_v7 }
 0x2a5   :  { %6411 = vlog2.f32 %v2649_v55  ;;  %v2578_v57 = vadd.f32 1.0, %v7810_v43  ;;  %v2653_v33 = vadd.f32 1.0, %v2652_v60  ;;  %vm2656_vm4 = vcmp.lt.f32.partialorder %v2655_v59, 0.0004427343 }
 0x2a6   :  { %v6404_v8 = vpop.eup %6403  ;;  %6413 = vpow2.f32 %v2567_v52  ;;  %v2572_v52 = vmul.f32 -0.5, %v7808_v7 }
 0x2a7   :  { %v2658_v61 = vadd.f32 1.0, %v6404_v8  ;;  %v2661_v58 = vmul.f32 -0.5, %v6404_v8  ;;  %v2654_v50 = vmul.f32 %v6398_v49, %v2653_v33  ;;  %v2622_v49 = vmax.f32 %v7791_v4, 0.0 }
 0x2a9   :  { %v6406_v34 = vpop.eup %6405  ;;  %6415 = vlog2.f32 %v2658_v61  ;;  %v2662_v60 = vadd.f32 1.0, %v2661_v58  ;;  %v2575_v61 = vand.u32 2147483647, %v7808_v7  ;;  %v2573_v58 = vadd.f32 1.0, %v2572_v52 }
 0x2aa   :  { %v2667_v44 = vadd.f32 1.0, %v6406_v34  ;;  %6417 = vlog2.f32 %v2569_v38  ;;  %v7814_v48 = vpop.eup %6407  ;;  %v2670_v45 = vmul.f32 -0.5, %v6406_v34  ;;  %v2673_v32 = vand.u32 2147483647, %v6406_v34 }
 0x2ab   :  { %v2587_v55 = vadd.f32 1.0, %v7814_v48  ;;  %vm7833_vm7 = vcmp.lt.f32.partialorder %v2575_v61, 0.0004427343  ;;  %v2581_v52 = vmul.f32 -0.5, %v7810_v43 }
 0x2ac   :  { %6419 = vlog2.f32 %v2667_v44  ;;  %v2671_v33 = vadd.f32 1.0, %v2670_v45  ;;  %vm7837_vm9 = vcmp.lt.f32.partialorder %v2673_v32, 0.0004427343  ;;  %v6099_v32 = vld [vmem:[%s8711_s11 + $0x1c4] ss:$16 sps:$4 sm:$0xff]  }
 0x2ad   :  { %v7816_v14 = vpop.eup %6409  ;;  %6421 = vlog2.f32 %v2578_v57  ;;  %v2664_v57 = vand.u32 2147483647, %v6404_v8  ;;  %3709 = vmatprep.subr.bf16.mxu0 %v6099_v32  ;;  %v6105_v45 = vld [vmem:[%s8711_s11 + $0x1e4] ss:$16 sps:$4 sm:$0xff]  }
 0x2ae   :  { %v2676_v15 = vadd.f32 1.0, %v7816_v14  ;;  %v2679_v59 = vmul.f32 -0.5, %v7816_v14  ;;  %v2672_v51 = vmul.f32 %v6406_v34, %v2671_v33  ;;  %v6102_v33 = vld [vmem:[%s8711_s11 + $0x1cc] ss:$16 sps:$4 sm:$0xff]  }
 0x2af   :  { %v6412_v40 = vpop.eup %6411  ;;  %vm2665_vm8 = vcmp.lt.f32.partialorder %v2664_v57, 0.0004427343  ;;  %v2574_v57 = vmul.f32 %v7808_v7, %v2573_v58  ;;  %3815 = vmatprep.subr.bf16.mxu1 %v6102_v33  ;;  %v6111_v33 = vld [vmem:[%s8711_s11 + $0x204] ss:$16 sps:$4 sm:$0xff]  }
 0x2b0   :  { %v2651_v41 = vmul.f32 0.6931472, %v6412_v40  ;;  %v7822_v38 = vpop.eup %6413  ;;  %6423 = vlog2.f32 %v2676_v15  ;;  %v2680_v61 = vadd.f32 1.0, %v2679_v59 }
 0x2b1   :  { %6425 = vlog2.f32 %v2587_v55  ;;  %v2596_v15 = vadd.f32 1.0, %v7822_v38 }
 0x2b2   :  { %v2657_v44 = vsel %vm2656_vm4, %v2654_v50, %v2651_v41  ;;  %v2663_v50 = vmul.f32 %v6404_v8, %v2662_v60  ;;  %v2623_v60 = vmax.f32 %v7798_v36, 0.0  ;;  %vm4945_vm4 = vcmask 7168  }
 0x2b3   :  { %v2685_v31 = vadd.f32 %v2657_v44, %v2621_v35  ;;  %v6416_v40 = vpop.eup %6415  ;;  %6427 = vlog2.f32 %v2596_v15  ;;  %v2582_v15 = vadd.f32 1.0, %v2581_v52  ;;  %v6108_v52 = vld [vmem:[%s8711_s11 + $0x1ec] ss:$16 sps:$4 sm:$0xff]  }
 0x2b4   :  { %v6418_v25 = vpop.eup %6417  ;;  %v2660_v41 = vmul.f32 0.6931472, %v6416_v40 }
 0x2b5   :  { %v2689_v19 = vsel %vm2625_vm5, %v7784_v16, %v2685_v31  ;;  %v2682_v31 = vand.u32 2147483647, %v7816_v14  ;;  %v2583_v32 = vmul.f32 %v7810_v43, %v2582_v15 }
 0x2b6   :  { %v6420_v44 = vpop.eup %6419  ;;  %v2693_v18 = vsub.f32 0.0, %v2689_v19  ;;  %v2666_v55 = vsel %vm2665_vm8, %v2663_v50, %v2660_v41  ;;  %v6097_v19 = vld [vmem:[%s8711_s11 + $0x1c0] ss:$16 sps:$4 sm:$0xff]   ;;  %v2590_v41 = vmul.f32 -0.5, %v7814_v48 }
 0x2b7   :  { %v2669_v39 = vmul.f32 0.6931472, %v6420_v44  ;;  %v6422_v16 = vpop.eup %6421  ;;  %v2686_v8 = vadd.f32 %v2666_v55, %v2622_v49  ;;  %v6100_v49 = vld [vmem:[%s8711_s11 + $0x1c8] ss:$16 sps:$4 sm:$0xff]   ;;  %vm7866_vm11 = vcmp.lt.f32.partialorder %v2682_v31, 0.0004427343  ;;  %3710 = vmatpush1.bf16.msra.mxu0 %v6097_v19  ;;  %v2681_v44 = vmul.f32 %v7816_v14, %v2680_v61 }
 0x2b8   :  { %2871 = vperm.xlu0 %5618, %v2693_v18   ;;  %v2571_v18 = vmul.f32 0.6931472, %v6418_v25  ;;  %v2580_v58 = vmul.f32 0.6931472, %v6422_v16  ;;  %3816 = vmatpush1.bf16.msra.mxu1 %v6100_v49  ;;  %v2624_v31 = vmax.f32 %v7805_v26, 0.0  ;;  %v2541_v61 = vmax.f32 %v7780_v47, 0.0 }
 0x2b9   :  { %v2675_v34 = vsel %vm7837_vm9, %v2672_v51, %v2669_v39  ;;  %v2690_v40 = vsel %vm2626_vm6, %v7791_v4, %v2686_v8  ;;  %v2584_v39 = vand.u32 2147483647, %v7810_v43  ;;  %v6106_v14 = vld [vmem:[%s8711_s11 + $0x1e8] ss:$16 sps:$4 sm:$0xff]   ;;  %3711 = vmatprep.subr.bf16.mxu0 %v6105_v45  ;;  %3817 = vmatprep.subr.bf16.mxu1 %v6108_v52  ;;  %v2593_v49 = vand.u32 2147483647, %v7814_v48 }
 0x2ba   :  { %v2687_v59 = vadd.f32 %v2675_v34, %v2623_v60  ;;  %v6424_v25 = vpop.eup %6423  ;;  %v2694_v51 = vsub.f32 0.0, %v2690_v40  ;;  %v2577_v16 = vsel %vm7833_vm7, %v2574_v57, %v2571_v18  ;;  %v2591_v34 = vadd.f32 1.0, %v2590_v41  ;;  %v6114_v40 = vld [vmem:[%s8711_s11 + $0x20c] ss:$16 sps:$4 sm:$0xff]  }
 0x2bb   :  { %v2678_v50 = vmul.f32 0.6931472, %v6424_v25  ;;  %v6426_v8 = vpop.eup %6425  ;;  %vm7894_vm12 = vcmp.lt.f32.partialorder %v2584_v39, 0.0004427343  ;;  %v2599_v18 = vmul.f32 -0.5, %v7822_v38  ;;  %v2605_v57 = vadd.f32 %v2577_v16, %v2541_v61 }
 0x2bc   :  { %v2691_v4 = vsel %vm2627_vm10, %v7798_v36, %v2687_v59  ;;  %2876 = vperm.xlu1 %5619, %v2694_v51   ;;  %v6103_v36 = vld [vmem:[%s8711_s11 + $0x1e0] ss:$16 sps:$4 sm:$0xff]   ;;  %3818 = vmatpush1.bf16.msra.mxu1 %v6106_v14  ;;  %v2586_v59 = vsel %vm7894_vm12, %v2583_v32, %v2580_v58  ;;  %v2589_v15 = vmul.f32 0.6931472, %v6426_v8  ;;  %v2542_v51 = vmax.f32 %v7786_v17, 0.0 }
 0x2bd   :  { %v2695_v55 = vsub.f32 0.0, %v2691_v4  ;;  %v2684_v60 = vsel %vm7866_vm11, %v2681_v44, %v2678_v50  ;;  %3712 = vmatpush1.bf16.msra.mxu0 %v6103_v36  ;;  %v6428_v39 = vpop.eup %6427  ;;  %3840 = vmatprep.subr.bf16.mxu1 %v6114_v40  ;;  %v2592_v7 = vmul.f32 %v7814_v48, %v2591_v34  ;;  %v2600_v41 = vadd.f32 1.0, %v2599_v18  ;;  %v6120_v40 = vld [vmem:[%s8711_s11 + $0x22c] ss:$16 sps:$4 sm:$0xff]  }
 0x2be   :  { %v2688_v35 = vadd.f32 %v2684_v60, %v2624_v31  ;;  %3734 = vmatprep.subr.bf16.mxu0 %v6111_v33  ;;  %v2609_v4 = vsel %vm2545_vm14, %v7780_v47, %v2605_v57  ;;  %v2606_v50 = vadd.f32 %v2586_v59, %v2542_v51  ;;  %vm2594_vm15 = vcmp.lt.f32.partialorder %v2593_v49, 0.0004427343  ;;  %v6109_v33 = vld [vmem:[%s8711_s11 + $0x200] ss:$16 sps:$4 sm:$0xff]   ;;  %v6123_v51 = vld [vmem:[%s8711_s11 + $0x244] ss:$16 sps:$4 sm:$0xff]  }
 0x2bf   :  { %v2595_v58 = vsel %vm2594_vm15, %v2592_v7, %v2589_v15  ;;  %v2598_v44 = vmul.f32 0.6931472, %v6428_v39  ;;  %v2543_v45 = vmax.f32 %v7793_v62, 0.0  ;;  %v2613_v52 = vsub.f32 0.0, %v2609_v4 }
 0x2c0   :  { %2881 = vperm.xlu1 %5619, %v2695_v55   ;;  %v2692_v43 = vsel %vm2628_vm13, %v7805_v26, %v2688_v35  ;;  %v2602_v26 = vand.u32 2147483647, %v7822_v38  ;;  %v2601_v55 = vmul.f32 %v7822_v38, %v2600_v41  ;;  %v2610_v48 = vsel %vm2546_vm0, %v7786_v17, %v2606_v50 }
 0x2c1   :  { %v2696_v25 = vsub.f32 0.0, %v2692_v43  ;;  %v2607_v31 = vadd.f32 %v2595_v58, %v2543_v45  ;;  %v2544_v16 = vmax.f32 %v7800_v3, 0.0  ;;  %v2614_v36 = vsub.f32 0.0, %v2610_v48  ;;  %v6115_v43 = vld [vmem:[%s8711_s11 + $0x220] ss:$16 sps:$4 sm:$0xff]  }
 0x2c2   :  { %vm2603_vm1 = vcmp.lt.f32.partialorder %v2602_v26, 0.0004427343 }
 0x2c3   :  { %v2604_v47 = vsel %vm2603_vm1, %v2601_v55, %v2598_v44  ;;  %v2611_v14 = vsel %vm2547_vm2, %v7793_v62, %v2607_v31  ;;  %v6132_v44 = vld [vmem:[%s8711_s11 + $0x26c] ss:$16 sps:$4 sm:$0xff]   ;;  %v6130_v55 = vld [vmem:[%s8711_s11 + $0x268] ss:$16 sps:$4 sm:$0xff]  }
 0x2c4   :  { %2886 = vperm.xlu1 %5619, %v2696_v25   ;;  %v2608_v8 = vadd.f32 %v2604_v47, %v2544_v16  ;;  %v2615_v60 = vsub.f32 0.0, %v2611_v14  ;;  %v6118_v25 = vld [vmem:[%s8711_s11 + $0x228] ss:$16 sps:$4 sm:$0xff]   ;;  %v6135_v47 = vld [vmem:[%s8711_s11 + $0x284] ss:$16 sps:$4 sm:$0xff]  }
 0x2c6   :  { %v2612_v17 = vsel %vm2548_vm3, %v7800_v3, %v2608_v8 }
 0x2c7   :  { %v2616_v38 = vsub.f32 0.0, %v2612_v17  ;;  %v6139_v17 = vld [vmem:[%s8711_s11 + $0x2a0] ss:$16 sps:$4 sm:$0xff]  }
 0x2c8   :  { %2699 = vperm.xlu1 %5619, %v2613_v52   ;;  %v6127_v52 = vld [vmem:[%s8711_s11 + $0x260] ss:$16 sps:$4 sm:$0xff]  }
 0x2cc   :  { %2704 = vperm.xlu1 %5619, %v2614_v36  }
 0x2d0   :  { %2709 = vperm.xlu1 %5619, %v2615_v60   ;;  %v6144_v60 = vld [vmem:[%s8711_s11 + $0x2ac] ss:$16 sps:$4 sm:$0xff]  }
 0x2d4   :  { %2714 = vperm.xlu1 %5619, %v2616_v38   ;;  %v6142_v38 = vld [vmem:[%s8711_s11 + $0x2a8] ss:$16 sps:$4 sm:$0xff]  }
 0x337   :  { %v2872_v61 = vpop.permute.xlu0 %2871 }
 0x338   :  { %v2889_v19 = vmul.f32 %v2872_v61, %v7221_v63  ;;  %v2890_v35 = vmul.f32 %v2872_v61, %v7225_v1  ;;  %v2891_v32 = vmul.f32 %v2872_v61, %v7223_v0  ;;  %v2892_v62 = vmul.f32 %v2872_v61, %v7227_v2  ;;  %v6112_v63 = vld [vmem:[%s8711_s11 + $0x208] ss:$16 sps:$4 sm:$0xff]   ;;  %v6117_v0 = vld [vmem:[%s8711_s11 + $0x224] ss:$16 sps:$4 sm:$0xff]  }
 0x339   :  { %v6147_v61 = vld [vmem:[%s8711_s11 + $0x2c4] ss:$16 sps:$4 sm:$0xff]  }
 0x33b   :  { %v2877_v34 = vpop.permute.xlu1 %2876 }
 0x33c   :  { %v2893_v18 = vmul.f32 %v2877_v34, %v7239_v6  ;;  %v2894_v57 = vmul.f32 %v2877_v34, %v7249_v10  ;;  %v2895_v49 = vmul.f32 %v2877_v34, %v7247_v9  ;;  %v2896_v3 = vmul.f32 %v2877_v34, %v7251_v11  ;;  %v6156_v34 = vld [vmem:[%s8711_s11 + $0x2ec] ss:$16 sps:$4 sm:$0xff]  }
 0x33e   :  { %v2905_v1 = vpack.c.bf16 %v2893_v18, %v2889_v19  ;;  %v7947_v2 = vpack.c.bf16 %v2895_v49, %v2891_v32  ;;  %v2906_v6 = vpack.c.bf16 %v2894_v57, %v2890_v35  ;;  %v2908_v10 = vpack.c.bf16 %v2896_v3, %v2892_v62  ;;  %v6150_v19 = vld [vmem:[%s8711_s11 + $0x2cc] ss:$16 sps:$4 sm:$0xff]   ;;  %v6145_v35 = vld [vmem:[%s8711_s11 + $0x2c0] ss:$16 sps:$4 sm:$0xff]   ;;  %v6148_v32 = vld [vmem:[%s8711_s11 + $0x2c8] ss:$16 sps:$4 sm:$0xff]  }
 0x33f   :  { %v2882_v9 = vpop.permute.xlu1 %2881  ;;  %v6153_v62 = vld [vmem:[%s8711_s11 + $0x2e4] ss:$16 sps:$4 sm:$0xff]   ;;  %v6151_v18 = vld [vmem:[%s8711_s11 + $0x2e0] ss:$16 sps:$4 sm:$0xff]   ;;  %v6154_v57 = vld [vmem:[%s8711_s11 + $0x2e8] ss:$16 sps:$4 sm:$0xff]  }
 0x340   :  { %v2899_v11 = vmul.f32 %v2882_v9, %v7275_v21  ;;  %3713 = vmatprep.mubr.bf16.mxu0 %v2906_v6  ;;  %3819 = vmatprep.mubr.bf16.mxu1 %v2906_v6  ;;  %v2897_v59 = vmul.f32 %v2882_v9, %v7273_v20  ;;  %v2898_v15 = vmul.f32 %v2882_v9, %v7277_v22  ;;  %v6159_v49 = vld [vmem:[%s8711_s11 + $0x304] ss:$16 sps:$4 sm:$0xff]   ;;  %v6162_v3 = vld [vmem:[%s8711_s11 + $0x30c] ss:$16 sps:$4 sm:$0xff]   ;;  %v6163_v6 = vld [vmem:[%s8711_s11 + $0x320] ss:$16 sps:$4 sm:$0xff]  }
 0x341   :  { %3714 = vmatmul.mubr.bf16.vlgmr.msra.gmra.mrb[24].mxu0 %v2905_v1  ;;  %3820 = vmatmul.mubr.bf16.vlgmr.msra.gmra.mrb[24].mxu1 %v2905_v1  ;;  %v2900_v39 = vmul.f32 %v2882_v9, %v7279_v23  ;;  %v6126_v23 = vld [vmem:[%s8711_s11 + $0x24c] ss:$16 sps:$4 sm:$0xff]   ;;  %v6171_v9 = vld [vmem:[%s8711_s11 + $0x344] ss:$16 sps:$4 sm:$0xff]  }
 0x342   :  { %3735 = vmatpush1.bf16.msra.mxu0 %v6109_v33  ;;  %3841 = vmatpush1.bf16.msra.mxu1 %v6112_v63  ;;  %v6157_v33 = vld [vmem:[%s8711_s11 + $0x300] ss:$16 sps:$4 sm:$0xff]   ;;  %v6160_v63 = vld [vmem:[%s8711_s11 + $0x308] ss:$16 sps:$4 sm:$0xff]   ;;  %v6168_v1 = vld [vmem:[%s8711_s11 + $0x32c] ss:$16 sps:$4 sm:$0xff]  }
 0x343   :  { %v2887_v21 = vpop.permute.xlu1 %2886  ;;  %3736 = vmatprep.subr.bf16.mxu0 %v6117_v0  ;;  %3842 = vmatprep.subr.bf16.mxu1 %v6120_v40  ;;  %v6165_v0 = vld [vmem:[%s8711_s11 + $0x324] ss:$16 sps:$4 sm:$0xff]   ;;  %v6169_v40 = vld [vmem:[%s8711_s11 + $0x340] ss:$16 sps:$4 sm:$0xff]  }
 0x344   :  { %v2901_v7 = vmul.f32 %v2887_v21, %v7281_v24  ;;  %v2902_v41 = vmul.f32 %v2887_v21, %v7291_v28  ;;  %v2903_v20 = vmul.f32 %v2887_v21, %v7289_v27  ;;  %v2904_v22 = vmul.f32 %v2887_v21, %v7293_v29  ;;  %v6121_v27 = vld [vmem:[%s8711_s11 + $0x240] ss:$16 sps:$4 sm:$0xff]   ;;  %v6124_v28 = vld [vmem:[%s8711_s11 + $0x248] ss:$16 sps:$4 sm:$0xff]   ;;  %v6129_v29 = vld [vmem:[%s8711_s11 + $0x264] ss:$16 sps:$4 sm:$0xff]  }
 0x345   :  { %v6178_v21 = vld [vmem:[%s8711_s11 + $0x368] ss:$16 sps:$4 sm:$0xff]  }
 0x346   :  { %3737 = vmatpush1.bf16.msra.mxu0 %v6115_v43  ;;  %v2910_v4 = vpack.c.bf16 %v2902_v41, %v2898_v15  ;;  %v2909_v50 = vpack.c.bf16 %v2901_v7, %v2897_v59  ;;  %v7972_v26 = vpack.c.bf16 %v2904_v22, %v2900_v39  ;;  %v7974_v58 = vpack.c.bf16 %v2903_v20, %v2899_v11  ;;  %v6174_v11 = vld [vmem:[%s8711_s11 + $0x34c] ss:$16 sps:$4 sm:$0xff]   ;;  %v6172_v43 = vld [vmem:[%s8711_s11 + $0x348] ss:$16 sps:$4 sm:$0xff]   ;;  %v6177_v59 = vld [vmem:[%s8711_s11 + $0x364] ss:$16 sps:$4 sm:$0xff]  }
 0x347   :  { %3843 = vmatpush1.bf16.msra.mxu1 %v6118_v25  ;;  %v7976_v24 = vpop.permute.xlu1 %2699  ;;  %3738 = vmatprep.subr.bf16.mxu0 %v6123_v51  ;;  %v6180_v15 = vld [vmem:[%s8711_s11 + $0x36c] ss:$16 sps:$4 sm:$0xff]   ;;  %v6175_v39 = vld [vmem:[%s8711_s11 + $0x360] ss:$16 sps:$4 sm:$0xff]   ;;  %v6183_v25 = vld [vmem:[%s8711_s11 + $0x384] ss:$16 sps:$4 sm:$0xff]  }
 0x348   :  { %3723 = vmatprep.mubr.bf16.mxu0 %v2910_v4  ;;  %3829 = vmatprep.mubr.bf16.mxu1 %v2910_v4  ;;  %v2719_v48 = vmul.f32 %v7498_v12, %v7976_v24  ;;  %v2720_v16 = vmul.f32 %v7510_v46, %v7976_v24  ;;  %v6138_v12 = vld [vmem:[%s8711_s11 + $0x28c] ss:$16 sps:$4 sm:$0xff]   ;;  %v6136_v46 = vld [vmem:[%s8711_s11 + $0x288] ss:$16 sps:$4 sm:$0xff]   ;;  %v6181_v7 = vld [vmem:[%s8711_s11 + $0x380] ss:$16 sps:$4 sm:$0xff]  }
 0x349   :  { %3844 = vmatprep.subr.bf16.mxu1 %v6126_v23  ;;  %3724 = vmatmul.mubr.bf16.gmra.mrb[28].mxu0 %v2909_v50  ;;  %v6186_v51 = vld [vmem:[%s8711_s11 + $0x38c] ss:$16 sps:$4 sm:$0xff]   ;;  %v6184_v41 = vld [vmem:[%s8711_s11 + $0x388] ss:$16 sps:$4 sm:$0xff]   ;;  %v6189_v20 = vld [vmem:[%s8711_s11 + $0x3a4] ss:$16 sps:$4 sm:$0xff]  }
 0x34a   :  { %3830 = vmatmul.mubr.bf16.gmra.mrb[28].mxu1 %v2909_v50  ;;  %3739 = vmatpush1.bf16.msra.mxu0 %v6121_v27  ;;  %v6192_v22 = vld [vmem:[%s8711_s11 + $0x3ac] ss:$16 sps:$4 sm:$0xff]   ;;  %v6187_v23 = vld [vmem:[%s8711_s11 + $0x3a0] ss:$16 sps:$4 sm:$0xff]   ;;  %v6190_v4 = vld [vmem:[%s8711_s11 + $0x3a8] ss:$16 sps:$4 sm:$0xff]  }
 0x34b   :  { %3845 = vmatpush1.bf16.msra.mxu1 %v6124_v28  ;;  %v7990_v45 = vpop.permute.xlu1 %2704  ;;  %3766 = vmatprep.mubr.bf16.mxu0 %v2908_v10  ;;  %v6195_v50 = vld [vmem:[%s8711_s11 + $0x3c4] ss:$16 sps:$4 sm:$0xff]   ;;  %v6198_v27 = vld [vmem:[%s8711_s11 + $0x3cc] ss:$16 sps:$4 sm:$0xff]   ;;  %v6193_v28 = vld [vmem:[%s8711_s11 + $0x3c0] ss:$16 sps:$4 sm:$0xff]  }
 0x34c   :  { %3872 = vmatprep.mubr.bf16.mxu1 %v2908_v10  ;;  %v2723_v31 = vmul.f32 %v7524_v54, %v7990_v45  ;;  %v2724_v36 = vmul.f32 %v7534_v13, %v7990_v45  ;;  %3740 = vmatprep.subr.bf16.mxu0 %v6129_v29  ;;  %v6133_v54 = vld [vmem:[%s8711_s11 + $0x280] ss:$16 sps:$4 sm:$0xff]   ;;  %v6141_v13 = vld [vmem:[%s8711_s11 + $0x2a4] ss:$16 sps:$4 sm:$0xff]   ;;  %v6166_v10 = vld [vmem:[%s8711_s11 + $0x328] ss:$16 sps:$4 sm:$0xff]  }
 0x34d   :  { %3846 = vmatprep.subr.bf16.mxu1 %v6132_v44  ;;  %v6196_v29 = vld [vmem:[%s8711_s11 + $0x3c8] ss:$16 sps:$4 sm:$0xff]   ;;  %v6201_v44 = vld [vmem:[%s8711_s11 + $0x3e4] ss:$16 sps:$4 sm:$0xff]  }
 0x34e   :  { %v8012_v14 = vpack.c.bf16 %v2723_v31, %v2719_v48  ;;  %3741 = vmatpush1.bf16.msra.mxu0 %v6127_v52  ;;  %v8020_v8 = vpack.c.bf16 %v2724_v36, %v2720_v16  ;;  %v6204_v52 = vld [vmem:[%s8711_s11 + $0x3ec] ss:$16 sps:$4 sm:$0xff]   ;;  %v6202_v48 = vld [vmem:[%s8711_s11 + $0x3e8] ss:$16 sps:$4 sm:$0xff]   ;;  %v6207_v31 = vld [vmem:[%s8712_s10 + $0x4] ss:$16 sps:$4 sm:$0xff]  }
 0x34f   :  { %3847 = vmatpush1.bf16.msra.mxu1 %v6130_v55  ;;  %3742 = vmatprep.subr.bf16.mxu0 %v6135_v47  ;;  %v6199_v55 = vld [vmem:[%s8711_s11 + $0x3e0] ss:$16 sps:$4 sm:$0xff]   ;;  %v6210_v47 = vld [vmem:[%s8712_s10 + $0xc] ss:$16 sps:$4 sm:$0xff]   ;;  %v6208_v36 = vld [vmem:[%s8712_s10 + $0x8] ss:$16 sps:$4 sm:$0xff]  }
 0x350   :  { %3848 = vmatprep.subr.bf16.mxu1 %v6138_v12  ;;  %v6205_v16 = vld [vmem:[%s8712_s10] ss:$16 sps:$4 sm:$0xff]   ;;  %v6213_v12 = vld [vmem:[%s8712_s10 + $0x24] ss:$16 sps:$4 sm:$0xff]  }
 0x352   :  { %3743 = vmatpush1.bf16.msra.mxu0 %v6133_v54  ;;  %v6216_v54 = vld [vmem:[%s8712_s10 + $0x2c] ss:$16 sps:$4 sm:$0xff]  }
 0x353   :  { %3849 = vmatpush1.bf16.msra.mxu1 %v6136_v46  ;;  %3744 = vmatprep.subr.bf16.mxu0 %v6141_v13  ;;  %v6211_v46 = vld [vmem:[%s8712_s10 + $0x20] ss:$16 sps:$4 sm:$0xff]   ;;  %v6214_v13 = vld [vmem:[%s8712_s10 + $0x28] ss:$16 sps:$4 sm:$0xff]  }
 0x354   :  { %3850 = vmatprep.subr.bf16.mxu1 %v6144_v60  ;;  %v2722_v60 = vmul.f32 %v7531_v5, %v7990_v45  ;;  %v6220_v5 = vld [vmem:[%s8712_s10 + $0x48] ss:$16 sps:$4 sm:$0xff]  }
 0x356   :  { %3745 = vmatpush1.bf16.msra.mxu0 %v6139_v17  ;;  %v2718_v17 = vmul.f32 %v7507_v42, %v7976_v24  ;;  %v6228_v42 = vld [vmem:[%s8712_s10 + $0x6c] ss:$16 sps:$4 sm:$0xff]  }
 0x357   :  { %3851 = vmatpush1.bf16.msra.mxu1 %v6142_v38  ;;  %3746 = vmatprep.subr.bf16.mxu0 %v6147_v61  ;;  %v6217_v38 = vld [vmem:[%s8712_s10 + $0x40] ss:$16 sps:$4 sm:$0xff]  }
 0x358   :  { %3852 = vmatprep.subr.bf16.mxu1 %v6150_v19  ;;  %v2734_v61 = vpack.c.bf16 %v2722_v60, %v2718_v17  ;;  %v6225_v19 = vld [vmem:[%s8712_s10 + $0x64] ss:$16 sps:$4 sm:$0xff]   ;;  %v6295_v17 = vld [vmem:[%s8712_s10 + $0x1e0] ss:$16 sps:$4 sm:$0xff]  }
 0x359   :  { %v6297_v60 = vld [vmem:[%s8712_s10 + $0x1e4] ss:$16 sps:$4 sm:$0xff]  }
 0x35a   :  { %3747 = vmatpush1.bf16.msra.mxu0 %v6145_v35  ;;  %v6223_v35 = vld [vmem:[%s8712_s10 + $0x60] ss:$16 sps:$4 sm:$0xff]  }
 0x35b   :  { %3853 = vmatpush1.bf16.msra.mxu1 %v6148_v32  ;;  %3748 = vmatprep.subr.bf16.mxu0 %v6153_v62  ;;  %v6226_v32 = vld [vmem:[%s8712_s10 + $0x68] ss:$16 sps:$4 sm:$0xff]   ;;  %v6231_v62 = vld [vmem:[%s8712_s10 + $0x84] ss:$16 sps:$4 sm:$0xff]  }
 0x35c   :  { %3854 = vmatprep.subr.bf16.mxu1 %v6156_v34  ;;  %v6229_v34 = vld [vmem:[%s8712_s10 + $0x80] ss:$16 sps:$4 sm:$0xff]  }
 0x35e   :  { %3749 = vmatpush1.bf16.msra.mxu0 %v6151_v18  ;;  %v6232_v18 = vld [vmem:[%s8712_s10 + $0x88] ss:$16 sps:$4 sm:$0xff]  }
 0x35f   :  { %3855 = vmatpush1.bf16.msra.mxu1 %v6154_v57  ;;  %3750 = vmatprep.subr.bf16.mxu0 %v6159_v49  ;;  %v6237_v57 = vld [vmem:[%s8712_s10 + $0xa4] ss:$16 sps:$4 sm:$0xff]   ;;  %v6240_v49 = vld [vmem:[%s8712_s10 + $0xac] ss:$16 sps:$4 sm:$0xff]  }
 0x360   :  { %3856 = vmatprep.subr.bf16.mxu1 %v6162_v3  ;;  %v6235_v3 = vld [vmem:[%s8712_s10 + $0xa0] ss:$16 sps:$4 sm:$0xff]  }
 0x362   :  { %3751 = vmatpush1.bf16.msra.mxu0 %v6157_v33  ;;  %v6238_v33 = vld [vmem:[%s8712_s10 + $0xa8] ss:$16 sps:$4 sm:$0xff]  }
 0x363   :  { %3857 = vmatpush1.bf16.msra.mxu1 %v6160_v63  ;;  %3752 = vmatprep.subr.bf16.mxu0 %v6165_v0  ;;  %v6243_v63 = vld [vmem:[%s8712_s10 + $0xc4] ss:$16 sps:$4 sm:$0xff]   ;;  %v6246_v0 = vld [vmem:[%s8712_s10 + $0xcc] ss:$16 sps:$4 sm:$0xff]  }
 0x364   :  { %3858 = vmatprep.subr.bf16.mxu1 %v6168_v1  ;;  %v6241_v1 = vld [vmem:[%s8712_s10 + $0xc0] ss:$16 sps:$4 sm:$0xff]  }
 0x366   :  { %3753 = vmatpush1.bf16.msra.mxu0 %v6163_v6  ;;  %v6244_v6 = vld [vmem:[%s8712_s10 + $0xc8] ss:$16 sps:$4 sm:$0xff]  }
 0x367   :  { %3859 = vmatpush1.bf16.msra.mxu1 %v6166_v10  ;;  %3754 = vmatprep.subr.bf16.mxu0 %v6171_v9  ;;  %v6249_v10 = vld [vmem:[%s8712_s10 + $0xe4] ss:$16 sps:$4 sm:$0xff]   ;;  %v6252_v9 = vld [vmem:[%s8712_s10 + $0xec] ss:$16 sps:$4 sm:$0xff]  }
 0x368   :  { %3860 = vmatprep.subr.bf16.mxu1 %v6174_v11  ;;  %v6247_v11 = vld [vmem:[%s8712_s10 + $0xe0] ss:$16 sps:$4 sm:$0xff]  }
 0x36a   :  { %3755 = vmatpush1.bf16.msra.mxu0 %v6169_v40  ;;  %v6250_v40 = vld [vmem:[%s8712_s10 + $0xe8] ss:$16 sps:$4 sm:$0xff]  }
 0x36b   :  { %3861 = vmatpush1.bf16.msra.mxu1 %v6172_v43  ;;  %3756 = vmatprep.subr.bf16.mxu0 %v6177_v59  ;;  %v6255_v43 = vld [vmem:[%s8712_s10 + $0x104] ss:$16 sps:$4 sm:$0xff]   ;;  %v6258_v59 = vld [vmem:[%s8712_s10 + $0x10c] ss:$16 sps:$4 sm:$0xff]  }
 0x36c   :  { %3862 = vmatprep.subr.bf16.mxu1 %v6180_v15  ;;  %v6253_v15 = vld [vmem:[%s8712_s10 + $0x100] ss:$16 sps:$4 sm:$0xff]  }
 0x36e   :  { %3757 = vmatpush1.bf16.msra.mxu0 %v6175_v39  ;;  %v6256_v39 = vld [vmem:[%s8712_s10 + $0x108] ss:$16 sps:$4 sm:$0xff]  }
 0x36f   :  { %3863 = vmatpush1.bf16.msra.mxu1 %v6178_v21  ;;  %3758 = vmatprep.subr.bf16.mxu0 %v6183_v25  ;;  %v6261_v21 = vld [vmem:[%s8712_s10 + $0x124] ss:$16 sps:$4 sm:$0xff]   ;;  %v6264_v25 = vld [vmem:[%s8712_s10 + $0x12c] ss:$16 sps:$4 sm:$0xff]  }
 0x370   :  { %3864 = vmatprep.subr.bf16.mxu1 %v6186_v51  ;;  %v6259_v51 = vld [vmem:[%s8712_s10 + $0x120] ss:$16 sps:$4 sm:$0xff]  }
 0x372   :  { %3759 = vmatpush1.bf16.msra.mxu0 %v6181_v7  ;;  %v6262_v7 = vld [vmem:[%s8712_s10 + $0x128] ss:$16 sps:$4 sm:$0xff]  }
 0x373   :  { %3865 = vmatpush1.bf16.msra.mxu1 %v6184_v41  ;;  %3760 = vmatprep.subr.bf16.mxu0 %v6189_v20  ;;  %v6267_v41 = vld [vmem:[%s8712_s10 + $0x144] ss:$16 sps:$4 sm:$0xff]   ;;  %v6270_v20 = vld [vmem:[%s8712_s10 + $0x14c] ss:$16 sps:$4 sm:$0xff]  }
 0x374   :  { %3866 = vmatprep.subr.bf16.mxu1 %v6192_v22  ;;  %v6265_v22 = vld [vmem:[%s8712_s10 + $0x140] ss:$16 sps:$4 sm:$0xff]  }
 0x376   :  { %3761 = vmatpush1.bf16.msra.mxu0 %v6187_v23  ;;  %v6268_v23 = vld [vmem:[%s8712_s10 + $0x148] ss:$16 sps:$4 sm:$0xff]  }
 0x377   :  { %3867 = vmatpush1.bf16.msra.mxu1 %v6190_v4  ;;  %3762 = vmatprep.subr.bf16.mxu0 %v6195_v50  ;;  %v6273_v4 = vld [vmem:[%s8712_s10 + $0x164] ss:$16 sps:$4 sm:$0xff]   ;;  %v6276_v50 = vld [vmem:[%s8712_s10 + $0x16c] ss:$16 sps:$4 sm:$0xff]  }
 0x378   :  { %3868 = vmatprep.subr.bf16.mxu1 %v6198_v27  ;;  %v6271_v27 = vld [vmem:[%s8712_s10 + $0x160] ss:$16 sps:$4 sm:$0xff]  }
 0x37a   :  { %3763 = vmatpush1.bf16.msra.mxu0 %v6193_v28  ;;  %v6274_v28 = vld [vmem:[%s8712_s10 + $0x168] ss:$16 sps:$4 sm:$0xff]  }
 0x37b   :  { %3869 = vmatpush1.bf16.msra.mxu1 %v6196_v29  ;;  %3764 = vmatprep.subr.bf16.mxu0 %v6201_v44  ;;  %v6279_v29 = vld [vmem:[%s8712_s10 + $0x184] ss:$16 sps:$4 sm:$0xff]   ;;  %v6282_v44 = vld [vmem:[%s8712_s10 + $0x18c] ss:$16 sps:$4 sm:$0xff]  }
 0x37c   :  { %3870 = vmatprep.subr.bf16.mxu1 %v6204_v52  ;;  %v6277_v52 = vld [vmem:[%s8712_s10 + $0x180] ss:$16 sps:$4 sm:$0xff]  }
 0x37e   :  { %3765 = vmatpush1.bf16.msra.mxu0 %v6199_v55  ;;  %v6280_v55 = vld [vmem:[%s8712_s10 + $0x188] ss:$16 sps:$4 sm:$0xff]  }
 0x37f   :  { %3871 = vmatpush1.bf16.msra.mxu1 %v6202_v48  ;;  %4533 = vmatprep.subr.bf16.mxu0 %v6207_v31  ;;  %v6285_v48 = vld [vmem:[%s8712_s10 + $0x1a4] ss:$16 sps:$4 sm:$0xff]   ;;  %v6288_v31 = vld [vmem:[%s8712_s10 + $0x1ac] ss:$16 sps:$4 sm:$0xff]  }
 0x380   :  { %4639 = vmatprep.subr.bf16.mxu1 %v6210_v47  ;;  %v6283_v47 = vld [vmem:[%s8712_s10 + $0x1a0] ss:$16 sps:$4 sm:$0xff]  }
 0x381   :  { %3767 = vmatmul.mubr.bf16.vlgmr.msra.gmra.mrb[24].mxu0 %v7947_v2 }
 0x382   :  { %3873 = vmatmul.mubr.bf16.vlgmr.msra.gmra.mrb[24].mxu1 %v7947_v2  ;;  %3776 = vmatprep.mubr.bf16.mxu0 %v7972_v26  ;;  %v6219_v2 = vld [vmem:[%s8712_s10 + $0x44] ss:$16 sps:$4 sm:$0xff]  }
 0x383   :  { %3882 = vmatprep.mubr.bf16.mxu1 %v7972_v26  ;;  %4534 = vmatpush1.bf16.msra.mxu0 %v6205_v16  ;;  %v6222_v26 = vld [vmem:[%s8712_s10 + $0x4c] ss:$16 sps:$4 sm:$0xff]   ;;  %v6286_v16 = vld [vmem:[%s8712_s10 + $0x1a8] ss:$16 sps:$4 sm:$0xff]  }
 0x384   :  { %4640 = vmatpush1.bf16.msra.mxu1 %v6208_v36  ;;  %4535 = vmatprep.subr.bf16.mxu0 %v6213_v12  ;;  %v8332_v36 = vpop.permute.xlu1 %2709  ;;  %v6291_v12 = vld [vmem:[%s8712_s10 + $0x1c4] ss:$16 sps:$4 sm:$0xff]  }
 0x385   :  { %4641 = vmatprep.subr.bf16.mxu1 %v6216_v54  ;;  %v6294_v54 = vld [vmem:[%s8712_s10 + $0x1cc] ss:$16 sps:$4 sm:$0xff]  }
 0x387   :  { %4536 = vmatpush1.bf16.msra.mxu0 %v6211_v46  ;;  %v6289_v46 = vld [vmem:[%s8712_s10 + $0x1c0] ss:$16 sps:$4 sm:$0xff]  }
 0x388   :  { %4642 = vmatpush1.bf16.msra.mxu1 %v6214_v13  ;;  %4537 = vmatprep.subr.bf16.mxu0 %v6219_v2  ;;  %v6292_v13 = vld [vmem:[%s8712_s10 + $0x1c8] ss:$16 sps:$4 sm:$0xff]   ;;  %v6300_v2 = vld [vmem:[%s8712_s10 + $0x1ec] ss:$16 sps:$4 sm:$0xff]  }
 0x389   :  { %4643 = vmatprep.subr.bf16.mxu1 %v6222_v26  ;;  %3777 = vmatmul.mubr.bf16.gmra.mrb[28].mxu0 %v7974_v58  ;;  %v8352_v26 = vpop.permute.xlu1 %2714 }
 0x38a   :  { %3883 = vmatmul.mubr.bf16.gmra.mrb[28].mxu1 %v7974_v58  ;;  %4565 = vmatprep.mubr.bf16.mxu0 %v2734_v61  ;;  %v6234_v58 = vld [vmem:[%s8712_s10 + $0x8c] ss:$16 sps:$4 sm:$0xff]  }
 0x38b   :  { %4671 = vmatprep.mubr.bf16.mxu1 %v2734_v61  ;;  %4538 = vmatpush1.bf16.msra.mxu0 %v6217_v38  ;;  %v6298_v38 = vld [vmem:[%s8712_s10 + $0x1e8] ss:$16 sps:$4 sm:$0xff]   ;;  %v6303_v61 = vld [vmem:[%s8712_s10 + $0x204] ss:$16 sps:$4 sm:$0xff]  }
 0x38c   :  { %4644 = vmatpush1.bf16.msra.mxu1 %v6220_v5  ;;  %4539 = vmatprep.subr.bf16.mxu0 %v6225_v19  ;;  %v2721_v5 = vmul.f32 %v7522_v53, %v7990_v45  ;;  %v6306_v19 = vld [vmem:[%s8712_s10 + $0x20c] ss:$16 sps:$4 sm:$0xff]   ;;  %v6301_v53 = vld [vmem:[%s8712_s10 + $0x200] ss:$16 sps:$4 sm:$0xff]  }
 0x38d   :  { %4645 = vmatprep.subr.bf16.mxu1 %v6228_v42  ;;  %v2730_v42 = vmul.f32 %v7582_v37, %v8352_v26 }
 0x38f   :  { %4540 = vmatpush1.bf16.msra.mxu0 %v6223_v35  ;;  %v2717_v35 = vmul.f32 %v7496_v30, %v7976_v24  ;;  %v6309_v30 = vld [vmem:[%s8712_s10 + $0x224] ss:$16 sps:$4 sm:$0xff]   ;;  %v6307_v24 = vld [vmem:[%s8712_s10 + $0x220] ss:$16 sps:$4 sm:$0xff]  }
 0x390   :  { %4646 = vmatpush1.bf16.msra.mxu1 %v6226_v32  ;;  %4541 = vmatprep.subr.bf16.mxu0 %v6231_v62  ;;  %v2726_v32 = vmul.f32 %v7564_v56, %v8332_v36  ;;  %v6304_v62 = vld [vmem:[%s8712_s10 + $0x208] ss:$16 sps:$4 sm:$0xff]   ;;  %v6312_v56 = vld [vmem:[%s8712_s10 + $0x22c] ss:$16 sps:$4 sm:$0xff]  }
 0x391   :  { %4647 = vmatprep.subr.bf16.mxu1 %v6234_v58  ;;  %v2733_v45 = vpack.c.bf16 %v2721_v5, %v2717_v35  ;;  %v8780_v58 = vld [vmem:[#allocation26_spill] sm:$0xff] }
 0x392   :  { %v2738_v37 = vpack.c.bf16 %v2730_v42, %v2726_v32  ;;  %v6373_v5 = vld [vmem:[%s8712_s10 + $0x380] ss:$16 sps:$4 sm:$0xff]   ;;  %v6384_v42 = vld [vmem:[%s8712_s10 + $0x3ac] ss:$16 sps:$4 sm:$0xff]   ;;  %v6382_v32 = vld [vmem:[%s8712_s10 + $0x3a8] ss:$16 sps:$4 sm:$0xff]  }
 0x393   :  { %4542 = vmatpush1.bf16.msra.mxu0 %v6229_v34  ;;  %v2729_v34 = vmul.f32 %v8780_v58, %v8352_v26  ;;  %v6379_v35 = vld [vmem:[%s8712_s10 + $0x3a0] ss:$16 sps:$4 sm:$0xff]   ;;  %v6394_v58 = vld [vmem:[%s8712_s10 + $0x3e8] ss:$16 sps:$4 sm:$0xff]  }
 0x394   :  { %4648 = vmatpush1.bf16.msra.mxu1 %v6232_v18  ;;  %4543 = vmatprep.subr.bf16.mxu0 %v6237_v57  ;;  %v6310_v18 = vld [vmem:[%s8712_s10 + $0x228] ss:$16 sps:$4 sm:$0xff]   ;;  %v6315_v57 = vld [vmem:[%s8712_s10 + $0x244] ss:$16 sps:$4 sm:$0xff]  }
 0x395   :  { %4649 = vmatprep.subr.bf16.mxu1 %v6240_v49  ;;  %v6318_v49 = vld [vmem:[%s8712_s10 + $0x24c] ss:$16 sps:$4 sm:$0xff]  }
 0x397   :  { %4544 = vmatpush1.bf16.msra.mxu0 %v6235_v3  ;;  %v8781_v3 = vld [vmem:[#allocation23_spill] sm:$0xff] }
 0x398   :  { %4650 = vmatpush1.bf16.msra.mxu1 %v6238_v33  ;;  %4545 = vmatprep.subr.bf16.mxu0 %v6243_v63  ;;  %v2725_v33 = vmul.f32 %v8781_v3, %v8332_v36  ;;  %v6313_v63 = vld [vmem:[%s8712_s10 + $0x240] ss:$16 sps:$4 sm:$0xff]  }
 0x399   :  { %4651 = vmatprep.subr.bf16.mxu1 %v6246_v0 }
 0x39a   :  { %v2737_v0 = vpack.c.bf16 %v2729_v34, %v2725_v33  ;;  %v8782_v34 = vld [vmem:[#allocation28_spill] sm:$0xff]  ;;  %v8784_v33 = vld [vmem:[#allocation27_spill] sm:$0xff] }
 0x39b   :  { %4546 = vmatpush1.bf16.msra.mxu0 %v6241_v1  ;;  %v6316_v1 = vld [vmem:[%s8712_s10 + $0x248] ss:$16 sps:$4 sm:$0xff]  }
 0x39c   :  { %4652 = vmatpush1.bf16.msra.mxu1 %v6244_v6  ;;  %4547 = vmatprep.subr.bf16.mxu0 %v6249_v10  ;;  %v6321_v6 = vld [vmem:[%s8712_s10 + $0x264] ss:$16 sps:$4 sm:$0xff]   ;;  %v6324_v10 = vld [vmem:[%s8712_s10 + $0x26c] ss:$16 sps:$4 sm:$0xff]  }
 0x39d   :  { %4653 = vmatprep.subr.bf16.mxu1 %v6252_v9  ;;  %v6319_v9 = vld [vmem:[%s8712_s10 + $0x260] ss:$16 sps:$4 sm:$0xff]  }
 0x39f   :  { %4548 = vmatpush1.bf16.msra.mxu0 %v6247_v11  ;;  %v6322_v11 = vld [vmem:[%s8712_s10 + $0x268] ss:$16 sps:$4 sm:$0xff]  }
 0x3a0   :  { %4654 = vmatpush1.bf16.msra.mxu1 %v6250_v40  ;;  %4549 = vmatprep.subr.bf16.mxu0 %v6255_v43  ;;  %v6327_v40 = vld [vmem:[%s8712_s10 + $0x284] ss:$16 sps:$4 sm:$0xff]   ;;  %v6330_v43 = vld [vmem:[%s8712_s10 + $0x28c] ss:$16 sps:$4 sm:$0xff]  }
 0x3a1   :  { %4655 = vmatprep.subr.bf16.mxu1 %v6258_v59  ;;  %v6325_v59 = vld [vmem:[%s8712_s10 + $0x280] ss:$16 sps:$4 sm:$0xff]  }
 0x3a3   :  { %4550 = vmatpush1.bf16.msra.mxu0 %v6253_v15  ;;  %v6333_v15 = vld [vmem:[%s8712_s10 + $0x2a4] ss:$16 sps:$4 sm:$0xff]  }
 0x3a4   :  { %4656 = vmatpush1.bf16.msra.mxu1 %v6256_v39  ;;  %4551 = vmatprep.subr.bf16.mxu0 %v6261_v21  ;;  %v6336_v39 = vld [vmem:[%s8712_s10 + $0x2ac] ss:$16 sps:$4 sm:$0xff]   ;;  %v6331_v21 = vld [vmem:[%s8712_s10 + $0x2a0] ss:$16 sps:$4 sm:$0xff]  }
 0x3a5   :  { %4657 = vmatprep.subr.bf16.mxu1 %v6264_v25  ;;  %v6334_v25 = vld [vmem:[%s8712_s10 + $0x2a8] ss:$16 sps:$4 sm:$0xff]  }
 0x3a7   :  { %4552 = vmatpush1.bf16.msra.mxu0 %v6259_v51  ;;  %v6339_v51 = vld [vmem:[%s8712_s10 + $0x2c4] ss:$16 sps:$4 sm:$0xff]  }
 0x3a8   :  { %4658 = vmatpush1.bf16.msra.mxu1 %v6262_v7  ;;  %4553 = vmatprep.subr.bf16.mxu0 %v6267_v41  ;;  %v6342_v7 = vld [vmem:[%s8712_s10 + $0x2cc] ss:$16 sps:$4 sm:$0xff]   ;;  %v6337_v41 = vld [vmem:[%s8712_s10 + $0x2c0] ss:$16 sps:$4 sm:$0xff]  }
 0x3a9   :  { %4659 = vmatprep.subr.bf16.mxu1 %v6270_v20  ;;  %v6340_v20 = vld [vmem:[%s8712_s10 + $0x2c8] ss:$16 sps:$4 sm:$0xff]  }
 0x3ab   :  { %4554 = vmatpush1.bf16.msra.mxu0 %v6265_v22  ;;  %v6345_v22 = vld [vmem:[%s8712_s10 + $0x2e4] ss:$16 sps:$4 sm:$0xff]  }
 0x3ac   :  { %4660 = vmatpush1.bf16.msra.mxu1 %v6268_v23  ;;  %4555 = vmatprep.subr.bf16.mxu0 %v6273_v4  ;;  %v6348_v23 = vld [vmem:[%s8712_s10 + $0x2ec] ss:$16 sps:$4 sm:$0xff]   ;;  %v6343_v4 = vld [vmem:[%s8712_s10 + $0x2e0] ss:$16 sps:$4 sm:$0xff]  }
 0x3ad   :  { %4661 = vmatprep.subr.bf16.mxu1 %v6276_v50  ;;  %v6346_v50 = vld [vmem:[%s8712_s10 + $0x2e8] ss:$16 sps:$4 sm:$0xff]  }
 0x3af   :  { %4556 = vmatpush1.bf16.msra.mxu0 %v6271_v27  ;;  %v6351_v27 = vld [vmem:[%s8712_s10 + $0x304] ss:$16 sps:$4 sm:$0xff]  }
 0x3b0   :  { %4662 = vmatpush1.bf16.msra.mxu1 %v6274_v28  ;;  %4557 = vmatprep.subr.bf16.mxu0 %v6279_v29  ;;  %v6354_v28 = vld [vmem:[%s8712_s10 + $0x30c] ss:$16 sps:$4 sm:$0xff]   ;;  %v6349_v29 = vld [vmem:[%s8712_s10 + $0x300] ss:$16 sps:$4 sm:$0xff]  }
 0x3b1   :  { %4663 = vmatprep.subr.bf16.mxu1 %v6282_v44  ;;  %v6352_v44 = vld [vmem:[%s8712_s10 + $0x308] ss:$16 sps:$4 sm:$0xff]  }
 0x3b3   :  { %4558 = vmatpush1.bf16.msra.mxu0 %v6277_v52  ;;  %v6357_v52 = vld [vmem:[%s8712_s10 + $0x324] ss:$16 sps:$4 sm:$0xff]  }
 0x3b4   :  { %4664 = vmatpush1.bf16.msra.mxu1 %v6280_v55  ;;  %4559 = vmatprep.subr.bf16.mxu0 %v6285_v48  ;;  %v6360_v55 = vld [vmem:[%s8712_s10 + $0x32c] ss:$16 sps:$4 sm:$0xff]   ;;  %v6355_v48 = vld [vmem:[%s8712_s10 + $0x320] ss:$16 sps:$4 sm:$0xff]  }
 0x3b5   :  { %4665 = vmatprep.subr.bf16.mxu1 %v6288_v31  ;;  %v6358_v31 = vld [vmem:[%s8712_s10 + $0x328] ss:$16 sps:$4 sm:$0xff]  }
 0x3b7   :  { %4560 = vmatpush1.bf16.msra.mxu0 %v6283_v47  ;;  %v6363_v47 = vld [vmem:[%s8712_s10 + $0x344] ss:$16 sps:$4 sm:$0xff]  }
 0x3b8   :  { %4666 = vmatpush1.bf16.msra.mxu1 %v6286_v16  ;;  %4561 = vmatprep.subr.bf16.mxu0 %v6291_v12  ;;  %v6366_v16 = vld [vmem:[%s8712_s10 + $0x34c] ss:$16 sps:$4 sm:$0xff]   ;;  %v6361_v12 = vld [vmem:[%s8712_s10 + $0x340] ss:$16 sps:$4 sm:$0xff]  }
 0x3b9   :  { %4667 = vmatprep.subr.bf16.mxu1 %v6294_v54  ;;  %v6364_v54 = vld [vmem:[%s8712_s10 + $0x348] ss:$16 sps:$4 sm:$0xff]  }
 0x3bb   :  { %4562 = vmatpush1.bf16.msra.mxu0 %v6289_v46  ;;  %v6369_v46 = vld [vmem:[%s8712_s10 + $0x364] ss:$16 sps:$4 sm:$0xff]  }
 0x3bc   :  { %4668 = vmatpush1.bf16.msra.mxu1 %v6292_v13  ;;  %4563 = vmatprep.subr.bf16.mxu0 %v6297_v60  ;;  %v6372_v13 = vld [vmem:[%s8712_s10 + $0x36c] ss:$16 sps:$4 sm:$0xff]   ;;  %v6367_v60 = vld [vmem:[%s8712_s10 + $0x360] ss:$16 sps:$4 sm:$0xff]  }
 0x3bd   :  { %4669 = vmatprep.subr.bf16.mxu1 %v6300_v2  ;;  %v6370_v2 = vld [vmem:[%s8712_s10 + $0x368] ss:$16 sps:$4 sm:$0xff]  }
 0x3bf   :  { %4564 = vmatpush1.bf16.msra.mxu0 %v6295_v17  ;;  %v6375_v17 = vld [vmem:[%s8712_s10 + $0x384] ss:$16 sps:$4 sm:$0xff]  }
 0x3c0   :  { %4670 = vmatpush1.bf16.msra.mxu1 %v6298_v38  ;;  %4586 = vmatprep.subr.bf16.mxu0 %v6303_v61  ;;  %v6378_v38 = vld [vmem:[%s8712_s10 + $0x38c] ss:$16 sps:$4 sm:$0xff]   ;;  %v6376_v61 = vld [vmem:[%s8712_s10 + $0x388] ss:$16 sps:$4 sm:$0xff]  }
 0x3c1   :  { %4692 = vmatprep.subr.bf16.mxu1 %v6306_v19  ;;  %v6381_v19 = vld [vmem:[%s8712_s10 + $0x3a4] ss:$16 sps:$4 sm:$0xff]  }
 0x3c2   :  { %4566 = vmatmul.mubr.bf16.vlgmr.msra.gmra.mrb[24].mxu0 %v2733_v45 }
 0x3c3   :  { %4672 = vmatmul.mubr.bf16.vlgmr.msra.gmra.mrb[24].mxu1 %v2733_v45  ;;  %4575 = vmatprep.mubr.bf16.mxu0 %v2738_v37  ;;  %v6390_v45 = vld [vmem:[%s8712_s10 + $0x3cc] ss:$16 sps:$4 sm:$0xff]  }
 0x3c4   :  { %4587 = vmatpush1.bf16.msra.mxu0 %v6301_v53  ;;  %4681 = vmatprep.mubr.bf16.mxu1 %v2738_v37  ;;  %v6387_v53 = vld [vmem:[%s8712_s10 + $0x3c4] ss:$16 sps:$4 sm:$0xff]   ;;  %v6388_v37 = vld [vmem:[%s8712_s10 + $0x3c8] ss:$16 sps:$4 sm:$0xff]  }
 0x3c5   :  { %4693 = vmatpush1.bf16.msra.mxu1 %v6304_v62  ;;  %4588 = vmatprep.subr.bf16.mxu0 %v6309_v30  ;;  %v6385_v62 = vld [vmem:[%s8712_s10 + $0x3c0] ss:$16 sps:$4 sm:$0xff]   ;;  %v6393_v30 = vld [vmem:[%s8712_s10 + $0x3e4] ss:$16 sps:$4 sm:$0xff]  }
 0x3c6   :  { %4694 = vmatprep.subr.bf16.mxu1 %v6312_v56  ;;  %v6396_v56 = vld [vmem:[%s8712_s10 + $0x3ec] ss:$16 sps:$4 sm:$0xff]  }
 0x3c8   :  { %4589 = vmatpush1.bf16.msra.mxu0 %v6307_v24  ;;  %v6391_v24 = vld [vmem:[%s8712_s10 + $0x3e0] ss:$16 sps:$4 sm:$0xff]  }
 0x3c9   :  { %4695 = vmatpush1.bf16.msra.mxu1 %v6310_v18  ;;  %4590 = vmatprep.subr.bf16.mxu0 %v6315_v57  ;;  %v2732_v18 = vmul.f32 %v8782_v34, %v8352_v26  ;;  %v8783_v57 = vld [vmem:[#allocation25_spill] sm:$0xff] }
 0x3ca   :  { %4696 = vmatprep.subr.bf16.mxu1 %v6318_v49  ;;  %4576 = vmatmul.mubr.bf16.gmra.mrb[28].mxu0 %v2737_v0  ;;  %v2728_v49 = vmul.f32 %v8783_v57, %v8332_v36 }
 0x3cb   :  { %4682 = vmatmul.mubr.bf16.gmra.mrb[28].mxu1 %v2737_v0  ;;  %4618 = vmatprep.mubr.bf16.mxu0 %v8020_v8  ;;  %v8785_v0 = vld [vmem:[#allocation24_spill] sm:$0xff] }
 0x3cc   :  { %4591 = vmatpush1.bf16.msra.mxu0 %v6313_v63  ;;  %4724 = vmatprep.mubr.bf16.mxu1 %v8020_v8  ;;  %v6328_v8 = vld [vmem:[%s8712_s10 + $0x288] ss:$16 sps:$4 sm:$0xff]   ;;  %v2740_v3 = vpack.c.bf16 %v2732_v18, %v2728_v49  ;;  %v2731_v63 = vmul.f32 %v8784_v33, %v8352_v26 }
 0x3cd   :  { %4697 = vmatpush1.bf16.msra.mxu1 %v6316_v1  ;;  %4592 = vmatprep.subr.bf16.mxu0 %v6321_v6  ;;  %v2727_v1 = vmul.f32 %v8785_v0, %v8332_v36 }
 0x3ce   :  { %4698 = vmatprep.subr.bf16.mxu1 %v6324_v10  ;;  %v4745_v10 = vld [vmem:[%s8713_s12] sm:$0xf] }
 0x3cf   :  { %v2739_v6 = vpack.c.bf16 %v2731_v63, %v2727_v1 }
 0x3d0   :  { %4593 = vmatpush1.bf16.msra.mxu0 %v6319_v9  ;;  %v8786_v9 = vld [vmem:[#allocation19_spill] sm:$0xff] }
 0x3d1   :  { %4699 = vmatpush1.bf16.msra.mxu1 %v6322_v11  ;;  %4594 = vmatprep.subr.bf16.mxu0 %v6327_v40  ;;  %v4750_v11 = vrot.slane %v4745_v10, %v8786_v9  ;;  %v8787_v40 = vld [vmem:[#allocation20_spill] sm:$0xff] }
 0x3d2   :  { %4700 = vmatprep.subr.bf16.mxu1 %v6330_v43  ;;  %v4758_v43 = vrot.slane %v4745_v10, %v8787_v40 }
 0x3d4   :  { %4595 = vmatpush1.bf16.msra.mxu0 %v6325_v59 }
 0x3d5   :  { %4701 = vmatpush1.bf16.msra.mxu1 %v6328_v8  ;;  %4596 = vmatprep.subr.bf16.mxu0 %v6333_v15  ;;  %v8789_v8 = vld [vmem:[#allocation22_spill] sm:$0xff] }
 0x3d6   :  { %4702 = vmatprep.subr.bf16.mxu1 %v6336_v39  ;;  %v4762_v15 = vrot.slane %v4745_v10, %v8789_v8 }
 0x3d8   :  { %4597 = vmatpush1.bf16.msra.mxu0 %v6331_v21 }
 0x3d9   :  { %4703 = vmatpush1.bf16.msra.mxu1 %v6334_v25  ;;  %4598 = vmatprep.subr.bf16.mxu0 %v6339_v51 }
 0x3da   :  { %4704 = vmatprep.subr.bf16.mxu1 %v6342_v7 }
 0x3dc   :  { %4599 = vmatpush1.bf16.msra.mxu0 %v6337_v41 }
 0x3dd   :  { %4705 = vmatpush1.bf16.msra.mxu1 %v6340_v20  ;;  %4600 = vmatprep.subr.bf16.mxu0 %v6345_v22  ;;  %v8790_v20 = vld [vmem:[#allocation3_spill] sm:$0xff] }
 0x3de   :  { %4706 = vmatprep.subr.bf16.mxu1 %v6348_v23 }
 0x3e0   :  { %4601 = vmatpush1.bf16.msra.mxu0 %v6343_v4 }
 0x3e1   :  { %4707 = vmatpush1.bf16.msra.mxu1 %v6346_v50  ;;  %4602 = vmatprep.subr.bf16.mxu0 %v6351_v27 }
 0x3e2   :  { %4708 = vmatprep.subr.bf16.mxu1 %v6354_v28  ;;  %v8791_v28 = vld [vmem:[#allocation4_spill] sm:$0xff] }
 0x3e4   :  { %4603 = vmatpush1.bf16.msra.mxu0 %v6349_v29 }
 0x3e5   :  { %4709 = vmatpush1.bf16.msra.mxu1 %v6352_v44  ;;  %4604 = vmatprep.subr.bf16.mxu0 %v6357_v52  ;;  %v8792_v44 = vld [vmem:[#allocation5_spill] sm:$0xff] }
 0x3e6   :  { %4710 = vmatprep.subr.bf16.mxu1 %v6360_v55 }
 0x3e8   :  { %4605 = vmatpush1.bf16.msra.mxu0 %v6355_v48 }
 0x3e9   :  { %4711 = vmatpush1.bf16.msra.mxu1 %v6358_v31  ;;  %4606 = vmatprep.subr.bf16.mxu0 %v6363_v47 }
 0x3ea   :  { %4712 = vmatprep.subr.bf16.mxu1 %v6366_v16  ;;  %v8793_v16 = vld [vmem:[#allocation6_spill] sm:$0xff] }
 0x3ec   :  { %4607 = vmatpush1.bf16.msra.mxu0 %v6361_v12 }
 0x3ed   :  { %4713 = vmatpush1.bf16.msra.mxu1 %v6364_v54  ;;  %4608 = vmatprep.subr.bf16.mxu0 %v6369_v46  ;;  %v8794_v54 = vld [vmem:[#allocation7_spill] sm:$0xff] }
 0x3ee   :  { %4714 = vmatprep.subr.bf16.mxu1 %v6372_v13 }
 0x3f0   :  { %4609 = vmatpush1.bf16.msra.mxu0 %v6367_v60 }
 0x3f1   :  { %4715 = vmatpush1.bf16.msra.mxu1 %v6370_v2  ;;  %4610 = vmatprep.subr.bf16.mxu0 %v6375_v17  ;;  %v8795_v2 = vld [vmem:[#allocation8_spill] sm:$0xff] }
 0x3f2   :  { %4716 = vmatprep.subr.bf16.mxu1 %v6378_v38  ;;  %v8796_v38 = vld [vmem:[#allocation9_spill] sm:$0xff] }
 0x3f4   :  { %4611 = vmatpush1.bf16.msra.mxu0 %v6373_v5 }
 0x3f5   :  { %4717 = vmatpush1.bf16.msra.mxu1 %v6376_v61  ;;  %4612 = vmatprep.subr.bf16.mxu0 %v6381_v19  ;;  %v8797_v19 = vld [vmem:[#allocation10_spill] sm:$0xff] }
 0x3f6   :  { %4718 = vmatprep.subr.bf16.mxu1 %v6384_v42 }
 0x3f8   :  { %4613 = vmatpush1.bf16.msra.mxu0 %v6379_v35 }
 0x3f9   :  { %4719 = vmatpush1.bf16.msra.mxu1 %v6382_v32  ;;  %4614 = vmatprep.subr.bf16.mxu0 %v6387_v53 }
 0x3fa   :  { %4720 = vmatprep.subr.bf16.mxu1 %v6390_v45 }
 0x3fc   :  { %4615 = vmatpush1.bf16.msra.mxu0 %v6385_v62 }
 0x3fd   :  { %4721 = vmatpush1.bf16.msra.mxu1 %v6388_v37  ;;  %4616 = vmatprep.subr.bf16.mxu0 %v6393_v30 }
 0x3fe   :  { %4722 = vmatprep.subr.bf16.mxu1 %v6396_v56 }
 0x400   :  { %4617 = vmatpush1.bf16.msra.mxu0 %v6391_v24 }
 0x401   :  { %4723 = vmatpush1.bf16.msra.mxu1 %v6394_v58 }
 0x403   :  { %4619 = vmatmul.mubr.bf16.vlgmr.msra.gmra.mrb[24].mxu0 %v8012_v14 }
 0x404   :  { %4725 = vmatmul.mubr.bf16.vlgmr.msra.gmra.mrb[24].mxu1 %v8012_v14  ;;  %4628 = vmatprep.mubr.bf16.mxu0 %v2740_v3  ;;  %v8788_v14 = vld [vmem:[#allocation21_spill] sm:$0xff] }
 0x405   :  { %4734 = vmatprep.mubr.bf16.mxu1 %v2740_v3  ;;  %v4754_v59 = vrot.slane %v4745_v10, %v8788_v14  ;;  %v8798_v3 = vld [vmem:[#allocation11_spill] sm:$0xff] }
 0x40b   :  { %4629 = vmatmul.mubr.bf16.gmra.mrb[28].mxu0 %v2739_v6 }
 0x40c   :  { %4735 = vmatmul.mubr.bf16.gmra.mrb[28].mxu1 %v2739_v6 }
 0x4d6   :  { %v4620_v26 = vpop.f32.mrb[24].mxu0 }
 0x4d7   :  { %v4767_v39 = vadd.f32 %v4750_v11, %v4620_v26  ;;  %v4726_v21 = vpop.f32.mrb[24].mxu1  ;;  %v4622_v25 = vpop.f32.mrb[25].mxu0  ;;  %v8799_v26 = vld [vmem:[#allocation12_spill] sm:$0xff] }
 0x4d8   :  { %v4769_v36 = vadd.f32 %v4758_v43, %v4726_v21  ;;  %v4768_v51 = vadd.f32 %v4754_v59, %v4622_v25  ;;  %v4728_v7 = vpop.f32.mrb[25].mxu1  ;;  %v4624_v41 = vpop.f32.mrb[26].mxu0  ;;  %v8800_v21 = vld [vmem:[#allocation13_spill] sm:$0xff] }
 0x4d9   :  { %v8584_v22 = vadd.f32 %v4767_v39, %v8790_v20  ;;  %v4770_v23 = vadd.f32 %v4762_v15, %v4728_v7  ;;  %v4771_v4 = vadd.f32 %v4750_v11, %v4624_v41  ;;  %v4730_v50 = vpop.f32.mrb[26].mxu1  ;;  %v4626_v27 = vpop.f32.mrb[27].mxu0  ;;  %v8801_v20 = vld [vmem:[#allocation14_spill] sm:$0xff] }
 0x4da   :  { %v8587_v29 = vadd.f32 %v4769_v36, %v8791_v28  ;;  %v8590_v52 = vadd.f32 %v4768_v51, %v8792_v44  ;;  %v4773_v55 = vadd.f32 %v4758_v43, %v4730_v50  ;;  %v4772_v48 = vadd.f32 %v4754_v59, %v4626_v27  ;;  %v4732_v31 = vpop.f32.mrb[27].mxu1  ;;  %v8803_v28 = vld [vmem:[#allocation16_spill] sm:$0xff] }
 0x4db   :  { %v4799_v47 = vmul.f32 %v8584_v22, %v8584_v22  ;;  %v8595_v12 = vadd.f32 %v4770_v23, %v8793_v16  ;;  %v8598_v46 = vadd.f32 %v4771_v4, %v8794_v54  ;;  %v4774_v13 = vadd.f32 %v4762_v15, %v4732_v31  ;;  %v8802_v4 = vld [vmem:[#allocation15_spill] sm:$0xff]  ;;  %v8805_v31 = vld [vmem:[#allocation18_spill] sm:$0xff] }
 0x4dc   :  { %v4800_v60 = vmul.f32 %v8590_v52, %v8590_v52  ;;  %v8603_v17 = vadd.f32 %v4773_v55, %v8795_v2  ;;  %v8606_v5 = vadd.f32 %v4772_v48, %v8796_v38  ;;  %v4801_v35 = vmul.f32 %v8587_v29, %v8587_v29  ;;  %v8804_v55 = vld [vmem:[#allocation17_spill] sm:$0xff] }
 0x4dd   :  { %v4803_v61 = vmul.f32 %v8598_v46, %v8598_v46  ;;  %v8611_v42 = vadd.f32 %v4774_v13, %v8797_v19  ;;  %v4802_v56 = vmul.f32 %v8595_v12, %v8595_v12 }
 0x4de   :  { %v4804_v32 = vmul.f32 %v8606_v5, %v8606_v5  ;;  %v4630_v53 = vpop.f32.mrb[28].mxu0  ;;  %v4815_v45 = vadd.f32 %v4800_v60, %v4799_v47  ;;  %v4805_v24 = vmul.f32 %v8603_v17, %v8603_v17 }
 0x4df   :  { %v4775_v62 = vadd.f32 %v4750_v11, %v4630_v53  ;;  %v4736_v37 = vpop.f32.mrb[28].mxu1  ;;  %v4632_v30 = vpop.f32.mrb[29].mxu0 }
 0x4e0   :  { %v4777_v58 = vadd.f32 %v4758_v43, %v4736_v37  ;;  %v4776_v34 = vadd.f32 %v4754_v59, %v4632_v30  ;;  %v4738_v18 = vpop.f32.mrb[29].mxu1  ;;  %v4634_v57 = vpop.f32.mrb[30].mxu0  ;;  %v4816_v49 = vadd.f32 %v4815_v45, %v4801_v35  ;;  %v4820_v10 = vadd.f32 %v4804_v32, %v4803_v61 }
 0x4e1   :  { %v8622_v33 = vadd.f32 %v4775_v62, %v8798_v3  ;;  %v4778_v63 = vadd.f32 %v4762_v15, %v4738_v18  ;;  %v4779_v0 = vadd.f32 %v4750_v11, %v4634_v57  ;;  %v4740_v1 = vpop.f32.mrb[30].mxu1  ;;  %v4636_v6 = vpop.f32.mrb[31].mxu0 }
 0x4e2   :  { %v8625_v39 = vadd.f32 %v4777_v58, %v8799_v26  ;;  %v8628_v25 = vadd.f32 %v4776_v34, %v8800_v21  ;;  %v4781_v36 = vadd.f32 %v4758_v43, %v4740_v1  ;;  %v4780_v51 = vadd.f32 %v4754_v59, %v4636_v6  ;;  %v4742_v7 = vpop.f32.mrb[31].mxu1 }
 0x4e3   :  { %v4807_v41 = vmul.f32 %v8622_v33, %v8622_v33  ;;  %v8633_v23 = vadd.f32 %v4778_v63, %v8801_v20  ;;  %v8636_v11 = vadd.f32 %v4779_v0, %v8802_v4  ;;  %v4782_v50 = vadd.f32 %v4762_v15, %v4742_v7 }
 0x4e4   :  { %v4808_v27 = vmul.f32 %v8628_v25, %v8628_v25  ;;  %v8641_v44 = vadd.f32 %v4781_v36, %v8803_v28  ;;  %v8644_v43 = vadd.f32 %v4780_v51, %v8804_v55  ;;  %v4806_v59 = vmul.f32 %v8611_v42, %v8611_v42 }
 0x4e5   :  { %v4811_v48 = vmul.f32 %v8636_v11, %v8636_v11  ;;  %v8651_v47 = vadd.f32 %v4782_v50, %v8805_v31  ;;  %v4817_v16 = vadd.f32 %v4816_v49, %v4802_v56  ;;  %v4821_v15 = vadd.f32 %v4820_v10, %v4805_v24  ;;  %v5503_v49 = vld.sshfl [vmem:[%s8714_s3] sm:$0xff pattern:$0x75316420] }
 0x4e6   :  { %v4809_v54 = vmul.f32 %v8625_v39, %v8625_v39  ;;  %v4812_v13 = vmul.f32 %v8644_v43, %v8644_v43  ;;  %v4825_v60 = vadd.f32 %v4808_v27, %v4807_v41  ;;  %v4813_v38 = vmul.f32 %v8641_v44, %v8641_v44 }
 0x4e7   :  { %4818 = vadd.xlane.f32.xlu1 %v4817_v16  ;;  %v4822_v2 = vadd.f32 %v4821_v15, %v4806_v59  ;;  %v4810_v61 = vmul.f32 %v8633_v23, %v8633_v23  ;;  %v4814_v53 = vmul.f32 %v8651_v47, %v8651_v47  ;;  %v4872_v3 = vrot.slane %v5503_v49, %v8786_v9 }
 0x4e8   :  { %v4826_v19 = vadd.f32 %v4825_v60, %v4809_v54  ;;  %v4830_v35 = vadd.f32 %v4812_v13, %v4811_v48  ;;  %v4876_v63 = vrot.slane %v5503_v49, %v8788_v14  ;;  %v4868_v0 = vcombine.high %v5503_v49, %v5503_v49 }
 0x4e9   :  { %4823 = vadd.xlane.f32.xlu0 %v4822_v2  ;;  %v4880_v21 = vrot.slane %v5503_v49, %v8787_v40  ;;  %v4884_v7 = vrot.slane %v5503_v49, %v8789_v8 }
 0x4ea   :  { %v4827_v32 = vadd.f32 %v4826_v19, %v4810_v61  ;;  %v4831_v45 = vadd.f32 %v4830_v35, %v4813_v38  ;;  %v4888_v4 = vrot.slane %v4868_v0, %v8786_v9  ;;  %v4896_v55 = vrot.slane %v4868_v0, %v8787_v40 }
 0x4ec   :  { %v4832_v62 = vadd.f32 %v4831_v45, %v4814_v53 }
 0x4ed   :  { %4828 = vadd.xlane.f32.xlu0 %v4827_v32 }
 0x4ee   :  { %4833 = vadd.xlane.f32.xlu1 %v4832_v62 }
 0x574   :  { %v4819_v37 = vpop.xlane.xlu1 %4818 }
 0x575   :  { %v4835_v30 = vmax.f32 %v4819_v37, 1e-24 }
 0x576   :  { %v4824_v56 = vpop.xlane.xlu0 %4823 }
 0x577   :  { %6429 = vrsqrt.f32 %v4835_v30  ;;  %v4836_v24 = vmax.f32 %v4824_v56, 1e-24 }
 0x579   :  { %6431 = vrsqrt.f32 %v4836_v24 }
 0x57a   :  { %v4829_v58 = vpop.xlane.xlu0 %4828 }
 0x57b   :  { %v4837_v34 = vmax.f32 %v4829_v58, 1e-24  ;;  %v4834_v18 = vpop.xlane.xlu1 %4833 }
 0x57c   :  { %v4838_v57 = vmax.f32 %v4834_v18, 1e-24 }
 0x57d   :  { %6433 = vrsqrt.f32 %v4837_v34 }
 0x57e   :  { %6435 = vrsqrt.f32 %v4838_v57 }
 0x581   :  { %v6430_v1 = vpop.eup %6429 }
 0x582   :  { %v4843_v6 = vmul.f32 %v6430_v1, %v8584_v22  ;;  %v4844_v10 = vmul.f32 %v6430_v1, %v8590_v52  ;;  %v4845_v26 = vmul.f32 %v6430_v1, %v8587_v29  ;;  %v4846_v51 = vmul.f32 %v6430_v1, %v8595_v12 }
 0x583   :  { %v6432_v36 = vpop.eup %6431  ;;  %v4892_v52 = vrot.slane %v4868_v0, %v8788_v14  ;;  %v4900_v12 = vrot.slane %v4868_v0, %v8789_v8 }
 0x584   :  { %v4909_v41 = vmul.f32 %v4872_v3, %v4843_v6  ;;  %v4910_v20 = vmul.f32 %v4876_v63, %v4844_v10  ;;  %v4847_v50 = vmul.f32 %v6432_v36, %v8598_v46  ;;  %v4848_v27 = vmul.f32 %v6432_v36, %v8606_v5 }
 0x585   :  { %v4849_v22 = vmul.f32 %v6432_v36, %v8603_v17  ;;  %v4911_v29 = vmul.f32 %v4880_v21, %v4845_v26  ;;  %v4912_v48 = vmul.f32 %v4884_v7, %v4846_v51  ;;  %v4850_v31 = vmul.f32 %v6432_v36, %v8611_v42 }
 0x586   :  { %v4925_v28 = vadd.f32 %v4910_v20, %v4909_v41  ;;  %v4913_v16 = vmul.f32 %v4872_v3, %v4847_v50  ;;  %v4914_v9 = vmul.f32 %v4876_v63, %v4848_v27 }
 0x587   :  { %v6434_v59 = vpop.eup %6433  ;;  %v4915_v54 = vmul.f32 %v4880_v21, %v4849_v22  ;;  %v4916_v61 = vmul.f32 %v4884_v7, %v4850_v31 }
 0x588   :  { %v6436_v15 = vpop.eup %6435  ;;  %v4926_v46 = vadd.f32 %v4925_v28, %v4911_v29  ;;  %v4851_v5 = vmul.f32 %v6434_v59, %v8622_v33  ;;  %v4852_v17 = vmul.f32 %v6434_v59, %v8628_v25  ;;  %v4853_v14 = vmul.f32 %v6434_v59, %v8625_v39 }
 0x589   :  { %v4930_v13 = vadd.f32 %v4914_v9, %v4913_v16  ;;  %v4855_v40 = vmul.f32 %v6436_v15, %v8636_v11  ;;  %v4856_v8 = vmul.f32 %v6436_v15, %v8644_v43  ;;  %v4854_v2 = vmul.f32 %v6434_v59, %v8633_v23 }
 0x58a   :  { %v4927_v60 = vadd.f32 %v4926_v46, %v4912_v48  ;;  %v4917_v42 = vmul.f32 %v4888_v4, %v4851_v5  ;;  %v4918_v38 = vmul.f32 %v4892_v52, %v4852_v17  ;;  %v4919_v35 = vmul.f32 %v4896_v55, %v4853_v14 }
 0x58b   :  { %v4931_v19 = vadd.f32 %v4930_v13, %v4915_v54  ;;  %v4857_v33 = vmul.f32 %v6436_v15, %v8641_v44  ;;  %v4858_v39 = vmul.f32 %v6436_v15, %v8651_v47  ;;  %v4921_v32 = vmul.f32 %v4888_v4, %v4855_v40 }
 0x58c   :  { %4928 = vadd.xlane.f32.xlu0 %v4927_v60  ;;  %v4935_v25 = vadd.f32 %v4918_v38, %v4917_v42  ;;  %v4922_v53 = vmul.f32 %v4892_v52, %v4856_v8  ;;  %v4920_v11 = vmul.f32 %v4900_v12, %v4854_v2 }
 0x58d   :  { %v4932_v45 = vadd.f32 %v4931_v19, %v4916_v61  ;;  %v4923_v43 = vmul.f32 %v4896_v55, %v4857_v33  ;;  %v4924_v30 = vmul.f32 %v4900_v12, %v4858_v39 }
 0x58e   :  { %v4936_v62 = vadd.f32 %v4935_v25, %v4919_v35  ;;  %v4940_v37 = vadd.f32 %v4922_v53, %v4921_v32 }
 0x58f   :  { %4933 = vadd.xlane.f32.xlu1 %v4932_v45 }
 0x590   :  { %v4937_v23 = vadd.f32 %v4936_v62, %v4920_v11  ;;  %v4941_v56 = vadd.f32 %v4940_v37, %v4923_v43 }
 0x592   :  { %4938 = vadd.xlane.f32.xlu0 %v4937_v23  ;;  %v4942_v24 = vadd.f32 %v4941_v56, %v4924_v30 }
 0x594   :  { %4943 = vadd.xlane.f32.xlu1 %v4942_v24 }
 0x619   :  { %v4929_v44 = vpop.xlane.xlu0 %4928 }
 0x61a   :  { %4946 = vst.msk [vmem:[%s8715_s13] sm:$0xff] %vm4945_vm4, %v4929_v44 }
 0x61c   :  { %v4934_v47 = vpop.xlane.xlu1 %4933 }
 0x61d   :  { %4947 = vst.msk [vmem:[%s8715_s13 + $0x8] sm:$0xff] %vm4945_vm4, %v4934_v47 }
 0x61f   :  { %v4939_v58 = vpop.xlane.xlu0 %4938 }
 0x620   :  { %4948 = vst.msk [vmem:[%s8715_s13 + $0x10] sm:$0xff] %vm4945_vm4, %v4939_v58 }
 0x621   :  { %v4944_v34 = vpop.xlane.xlu1 %4943 }
 0x622   :  { %4949 = vst.msk [vmem:[%s8715_s13 + $0x18] sm:$0xff] %vm4945_vm4, %v4944_v34 }

</bundles_post_ra>
